<compile_context>
chip_gen: v7x
topology: tpu7x:2x2x1
jax: 0.10.0
libtpu: 0.0.40
codegen_flags: <defaults>
</compile_context>

<pallas_src>
import functools
import numpy as np
import jax
import jax.numpy as jnp
from jax.experimental import pallas as pl
from jax.experimental.pallas import tpu as pltpu

KSIZE = 51
PAD = 25
BN_EPS = 1e-5


# ----------------------- host-side, one-time parameter prep -----------------------
def conv_circulant_matrix(w, L):
    """A s.t. flatten(conv_circular(x)) == flatten(x) @ A (channel-major)."""
    c_out, c_in, k_sz = w.shape
    A = np.zeros((c_in * L, c_out * L), np.float32)
    t = np.arange(L)
    for co in range(c_out):
        for ci in range(c_in):
            for k in range(k_sz):
                s = (t + k - PAD) % L
                A[ci * L + s, co * L + t] += w[co, ci, k]
    return A


def adaptive_avgpool_matrix(l_in, l_out):
    """P s.t. x @ P == AdaptiveAvgPool1d(l_out)(x) along the last dim."""
    P = np.zeros((l_in, l_out), np.float32)
    for i in range(l_out):
        s = (i * l_in) // l_out
        e = -((-(i + 1) * l_in) // l_out)  # ceil
        P[s:e, i] = 1.0 / (e - s)
    return P


def prepare_params(params, L, class_c):
    """Build bf16 BN-folded circulant matrices + f32 biases. Call ONCE, reuse."""
    args = []
    for (w, b, gamma, beta, mean, var) in params:
        w = np.asarray(w, np.float32)
        b = np.asarray(b, np.float32)
        gamma = np.asarray(gamma, np.float32)
        beta = np.asarray(beta, np.float32)
        mean = np.asarray(mean, np.float32)
        var = np.asarray(var, np.float32)

        A = conv_circulant_matrix(w, L)                      # (Cin*L, Cout*L)
        scale_c = gamma / np.sqrt(var + BN_EPS)
        A *= np.repeat(scale_c, L)[None, :]                  # fold BN scale into columns
        bias_c = (b - mean) * scale_c + beta                 # folded conv-bias + BN shift
        bias = np.repeat(bias_c, L)[None, :].astype(np.float32)

        args.append(jnp.asarray(A, jnp.bfloat16))            # bf16 weights: half the DMA
        args.append(jnp.asarray(bias, jnp.float32))

    c_last = np.asarray(params[-1][0]).shape[0]
    P = adaptive_avgpool_matrix(c_last * L, class_c)
    args.append(jnp.asarray(P, jnp.bfloat16))
    return tuple(args)


# ----------------------------------- kernel -----------------------------------
def cnn_kernel(x_ref,
               a1_ref, b1_ref, a2_ref, b2_ref,
               a3_ref, b3_ref, a4_ref, b4_ref,
               p_ref, o_ref):
    def conv_bn_relu(h, a_ref, b_ref):
        # bf16 x bf16 -> f32 accumulation on the MXU, bias+ReLU on the VPU.
        y = jnp.dot(h, a_ref[...], preferred_element_type=jnp.float32)
        return jnp.maximum(y + b_ref[...], 0.0).astype(jnp.bfloat16)

    h = x_ref[...]                                           # (TN, Cin*L) bf16
    h = conv_bn_relu(h, a1_ref, b1_ref)                      # conv1 + BN1 + ReLU
    h = conv_bn_relu(h, a2_ref, b2_ref)                      # conv2 + BN2 + ReLU
    h = conv_bn_relu(h, a3_ref, b3_ref)                      # conv3 + BN3 + ReLU
    # TODO(synk): training-mode Dropout (random masking) not implemented; eval identity.
    h = conv_bn_relu(h, a4_ref, b4_ref)                      # conv4 + BN4 + ReLU

    # x.view(N, -1) already matches this layout; AdaptiveAvgPool1d as matmul.
    z = jnp.dot(h, p_ref[...], preferred_element_type=jnp.float32)   # (TN, class_c)

    # softmax over dim=1 (EUP exp + approx reciprocal, no VALU divide)
    z = z - jnp.max(z, axis=1, keepdims=True)
    e = jnp.exp(z)
    o_ref[...] = e * pl.reciprocal(jnp.sum(e, axis=1, keepdims=True), approx=True)


# ----------------------------------- wrapper -----------------------------------
@functools.partial(jax.jit, static_argnames=("class_c",))
def cnn_without_fc(x, prepared, class_c):
    """x: (N, in_ch, L) float32, PyTorch NCL layout. `prepared` = prepare_params(...)."""
    N, in_ch, L = x.shape
    x2d = x.reshape(N, in_ch * L).astype(jnp.bfloat16)

    # Pad the batch to a sublane-aligned tile and grid over it so the (VMEM-resident)
    # weight stream is amortized over many rows; "parallel" lets v7x use both cores.
    TN = 128 if N > 128 else max(8, -(-N // 8) * 8)
    Npad = -(-N // TN) * TN
    if Npad != N:
        x2d = jnp.pad(x2d, ((0, Npad - N), (0, 0)))

    in_specs = [pl.BlockSpec((TN, in_ch * L), lambda i: (i, 0))]
    # Constant index_map: weights/biases/pool matrix stay resident across grid steps.
    in_specs += [pl.BlockSpec(a.shape, lambda i: (0, 0)) for a in prepared]

    out = pl.pallas_call(
        cnn_kernel,
        out_shape=jax.ShapeDtypeStruct((Npad, class_c), jnp.float32),
        grid=(Npad // TN,),
        in_specs=in_specs,
        out_specs=pl.BlockSpec((TN, class_c), lambda i: (i, 0)),
        compiler_params=pltpu.CompilerParams(
            dimension_semantics=("parallel",),
            vmem_limit_bytes=64 << 20),
    )(x2d, *prepared)
    return out[:N]


# ------------------------------ deterministic init ------------------------------
def init_params(key):
    layer_dims = [(1, 8), (8, 4), (4, 8), (8, 2)]  # (in_ch, out_ch) per conv layer
    params = []
    for (ci, co) in layer_dims:
        key, kw, kb, kg, kbe, km, kv = jax.random.split(key, 7)
        w = 0.05 * jax.random.normal(kw, (co, ci, KSIZE), jnp.float32)
        b = 0.05 * jax.random.normal(kb, (co,), jnp.float32)
        gamma = 1.0 + 0.1 * jax.random.normal(kg, (co,), jnp.float32)
        beta = 0.1 * jax.random.normal(kbe, (co,), jnp.float32)
        mean = 0.1 * jax.random.normal(km, (co,), jnp.float32)
        var = 1.0 + 0.1 * jnp.abs(jax.random.normal(kv, (co,), jnp.float32))
        params.append((w, b, gamma, beta, mean, var))
    return params


# ------------------------------- numpy reference -------------------------------
def ref_circular_conv(x, w, b):
    N, c_in, L = x.shape
    c_out = w.shape[0]
    y = np.zeros((N, c_out, L), np.float32)
    idx = np.arange(L)
    for k in range(KSIZE):
        xs = x[:, :, (idx + k - PAD) % L]
        y += np.einsum('oi,nil->nol', w[:, :, k], xs)
    return y + b[None, :, None]


def reference_forward(x, params, class_c):
    h = x.astype(np.float32)
    for (w, b, gamma, beta, mean, var) in params:
        h = ref_circular_conv(h, w, b)
        h = (h - mean[None, :, None]) / np.sqrt(var[None, :, None] + BN_EPS) \
            * gamma[None, :, None] + beta[None, :, None]
        h = np.maximum(h, 0.0)
    N = h.shape[0]
    flat = h.reshape(N, -1)
    l_in = flat.shape[1]
    pooled = np.zeros((N, class_c), np.float32)
    for i in range(class_c):
        s = (i * l_in) // class_c
        e = -((-(i + 1) * l_in) // class_c)
        pooled[:, i] = flat[:, s:e].mean(axis=1)
    z = pooled - pooled.max(axis=1, keepdims=True)
    ez = np.exp(z)
    return ez / ez.sum(axis=1, keepdims=True)


if __name__ == "__main__":
    N, in_ch, L, class_c = 2, 1, 128, 4   # feature_n = 128, class_c = 4
    key = jax.random.PRNGKey(0)
    kx, kp = jax.random.split(key)
    x = jax.random.normal(kx, (N, in_ch, L), jnp.float32)
    params = init_params(kp)

    prepared = prepare_params(
        [tuple(np.asarray(t) for t in p) for p in params], L, class_c)  # once, reused
    out = jax.block_until_ready(cnn_without_fc(x, prepared, class_c))

    ref = reference_forward(np.asarray(x),
                            [tuple(np.asarray(t) for t in p) for p in params],
                            class_c)
    np.testing.assert_allclose(np.asarray(out), ref, rtol=5e-2, atol=1e-2)
    print("KERNEL_OK")
</pallas_src>

<mosaic_0001>
module attributes {stable_mosaic.version = 11 : i64} {
  func.func @cnn_kernel(%arg0: i32, %arg1: memref<8x128xbf16, #tpu.memory_space<vmem>>, %arg2: memref<128x1024xbf16, #tpu.memory_space<vmem>>, %arg3: memref<1x1024xf32, #tpu.memory_space<vmem>>, %arg4: memref<1024x512xbf16, #tpu.memory_space<vmem>>, %arg5: memref<1x512xf32, #tpu.memory_space<vmem>>, %arg6: memref<512x1024xbf16, #tpu.memory_space<vmem>>, %arg7: memref<1x1024xf32, #tpu.memory_space<vmem>>, %arg8: memref<1024x256xbf16, #tpu.memory_space<vmem>>, %arg9: memref<1x256xf32, #tpu.memory_space<vmem>>, %arg10: memref<256x4xbf16, #tpu.memory_space<vmem>>, %arg11: memref<8x4xf32, #tpu.memory_space<vmem>>) attributes {dimension_semantics = [#tpu.dimension_semantics<parallel>], iteration_bounds = array<i64: 1>, scalar_prefetch = 0 : i64, scratch_operands = 0 : i64, tpu.core_type = #tpu.core_type<tc>, window_params = [{transform_indices = @transform_0, window_bounds = array<i64: 8, 128>}, {pipeline_mode = #tpu.pipeline_mode<synchronous>, transform_indices = @transform_1, window_bounds = array<i64: 128, 1024>}, {pipeline_mode = #tpu.pipeline_mode<synchronous>, transform_indices = @transform_2, window_bounds = array<i64: 1, 1024>}, {pipeline_mode = #tpu.pipeline_mode<synchronous>, transform_indices = @transform_3, window_bounds = array<i64: 1024, 512>}, {pipeline_mode = #tpu.pipeline_mode<synchronous>, transform_indices = @transform_4, window_bounds = array<i64: 1, 512>}, {pipeline_mode = #tpu.pipeline_mode<synchronous>, transform_indices = @transform_5, window_bounds = array<i64: 512, 1024>}, {pipeline_mode = #tpu.pipeline_mode<synchronous>, transform_indices = @transform_6, window_bounds = array<i64: 1, 1024>}, {pipeline_mode = #tpu.pipeline_mode<synchronous>, transform_indices = @transform_7, window_bounds = array<i64: 1024, 256>}, {pipeline_mode = #tpu.pipeline_mode<synchronous>, transform_indices = @transform_8, window_bounds = array<i64: 1, 256>}, {pipeline_mode = #tpu.pipeline_mode<synchronous>, transform_indices = @transform_9, window_bounds = array<i64: 256, 4>}, {transform_indices = @transform_10, window_bounds = array<i64: 8, 4>}]} {
    %c0 = arith.constant 0 : index
    %c0_0 = arith.constant 0 : index
    %0 = vector.load %arg1[%c0, %c0_0] : memref<8x128xbf16, #tpu.memory_space<vmem>>, vector<8x128xbf16>
    %c0_1 = arith.constant 0 : index
    %c0_2 = arith.constant 0 : index
    %1 = vector.load %arg2[%c0_1, %c0_2] : memref<128x1024xbf16, #tpu.memory_space<vmem>>, vector<128x1024xbf16>
    %cst = arith.constant dense<0.000000e+00> : vector<8x1024xf32>
    %2 = tpu.matmul %0, %1, %cst {dimension_numbers = #tpu.dot_dimension_numbers<[1], [0], [0], [1], [0, 0, 1, 1], [], []>} : vector<8x128xbf16>, vector<128x1024xbf16>, vector<8x1024xf32> -> vector<8x1024xf32>
    %c0_3 = arith.constant 0 : index
    %c0_4 = arith.constant 0 : index
    %3 = vector.load %arg3[%c0_3, %c0_4] : memref<1x1024xf32, #tpu.memory_space<vmem>>, vector<1x1024xf32>
    %4 = vector.broadcast %3 : vector<1x1024xf32> to vector<8x1024xf32>
    %5 = arith.addf %2, %4 : vector<8x1024xf32>
    %cst_5 = arith.constant 0.000000e+00 : f32
    %6 = vector.broadcast %cst_5 : f32 to vector<8x1024xf32>
    %7 = arith.maximumf %5, %6 : vector<8x1024xf32>
    %8 = arith.truncf %7 : vector<8x1024xf32> to vector<8x1024xbf16>
    %c0_6 = arith.constant 0 : index
    %c0_7 = arith.constant 0 : index
    %9 = vector.load %arg4[%c0_6, %c0_7] : memref<1024x512xbf16, #tpu.memory_space<vmem>>, vector<1024x512xbf16>
    %cst_8 = arith.constant dense<0.000000e+00> : vector<8x512xf32>
    %10 = tpu.matmul %8, %9, %cst_8 {dimension_numbers = #tpu.dot_dimension_numbers<[1], [0], [0], [1], [0, 0, 1, 1], [], []>} : vector<8x1024xbf16>, vector<1024x512xbf16>, vector<8x512xf32> -> vector<8x512xf32>
    %c0_9 = arith.constant 0 : index
    %c0_10 = arith.constant 0 : index
    %11 = vector.load %arg5[%c0_9, %c0_10] : memref<1x512xf32, #tpu.memory_space<vmem>>, vector<1x512xf32>
    %12 = vector.broadcast %11 : vector<1x512xf32> to vector<8x512xf32>
    %13 = arith.addf %10, %12 : vector<8x512xf32>
    %cst_11 = arith.constant 0.000000e+00 : f32
    %14 = vector.broadcast %cst_11 : f32 to vector<8x512xf32>
    %15 = arith.maximumf %13, %14 : vector<8x512xf32>
    %16 = arith.truncf %15 : vector<8x512xf32> to vector<8x512xbf16>
    %c0_12 = arith.constant 0 : index
    %c0_13 = arith.constant 0 : index
    %17 = vector.load %arg6[%c0_12, %c0_13] : memref<512x1024xbf16, #tpu.memory_space<vmem>>, vector<512x1024xbf16>
    %cst_14 = arith.constant dense<0.000000e+00> : vector<8x1024xf32>
    %18 = tpu.matmul %16, %17, %cst_14 {dimension_numbers = #tpu.dot_dimension_numbers<[1], [0], [0], [1], [0, 0, 1, 1], [], []>} : vector<8x512xbf16>, vector<512x1024xbf16>, vector<8x1024xf32> -> vector<8x1024xf32>
    %c0_15 = arith.constant 0 : index
    %c0_16 = arith.constant 0 : index
    %19 = vector.load %arg7[%c0_15, %c0_16] : memref<1x1024xf32, #tpu.memory_space<vmem>>, vector<1x1024xf32>
    %20 = vector.broadcast %19 : vector<1x1024xf32> to vector<8x1024xf32>
    %21 = arith.addf %18, %20 : vector<8x1024xf32>
    %cst_17 = arith.constant 0.000000e+00 : f32
    %22 = vector.broadcast %cst_17 : f32 to vector<8x1024xf32>
    %23 = arith.maximumf %21, %22 : vector<8x1024xf32>
    %24 = arith.truncf %23 : vector<8x1024xf32> to vector<8x1024xbf16>
    %c0_18 = arith.constant 0 : index
    %c0_19 = arith.constant 0 : index
    %25 = vector.load %arg8[%c0_18, %c0_19] : memref<1024x256xbf16, #tpu.memory_space<vmem>>, vector<1024x256xbf16>
    %cst_20 = arith.constant dense<0.000000e+00> : vector<8x256xf32>
    %26 = tpu.matmul %24, %25, %cst_20 {dimension_numbers = #tpu.dot_dimension_numbers<[1], [0], [0], [1], [0, 0, 1, 1], [], []>} : vector<8x1024xbf16>, vector<1024x256xbf16>, vector<8x256xf32> -> vector<8x256xf32>
    %c0_21 = arith.constant 0 : index
    %c0_22 = arith.constant 0 : index
    %27 = vector.load %arg9[%c0_21, %c0_22] : memref<1x256xf32, #tpu.memory_space<vmem>>, vector<1x256xf32>
    %28 = vector.broadcast %27 : vector<1x256xf32> to vector<8x256xf32>
    %29 = arith.addf %26, %28 : vector<8x256xf32>
    %cst_23 = arith.constant 0.000000e+00 : f32
    %30 = vector.broadcast %cst_23 : f32 to vector<8x256xf32>
    %31 = arith.maximumf %29, %30 : vector<8x256xf32>
    %32 = arith.truncf %31 : vector<8x256xf32> to vector<8x256xbf16>
    %c0_24 = arith.constant 0 : index
    %c0_25 = arith.constant 0 : index
    %33 = vector.load %arg10[%c0_24, %c0_25] : memref<256x4xbf16, #tpu.memory_space<vmem>>, vector<256x4xbf16>
    %cst_26 = arith.constant dense<0.000000e+00> : vector<8x4xf32>
    %34 = tpu.matmul %32, %33, %cst_26 {dimension_numbers = #tpu.dot_dimension_numbers<[1], [0], [0], [1], [0, 0, 1, 1], [], []>} : vector<8x256xbf16>, vector<256x4xbf16>, vector<8x4xf32> -> vector<8x4xf32>
    %cst_27 = arith.constant dense<0xFF800000> : vector<8xf32>
    %35 = vector.multi_reduction <maximumf>, %34, %cst_27 [1] : vector<8x4xf32> to vector<8xf32>
    %36 = vector.shape_cast %35 : vector<8xf32> to vector<8x1xf32>
    %37 = vector.broadcast %36 : vector<8x1xf32> to vector<8x4xf32>
    %38 = arith.subf %34, %37 : vector<8x4xf32>
    %39 = math.exp %38 : vector<8x4xf32>
    %cst_28 = arith.constant dense<0.000000e+00> : vector<8xf32>
    %40 = vector.multi_reduction <add>, %39, %cst_28 [1] : vector<8x4xf32> to vector<8xf32>
    %41 = vector.shape_cast %40 : vector<8xf32> to vector<8x1xf32>
    %42 = tpu.reciprocal %41 {approx = true} : vector<8x1xf32> -> vector<8x1xf32>
    %43 = vector.broadcast %42 : vector<8x1xf32> to vector<8x4xf32>
    %44 = arith.mulf %39, %43 : vector<8x4xf32>
    %c0_29 = arith.constant 0 : index
    %c0_30 = arith.constant 0 : index
    %45 = vector.load %arg11[%c0_29, %c0_30] : memref<8x4xf32, #tpu.memory_space<vmem>>, vector<8x4xf32>
    tpu.vector_store %arg11[%c0_29, %c0_30], %44 {strides = array<i32>} : memref<8x4xf32, #tpu.memory_space<vmem>>, vector<8x4xf32>,
    return
  }
  func.func @transform_0(%arg0: i32) -> (i32, i32) {
    %c0_i32 = arith.constant 0 : i32
    %c0_i32_0 = arith.constant 0 : i32
    return %arg0, %c0_i32 : i32, i32
  }
  func.func @transform_1(%arg0: i32) -> (i32, i32) {
    %c0_i32 = arith.constant 0 : i32
    %c0_i32_0 = arith.constant 0 : i32
    %c0_i32_1 = arith.constant 0 : i32
    return %c0_i32, %c0_i32_0 : i32, i32
  }
  func.func @transform_2(%arg0: i32) -> (i32, i32) {
    %c0_i32 = arith.constant 0 : i32
    %c0_i32_0 = arith.constant 0 : i32
    %c0_i32_1 = arith.constant 0 : i32
    return %c0_i32, %c0_i32_0 : i32, i32
  }
  func.func @transform_3(%arg0: i32) -> (i32, i32) {
    %c0_i32 = arith.constant 0 : i32
    %c0_i32_0 = arith.constant 0 : i32
    %c0_i32_1 = arith.constant 0 : i32
    return %c0_i32, %c0_i32_0 : i32, i32
  }
  func.func @transform_4(%arg0: i32) -> (i32, i32) {
    %c0_i32 = arith.constant 0 : i32
    %c0_i32_0 = arith.constant 0 : i32
    %c0_i32_1 = arith.constant 0 : i32
    return %c0_i32, %c0_i32_0 : i32, i32
  }
  func.func @transform_5(%arg0: i32) -> (i32, i32) {
    %c0_i32 = arith.constant 0 : i32
    %c0_i32_0 = arith.constant 0 : i32
    %c0_i32_1 = arith.constant 0 : i32
    return %c0_i32, %c0_i32_0 : i32, i32
  }
  func.func @transform_6(%arg0: i32) -> (i32, i32) {
    %c0_i32 = arith.constant 0 : i32
    %c0_i32_0 = arith.constant 0 : i32
    %c0_i32_1 = arith.constant 0 : i32
    return %c0_i32, %c0_i32_0 : i32, i32
  }
  func.func @transform_7(%arg0: i32) -> (i32, i32) {
    %c0_i32 = arith.constant 0 : i32
    %c0_i32_0 = arith.constant 0 : i32
    %c0_i32_1 = arith.constant 0 : i32
    return %c0_i32, %c0_i32_0 : i32, i32
  }
  func.func @transform_8(%arg0: i32) -> (i32, i32) {
    %c0_i32 = arith.constant 0 : i32
    %c0_i32_0 = arith.constant 0 : i32
    %c0_i32_1 = arith.constant 0 : i32
    return %c0_i32, %c0_i32_0 : i32, i32
  }
  func.func @transform_9(%arg0: i32) -> (i32, i32) {
    %c0_i32 = arith.constant 0 : i32
    %c0_i32_0 = arith.constant 0 : i32
    %c0_i32_1 = arith.constant 0 : i32
    return %c0_i32, %c0_i32_0 : i32, i32
  }
  func.func @transform_10(%arg0: i32) -> (i32, i32) {
    %c0_i32 = arith.constant 0 : i32
    %c0_i32_0 = arith.constant 0 : i32
    return %arg0, %c0_i32 : i32, i32
  }
}

</mosaic_0001>

<bundles_post_ra>
// kernel: cnn_without_fc.1
= control target key start
LH: loop header
LB: loop body
LE: loop exit
PB: predicated region body
PF: predicated region fallthrough
CT: control target
= control target key end

     0   :  { %15 = vsyncpa [#allocation3], 0  ;;  %s7811_s0 = inlined_call_operand.hbm [shape: bf16[8,128], index: 0, kind: input, shape index: {}]   ;;  %s7812_s1 = inlined_call_operand.hbm [shape: bf16[128,1024], index: 1, kind: input, shape index: {}]   ;;  %s7813_s2 = inlined_call_operand.hbm [shape: f32[1,1024], index: 2, kind: input, shape index: {}]   ;;  %s7814_s3 = inlined_call_operand.hbm [shape: bf16[1024,512], index: 3, kind: input, shape index: {}]   ;;  %s7815_s4 = inlined_call_operand.hbm [shape: f32[1,512], index: 4, kind: input, shape index: {}]   ;;  %s7816_s5 = inlined_call_operand.hbm [shape: bf16[512,1024], index: 5, kind: input, shape index: {}]   ;;  %s7817_s6 = inlined_call_operand.hbm [shape: f32[1,1024], index: 6, kind: input, shape index: {}]   ;;  %s7818_s7 = inlined_call_operand.hbm [shape: bf16[1024,256], index: 7, kind: input, shape index: {}]   ;;  %s7819_s8 = inlined_call_operand.hbm [shape: f32[1,256], index: 8, kind: input, shape index: {}]   ;;  %s7820_s9 = inlined_call_operand.hbm [shape: bf16[256,4], index: 9, kind: input, shape index: {}]   ;;  %s7821_s10 = inlined_call_operand.hbm [shape: f32[8,4], index: 10, kind: output, shape index: {}]  }
   0x1   :  { %16 = vsyncpa [#allocation6], 0 }
   0x2   :  { %17 = vsyncpa [#allocation9], 0 }
   0x3   :  { %18 = vsyncpa [#allocation12], 0 }
   0x4   :  { %19 = vsyncpa [#allocation15], 0 }
   0x5   :  { %20 = vsyncpa [#allocation18], 0 }
   0x6   :  { %21 = vsyncpa [#allocation4], 0  ;;  %s7413_s13 = smov [#allocation5]   ;;  %s7157_s17 = scalar_lea.hbm %s7812_s1, 8192 }
   0x7   :  { %s37_s14 = sshll.u32 %s7413_s13, 4  ;;  %p7158_p0 = scmp.ne.s32.totalorder %s7812_s1, %s7157_s17  ;;  %s38_s14 = int_to_ptr.vmem [resolvable:$true] %s37_s14 }
   0x8   :  { %p7161_p1 = scmp.lt.u32.totalorder %s7157_s17, %s7812_s1 }
   0xa   :  { %p7163_p2 = pnand %p7161_p1, %p7158_p0 }
   0xc   :  { %7166 = shalt.err (!%p7163_p2)
}
   0xd   :  { %s7167_s22 = scalar_lea.vmem %s38_s14, 8192  ;;  %p7172_p4 = scmp.lt.s32.totalorder %s38_s14, %s38_s14 }
   0xe   :  { %p7168_p3 = scmp.ne.s32.totalorder %s38_s14, %s7167_s22  ;;  %p7173_p5 = scmp.lt.s32.totalorder %s7167_s22, %s7167_s22 }
  0x10   :  { %p7174_p6 = por %p7173_p5, %p7172_p4 }
  0x12   :  { %p7175_p7 = pnand %p7174_p6, %p7168_p3 }
  0x14   :  { %7178 = shalt.err (!%p7175_p7)
}
  0x15   :  { %s7414_s23 = smov 512   ;;  %s7415_s24 = smov 32  }
  0x16   :  { %43 = dma.hbm_to_vmem [thread:$0]  %s7812_s1, 8192, %s38_s14, [#allocation6], %s7414_s23, %s7414_s23, %s7415_s24  }
  0x17   :  { %s7416_s27 = smov [#allocation8]   ;;  %s7179_s11 = scalar_lea.hbm %s7814_s3, 32768 }
  0x18   :  { %s59_s28 = sshll.u32 %s7416_s27, 4  ;;  %p7180_p8 = scmp.ne.s32.totalorder %s7814_s3, %s7179_s11  ;;  %s60_s28 = int_to_ptr.vmem [resolvable:$true] %s59_s28 }
  0x19   :  { %p7183_p9 = scmp.lt.u32.totalorder %s7179_s11, %s7814_s3 }
  0x1b   :  { %p7185_p10 = pnand %p7183_p9, %p7180_p8 }
  0x1d   :  { %7188 = shalt.err (!%p7185_p10)
}
  0x1e   :  { %s7189_s17 = scalar_lea.vmem %s60_s28, 32768  ;;  %p7194_p12 = scmp.lt.s32.totalorder %s60_s28, %s60_s28 }
  0x1f   :  { %p7190_p11 = scmp.ne.s32.totalorder %s60_s28, %s7189_s17  ;;  %p7195_p13 = scmp.lt.s32.totalorder %s7189_s17, %s7189_s17 }
  0x21   :  { %p7196_p0 = por %p7195_p13, %p7194_p12 }
  0x23   :  { %p7197_p1 = pnand %p7196_p0, %p7190_p11 }
  0x25   :  { %7200 = shalt.err (!%p7197_p1)
}
  0x26   :  { %s7417_s1 = smov 256   ;;  %s7418_s14 = smov 16  }
  0x27   :  { %65 = dma.hbm_to_vmem [thread:$0]  %s7814_s3, 32768, %s60_s28, [#allocation9], %s7417_s1, %s7417_s1, %s7418_s14  }
  0x28   :  { %s7419_s20 = smov [#allocation11]   ;;  %s7420_s22 = smov [#allocation14]  }
  0x29   :  { %s81_s21 = sshll.u32 %s7419_s20, 4  ;;  %s103_s25 = sshll.u32 %s7420_s22, 4  ;;  %s82_s21 = int_to_ptr.vmem [resolvable:$true] %s81_s21  ;;  %s7515_s25 = int_to_ptr.vmem [resolvable:$true] %s103_s25 }
  0x2a   :  { %s7201_s29 = scalar_lea.hbm %s7816_s5, 32768 }
  0x2b   :  { %p7202_p2 = scmp.ne.s32.totalorder %s7816_s5, %s7201_s29  ;;  %p7205_p3 = scmp.lt.u32.totalorder %s7201_s29, %s7816_s5 }
  0x2d   :  { %p7207_p4 = pnand %p7205_p3, %p7202_p2 }
  0x2f   :  { %7210 = shalt.err (!%p7207_p4)
}
  0x30   :  { %s7211_s3 = scalar_lea.vmem %s82_s21, 32768  ;;  %p7216_p6 = scmp.lt.s32.totalorder %s82_s21, %s82_s21 }
  0x31   :  { %p7212_p5 = scmp.ne.s32.totalorder %s82_s21, %s7211_s3  ;;  %p7217_p7 = scmp.lt.s32.totalorder %s7211_s3, %s7211_s3 }
  0x33   :  { %p7218_p8 = por %p7217_p7, %p7216_p6 }
  0x35   :  { %p7219_p9 = pnand %p7218_p8, %p7212_p5 }
  0x37   :  { %7222 = shalt.err (!%p7219_p9)
}
  0x38   :  { %87 = dma.hbm_to_vmem [thread:$0]  %s7816_s5, 32768, %s82_s21, [#allocation12], %s7414_s23, %s7414_s23, %s7415_s24  }
  0x39   :  { %s7223_s1 = scalar_lea.hbm %s7818_s7, 16384 }
  0x3a   :  { %p7224_p10 = scmp.ne.s32.totalorder %s7818_s7, %s7223_s1  ;;  %p7227_p11 = scmp.lt.u32.totalorder %s7223_s1, %s7818_s7 }
  0x3c   :  { %p7229_p12 = pnand %p7227_p11, %p7224_p10 }
  0x3e   :  { %7232 = shalt.err (!%p7229_p12)
}
  0x3f   :  { %s7233_s22 = scalar_lea.vmem %s7515_s25, 16384  ;;  %p7238_p0 = scmp.lt.s32.totalorder %s7515_s25, %s7515_s25 }
  0x40   :  { %p7234_p13 = scmp.ne.s32.totalorder %s7515_s25, %s7233_s22  ;;  %p7239_p1 = scmp.lt.s32.totalorder %s7233_s22, %s7233_s22 }
  0x42   :  { %p7240_p2 = por %p7239_p1, %p7238_p0 }
  0x44   :  { %p7241_p3 = pnand %p7240_p2, %p7234_p13 }
  0x46   :  { %7244 = shalt.err (!%p7241_p3)
}
  0x47   :  { %s7421_s5 = smov 128   ;;  %s7422_s23 = smov 8  }
  0x48   :  { %109 = dma.hbm_to_vmem [thread:$0]  %s7818_s7, 16384, %s7515_s25, [#allocation15], %s7421_s5, %s7421_s5, %s7422_s23  }
  0x49   :  { %s7423_s26 = smov [#allocation2]   ;;  %s7424_s29 = smov [#allocation7]  }
  0x4a   :  { %s28_s27 = sshll.u32 %s7423_s26, 4  ;;  %s50_s30 = sshll.u32 %s7424_s29, 4  ;;  %s29_s27 = int_to_ptr.vmem [resolvable:$true] %s28_s27  ;;  %s51_s30 = int_to_ptr.vmem [resolvable:$true] %s50_s30 }
  0x4b   :  { %s7245_s13 = scalar_lea.hbm %s7811_s0, 64 }
  0x4c   :  { %p7246_p4 = scmp.ne.s32.totalorder %s7811_s0, %s7245_s13  ;;  %p7249_p5 = scmp.lt.u32.totalorder %s7245_s13, %s7811_s0 }
  0x4e   :  { %p7251_p6 = pnand %p7249_p5, %p7246_p4 }
  0x50   :  { %7254 = shalt.err (!%p7251_p6)
}
  0x51   :  { %s7255_s7 = scalar_lea.vmem %s29_s27, 64  ;;  %p7260_p8 = scmp.lt.s32.totalorder %s29_s27, %s29_s27 }
  0x52   :  { %p7256_p7 = scmp.ne.s32.totalorder %s29_s27, %s7255_s7  ;;  %p7261_p9 = scmp.lt.s32.totalorder %s7255_s7, %s7255_s7 }
  0x54   :  { %p7262_p10 = por %p7261_p9, %p7260_p8 }
  0x56   :  { %p7263_p11 = pnand %p7262_p10, %p7256_p7 }
  0x58   :  { %7266 = shalt.err (!%p7263_p11)
}
  0x59   :  { %31 = dma.hbm_to_vmem [thread:$0]  %s7811_s0, 64, %s29_s27, [#allocation3]  }
  0x5a   :  { %s7267_s18 = scalar_lea.hbm %s7813_s2, 128 }
  0x5b   :  { %p7268_p12 = scmp.ne.s32.totalorder %s7813_s2, %s7267_s18  ;;  %p7271_p13 = scmp.lt.u32.totalorder %s7267_s18, %s7813_s2 }
  0x5d   :  { %p7273_p0 = pnand %p7271_p13, %p7268_p12 }
  0x5f   :  { %7276 = shalt.err (!%p7273_p0)
}
  0x60   :  { %s7277_s23 = scalar_lea.vmem %s51_s30, 128  ;;  %p7282_p2 = scmp.lt.s32.totalorder %s51_s30, %s51_s30 }
  0x61   :  { %p7278_p1 = scmp.ne.s32.totalorder %s51_s30, %s7277_s23  ;;  %p7283_p3 = scmp.lt.s32.totalorder %s7277_s23, %s7277_s23 }
  0x63   :  { %p7284_p4 = por %p7283_p3, %p7282_p2 }
  0x65   :  { %p7285_p5 = pnand %p7284_p4, %p7278_p1 }
  0x67   :  { %7288 = shalt.err (!%p7285_p5)
}
  0x68   :  { %53 = dma.hbm_to_vmem [thread:$0]  %s7813_s2, 128, %s51_s30, [#allocation6]  }
  0x69   :  { %s7425_s21 = smov [#allocation10]   ;;  %s7426_s27 = smov [#allocation13]  }
  0x6a   :  { %s72_s26 = sshll.u32 %s7425_s21, 4  ;;  %s94_s29 = sshll.u32 %s7426_s27, 4  ;;  %s73_s26 = int_to_ptr.vmem [resolvable:$true] %s72_s26  ;;  %s95_s29 = int_to_ptr.vmem [resolvable:$true] %s94_s29 }
  0x6b   :  { %s7289_s13 = scalar_lea.hbm %s7815_s4, 64 }
  0x6c   :  { %p7290_p6 = scmp.ne.s32.totalorder %s7815_s4, %s7289_s13  ;;  %p7293_p7 = scmp.lt.u32.totalorder %s7289_s13, %s7815_s4 }
  0x6e   :  { %p7295_p8 = pnand %p7293_p7, %p7290_p6 }
  0x70   :  { %7298 = shalt.err (!%p7295_p8)
}
  0x71   :  { %s7299_s2 = scalar_lea.vmem %s73_s26, 64  ;;  %p7304_p10 = scmp.lt.s32.totalorder %s73_s26, %s73_s26 }
  0x72   :  { %p7300_p9 = scmp.ne.s32.totalorder %s73_s26, %s7299_s2  ;;  %p7305_p11 = scmp.lt.s32.totalorder %s7299_s2, %s7299_s2 }
  0x74   :  { %p7306_p12 = por %p7305_p11, %p7304_p10 }
  0x76   :  { %p7307_p13 = pnand %p7306_p12, %p7300_p9 }
  0x78   :  { %7310 = shalt.err (!%p7307_p13)
}
  0x79   :  { %75 = dma.hbm_to_vmem [thread:$0]  %s7815_s4, 64, %s73_s26, [#allocation9]  }
  0x7a   :  { %s7311_s1 = scalar_lea.hbm %s7817_s6, 128 }
  0x7b   :  { %p7312_p0 = scmp.ne.s32.totalorder %s7817_s6, %s7311_s1  ;;  %p7315_p1 = scmp.lt.u32.totalorder %s7311_s1, %s7817_s6 }
  0x7d   :  { %p7317_p2 = pnand %p7315_p1, %p7312_p0 }
  0x7f   :  { %7320 = shalt.err (!%p7317_p2)
}
  0x80   :  { %s7321_s22 = scalar_lea.vmem %s95_s29, 128  ;;  %p7326_p4 = scmp.lt.s32.totalorder %s95_s29, %s95_s29 }
  0x81   :  { %p7322_p3 = scmp.ne.s32.totalorder %s95_s29, %s7321_s22  ;;  %p7327_p5 = scmp.lt.s32.totalorder %s7321_s22, %s7321_s22 }
  0x83   :  { %p7328_p6 = por %p7327_p5, %p7326_p4 }
  0x85   :  { %p7329_p7 = pnand %p7328_p6, %p7322_p3 }
  0x87   :  { %7332 = shalt.err (!%p7329_p7)
}
  0x88   :  { %97 = dma.hbm_to_vmem [thread:$0]  %s7817_s6, 128, %s95_s29, [#allocation12]  }
  0x89   :  { %s7427_s23 = smov [#allocation16]   ;;  %s7428_s24 = smov [#allocation17]  }
  0x8a   :  { %s116_s0 = sshll.u32 %s7427_s23, 4  ;;  %s125_s21 = sshll.u32 %s7428_s24, 4  ;;  %s117_s0 = int_to_ptr.vmem [resolvable:$true] %s116_s0  ;;  %s7597_s21 = int_to_ptr.vmem [resolvable:$true] %s125_s21 }
  0x8b   :  { %s7333_s11 = scalar_lea.hbm %s7819_s8, 32 }
  0x8c   :  { %p7334_p8 = scmp.ne.s32.totalorder %s7819_s8, %s7333_s11  ;;  %p7337_p9 = scmp.lt.u32.totalorder %s7333_s11, %s7819_s8 }
  0x8e   :  { %p7339_p10 = pnand %p7337_p9, %p7334_p8 }
  0x90   :  { %7342 = shalt.err (!%p7339_p10)
}
  0x91   :  { %s7343_s6 = scalar_lea.vmem %s117_s0, 32  ;;  %p7348_p12 = scmp.lt.s32.totalorder %s117_s0, %s117_s0 }
  0x92   :  { %p7344_p11 = scmp.ne.s32.totalorder %s117_s0, %s7343_s6  ;;  %p7349_p13 = scmp.lt.s32.totalorder %s7343_s6, %s7343_s6 }
  0x94   :  { %p7350_p0 = por %p7349_p13, %p7348_p12 }
  0x96   :  { %p7351_p1 = pnand %p7350_p0, %p7344_p11 }
  0x98   :  { %7354 = shalt.err (!%p7351_p1)
}
  0x99   :  { %119 = dma.hbm_to_vmem [thread:$0]  %s7819_s8, 32, %s117_s0, [#allocation15]  }
  0x9a   :  { %s7355_s30 = scalar_lea.hbm %s7820_s9, 2048 }
  0x9b   :  { %p7356_p2 = scmp.ne.s32.totalorder %s7820_s9, %s7355_s30  ;;  %p7359_p3 = scmp.lt.u32.totalorder %s7355_s30, %s7820_s9 }
  0x9d   :  { %p7361_p4 = pnand %p7359_p3, %p7356_p2 }
  0x9f   :  { %7364 = shalt.err (!%p7361_p4)
}
  0xa0   :  { %s7365_s14 = scalar_lea.vmem %s7597_s21, 2048  ;;  %p7370_p6 = scmp.lt.s32.totalorder %s7597_s21, %s7597_s21 }
  0xa1   :  { %p7366_p5 = scmp.ne.s32.totalorder %s7597_s21, %s7365_s14  ;;  %p7371_p7 = scmp.lt.s32.totalorder %s7365_s14, %s7365_s14 }
  0xa3   :  { %p7372_p8 = por %p7371_p7, %p7370_p6 }
  0xa5   :  { %p7373_p9 = pnand %p7372_p8, %p7366_p5 }
  0xa7   :  { %7376 = shalt.err (!%p7373_p9)
}
  0xa8   :  { %s7429_s8 = smov 64   ;;  %s7430_s18 = smov 4  }
  0xa9   :  { %131 = dma.hbm_to_vmem [thread:$0]  %s7820_s9, 2048, %s7597_s21, [#allocation18], %s7429_s8, %s7429_s8, %s7430_s18  }
  0xaa   :  { %7399 = dma.done.wait [#allocation3], 64  }
  0xab   :  { %7400 = vsyncadd [#allocation3], 4294967232 }
  0xac   :  { %7401 = dma.done.wait [#allocation6], 8320  }
  0xad   :  { %7402 = vsyncadd [#allocation6], 4294958976 }
  0xae   :  { %7403 = dma.done.wait [#allocation9], 32832  }
  0xaf   :  { %7404 = vsyncadd [#allocation9], 4294934464 }
  0xb0   :  { %7405 = dma.done.wait [#allocation12], 32896  }
  0xb1   :  { %7406 = vsyncadd [#allocation12], 4294934400 }
  0xb2   :  { %7407 = dma.done.wait [#allocation15], 16416  }
  0xb3   :  { %7408 = vsyncadd [#allocation15], 4294950880 }
  0xb4   :  { %7409 = dma.done.wait [#allocation18], 2048  }
  0xb5   :  { %7410 = vsyncadd [#allocation18], 4294965248  ;;  %v7431_v0 = vmov 0   ;;  %v164_v1 = vld [vmem:[#allocation5] sm:$0xff]  ;;  %v166_v18 = vld [vmem:[#allocation5 + $0x10] sm:$0xff]  ;;  %vm5702_vm0 = vcmask 31744  }
  0xb6   :  { %622 = vmatprep.mubr.bf16.mxu1 %v7431_v0  ;;  %704 = vmatprep.mubr.bf16.mxu0 %v7431_v0  ;;  %v168_v2 = vld [vmem:[#allocation5 + $0x20] sm:$0xff]  ;;  %v170_v19 = vld [vmem:[#allocation5 + $0x30] sm:$0xff]  ;;  %v165_v53 = vld [vmem:[#allocation5 + $0x8] sm:$0xff]  ;;  %s7432_s9 = smov [#allocation19]  }
  0xb7   :  { %v172_v3 = vld [vmem:[#allocation5 + $0x40] sm:$0xff]  ;;  %v5736_v4 = vcombine.high %v164_v1, %v168_v2  ;;  %v5735_v5 = vcombine.low %v164_v1, %v168_v2  ;;  %v174_v20 = vld [vmem:[#allocation5 + $0x50] sm:$0xff]  ;;  %v5740_v22 = vcombine.high %v166_v18, %v170_v19  ;;  %v5739_v23 = vcombine.low %v166_v18, %v170_v19  ;;  %v169_v54 = vld [vmem:[#allocation5 + $0x28] sm:$0xff]  ;;  %s5721_s22 = sshll.u32 %s7432_s9, 4  ;;  %s5722_s22 = int_to_ptr.vmem [resolvable:$true] %s5721_s22 }
  0xb8   :  { %v176_v6 = vld [vmem:[#allocation5 + $0x60] sm:$0xff]  ;;  %v178_v24 = vld [vmem:[#allocation5 + $0x70] sm:$0xff]  ;;  %v5738_v58 = vcombine.high %v165_v53, %v169_v54  ;;  %v173_v59 = vld [vmem:[#allocation5 + $0x48] sm:$0xff]  ;;  %v5737_v2 = vcombine.low %v165_v53, %v169_v54  ;;  %s7377_s4 = scalar_lea.vmem %s5722_s22, 128  ;;  %p7382_p11 = scmp.lt.s32.totalorder %s5722_s22, %s5722_s22 }
  0xb9   :  { %v5744_v7 = vcombine.high %v172_v3, %v176_v6  ;;  %v180_v8 = vld [vmem:[#allocation5 + $0x80] sm:$0xff]  ;;  %590 = vmatprep.subr.bf16.mxu1 %v5736_v4  ;;  %v5743_v10 = vcombine.low %v172_v3, %v176_v6  ;;  %v5748_v26 = vcombine.high %v174_v20, %v178_v24  ;;  %v182_v27 = vld [vmem:[#allocation5 + $0x90] sm:$0xff]  ;;  %672 = vmatprep.subr.bf16.mxu0 %v5740_v22  ;;  %v177_v60 = vld [vmem:[#allocation5 + $0x68] sm:$0xff]  ;;  %p7378_p10 = scmp.ne.s32.totalorder %s5722_s22, %s7377_s4  ;;  %p7383_p12 = scmp.lt.s32.totalorder %s7377_s4, %s7377_s4 }
  0xba   :  { %v184_v9 = vld [vmem:[#allocation5 + $0xa0] sm:$0xff]  ;;  %591 = vmatpush1.bf16.msra.mxu1 %v5735_v5  ;;  %v186_v28 = vld [vmem:[#allocation5 + $0xb0] sm:$0xff]  ;;  %673 = vmatpush1.bf16.msra.mxu0 %v5739_v23  ;;  %v5747_v31 = vcombine.low %v174_v20, %v178_v24  ;;  %v7630_v1 = vld [vmem:[#allocation2] sm:$0xf]  ;;  %v5746_v3 = vcombine.high %v173_v59, %v177_v60 }
  0xbb   :  { %592 = vmatprep.subr.bf16.mxu1 %v5744_v7  ;;  %v5752_v11 = vcombine.high %v180_v8, %v184_v9  ;;  %v188_v12 = vld [vmem:[#allocation5 + $0xc0] sm:$0xff]  ;;  %v5751_v14 = vcombine.low %v180_v8, %v184_v9  ;;  %674 = vmatprep.subr.bf16.mxu0 %v5748_v26  ;;  %v5756_v33 = vcombine.high %v182_v27, %v186_v28  ;;  %v190_v35 = vld [vmem:[#allocation5 + $0xd0] sm:$0xff]  ;;  %v181_v7 = vld [vmem:[#allocation5 + $0x88] sm:$0xff]  ;;  %p7384_p13 = por %p7383_p12, %p7382_p11 }
  0xbc   :  { %v192_v13 = vld [vmem:[#allocation5 + $0xe0] sm:$0xff]  ;;  %v194_v36 = vld [vmem:[#allocation5 + $0xf0] sm:$0xff]  ;;  %v5755_v39 = vcombine.low %v182_v27, %v186_v28  ;;  %v185_v8 = vld [vmem:[#allocation5 + $0xa8] sm:$0xff] }
  0xbd   :  { %v5760_v15 = vcombine.high %v188_v12, %v192_v13  ;;  %v196_v16 = vld [vmem:[#allocation5 + $0x100] sm:$0xff]  ;;  %v5759_v21 = vcombine.low %v188_v12, %v192_v13  ;;  %v5764_v41 = vcombine.high %v190_v35, %v194_v36  ;;  %v198_v43 = vld [vmem:[#allocation5 + $0x110] sm:$0xff]  ;;  %v5763_v47 = vcombine.low %v190_v35, %v194_v36  ;;  %v189_v13 = vld [vmem:[#allocation5 + $0xc8] sm:$0xff]  ;;  %p7385_p0 = pnand %p7384_p13, %p7378_p10 }
  0xbe   :  { %593 = vmatpush1.bf16.msra.mxu1 %v5743_v10  ;;  %v200_v17 = vld [vmem:[#allocation5 + $0x120] sm:$0xff]  ;;  %675 = vmatpush1.bf16.msra.mxu0 %v5747_v31  ;;  %v202_v44 = vld [vmem:[#allocation5 + $0x130] sm:$0xff]  ;;  %v5745_v10 = vcombine.low %v173_v59, %v177_v60  ;;  %v5754_v12 = vcombine.high %v181_v7, %v185_v8  ;;  %v197_v19 = vld [vmem:[#allocation5 + $0x108] sm:$0xff] }
  0xbf   :  { %594 = vmatprep.subr.bf16.mxu1 %v5752_v11  ;;  %v5768_v25 = vcombine.high %v196_v16, %v200_v17  ;;  %v204_v29 = vld [vmem:[#allocation5 + $0x140] sm:$0xff]  ;;  %v5767_v32 = vcombine.low %v196_v16, %v200_v17  ;;  %676 = vmatprep.subr.bf16.mxu0 %v5756_v33  ;;  %v5772_v49 = vcombine.high %v198_v43, %v202_v44  ;;  %v206_v51 = vld [vmem:[#allocation5 + $0x150] sm:$0xff]  ;;  %v6590_v17 = vld [vmem:[#allocation8 + $0x204] ss:$16 sps:$4 sm:$0xff]  }
  0xc0   :  { %v208_v30 = vld [vmem:[#allocation5 + $0x160] sm:$0xff]  ;;  %v210_v52 = vld [vmem:[#allocation5 + $0x170] sm:$0xff]  ;;  %v5771_v55 = vcombine.low %v198_v43, %v202_v44  ;;  %v5753_v16 = vcombine.low %v181_v7, %v185_v8  ;;  %v201_v20 = vld [vmem:[#allocation5 + $0x128] sm:$0xff] }
  0xc1   :  { %v5776_v34 = vcombine.high %v204_v29, %v208_v30  ;;  %v212_v37 = vld [vmem:[#allocation5 + $0x180] sm:$0xff]  ;;  %v5775_v40 = vcombine.low %v204_v29, %v208_v30  ;;  %v5780_v57 = vcombine.high %v206_v51, %v210_v52  ;;  %v214_v61 = vld [vmem:[#allocation5 + $0x190] sm:$0xff]  ;;  %v5779_v63 = vcombine.low %v206_v51, %v210_v52  ;;  %v6596_v23 = vld [vmem:[#allocation8 + $0x224] ss:$16 sps:$4 sm:$0xff]  }
  0xc2   :  { %595 = vmatpush1.bf16.msra.mxu1 %v5751_v14  ;;  %v216_v38 = vld [vmem:[#allocation5 + $0x1a0] sm:$0xff]  ;;  %677 = vmatpush1.bf16.msra.mxu0 %v5755_v39  ;;  %v218_v62 = vld [vmem:[#allocation5 + $0x1b0] sm:$0xff]  ;;  %v193_v14 = vld [vmem:[#allocation5 + $0xe8] sm:$0xff]  ;;  %v5770_v24 = vcombine.high %v197_v19, %v201_v20  ;;  %v5769_v28 = vcombine.low %v197_v19, %v201_v20 }
  0xc3   :  { %596 = vmatprep.subr.bf16.mxu1 %v5760_v15  ;;  %v5784_v42 = vcombine.high %v212_v37, %v216_v38  ;;  %v220_v45 = vld [vmem:[#allocation5 + $0x1c0] sm:$0xff]  ;;  %v5783_v48 = vcombine.low %v212_v37, %v216_v38  ;;  %678 = vmatprep.subr.bf16.mxu0 %v5764_v41  ;;  %v5788_v4 = vcombine.high %v214_v61, %v218_v62  ;;  %v222_v5 = vld [vmem:[#allocation5 + $0x1d0] sm:$0xff]  ;;  %v209_v26 = vld [vmem:[#allocation5 + $0x168] sm:$0xff] }
  0xc4   :  { %v224_v46 = vld [vmem:[#allocation5 + $0x1e0] sm:$0xff]  ;;  %v226_v6 = vld [vmem:[#allocation5 + $0x1f0] sm:$0xff]  ;;  %v5787_v9 = vcombine.low %v214_v61, %v218_v62  ;;  %v5762_v18 = vcombine.high %v189_v13, %v193_v14  ;;  %v5761_v22 = vcombine.low %v189_v13, %v193_v14  ;;  %v6594_v27 = vld [vmem:[#allocation8 + $0x220] ss:$16 sps:$4 sm:$0xff]  }
  0xc5   :  { %v5792_v50 = vcombine.high %v220_v45, %v224_v46  ;;  %v5791_v56 = vcombine.low %v220_v45, %v224_v46  ;;  %v5796_v11 = vcombine.high %v222_v5, %v226_v6  ;;  %v5795_v15 = vcombine.low %v222_v5, %v226_v6  ;;  %v213_v29 = vld [vmem:[#allocation5 + $0x188] sm:$0xff]  ;;  %v171_v43 = vld [vmem:[#allocation5 + $0x38] sm:$0xff] }
  0xc6   :  { %597 = vmatpush1.bf16.msra.mxu1 %v5759_v21  ;;  %679 = vmatpush1.bf16.msra.mxu0 %v5763_v47  ;;  %v6588_v21 = vld [vmem:[#allocation8 + $0x200] ss:$16 sps:$4 sm:$0xff]   ;;  %v6602_v31 = vld [vmem:[#allocation8 + $0x244] ss:$16 sps:$4 sm:$0xff]  }
  0xc7   :  { %598 = vmatprep.subr.bf16.mxu1 %v5768_v25  ;;  %680 = vmatprep.subr.bf16.mxu0 %v5772_v49  ;;  %v205_v25 = vld [vmem:[#allocation5 + $0x148] sm:$0xff]  ;;  %v179_v49 = vld [vmem:[#allocation5 + $0x78] sm:$0xff] }
  0xc8   :  { %v217_v30 = vld [vmem:[#allocation5 + $0x1a8] sm:$0xff]  ;;  %v5777_v35 = vcombine.low %v205_v25, %v209_v26  ;;  %v183_v53 = vld [vmem:[#allocation5 + $0x98] sm:$0xff] }
  0xc9   :  { %v6600_v33 = vld [vmem:[#allocation8 + $0x240] ss:$16 sps:$4 sm:$0xff]   ;;  %v5786_v38 = vcombine.high %v213_v29, %v217_v30  ;;  %v5785_v41 = vcombine.low %v213_v29, %v217_v30  ;;  %v6620_v46 = vld [vmem:[#allocation8 + $0x2a4] ss:$16 sps:$4 sm:$0xff]  }
  0xca   :  { %599 = vmatpush1.bf16.msra.mxu1 %v5767_v32  ;;  %681 = vmatpush1.bf16.msra.mxu0 %v5771_v55  ;;  %v5778_v32 = vcombine.high %v205_v25, %v209_v26  ;;  %v221_v36 = vld [vmem:[#allocation5 + $0x1c8] sm:$0xff]  ;;  %v187_v54 = vld [vmem:[#allocation5 + $0xb8] sm:$0xff] }
  0xcb   :  { %600 = vmatprep.subr.bf16.mxu1 %v5776_v34  ;;  %682 = vmatprep.subr.bf16.mxu0 %v5780_v57  ;;  %v6608_v34 = vld [vmem:[#allocation8 + $0x264] ss:$16 sps:$4 sm:$0xff]   ;;  %v6606_v39 = vld [vmem:[#allocation8 + $0x260] ss:$16 sps:$4 sm:$0xff]   ;;  %v5758_v59 = vcombine.high %v183_v53, %v187_v54  ;;  %v5757_v60 = vcombine.low %v183_v53, %v187_v54 }
  0xcc   :  { %v225_v37 = vld [vmem:[#allocation5 + $0x1e8] sm:$0xff]  ;;  %v191_v57 = vld [vmem:[#allocation5 + $0xd8] sm:$0xff] }
  0xcd   :  { %v5794_v44 = vcombine.high %v221_v36, %v225_v37  ;;  %v6612_v45 = vld [vmem:[#allocation8 + $0x280] ss:$16 sps:$4 sm:$0xff]   ;;  %v5793_v47 = vcombine.low %v221_v36, %v225_v37  ;;  %v6569_v20 = vld [vmem:[#allocation8 + $0x44] ss:$16 sps:$4 sm:$0xff]  }
  0xce   :  { %601 = vmatpush1.bf16.msra.mxu1 %v5775_v40  ;;  %683 = vmatpush1.bf16.msra.mxu0 %v5779_v63  ;;  %v6614_v40 = vld [vmem:[#allocation8 + $0x284] ss:$16 sps:$4 sm:$0xff]   ;;  %v6618_v51 = vld [vmem:[#allocation8 + $0x2a0] ss:$16 sps:$4 sm:$0xff]  }
  0xcf   :  { %602 = vmatprep.subr.bf16.mxu1 %v5784_v42  ;;  %684 = vmatprep.subr.bf16.mxu0 %v5788_v4  ;;  %v167_v42 = vld [vmem:[#allocation5 + $0x18] sm:$0xff] }
  0xd0   :  { %v5741_v52 = vcombine.low %v167_v42, %v171_v43  ;;  %v199_v61 = vld [vmem:[#allocation5 + $0x118] sm:$0xff] }
  0xd1   :  { %v203_v62 = vld [vmem:[#allocation5 + $0x138] sm:$0xff] }
  0xd2   :  { %603 = vmatpush1.bf16.msra.mxu1 %v5783_v48  ;;  %685 = vmatpush1.bf16.msra.mxu0 %v5787_v9  ;;  %v175_v48 = vld [vmem:[#allocation5 + $0x58] sm:$0xff]  ;;  %v5774_v5 = vcombine.high %v199_v61, %v203_v62  ;;  %v5773_v6 = vcombine.low %v199_v61, %v203_v62 }
  0xd3   :  { %604 = vmatprep.subr.bf16.mxu1 %v5792_v50  ;;  %686 = vmatprep.subr.bf16.mxu0 %v5796_v11  ;;  %v5742_v50 = vcombine.high %v167_v42, %v171_v43  ;;  %v5750_v55 = vcombine.high %v175_v48, %v179_v49  ;;  %v211_v4 = vld [vmem:[#allocation5 + $0x178] sm:$0xff] }
  0xd4   :  { %v215_v7 = vld [vmem:[#allocation5 + $0x198] sm:$0xff] }
  0xd5   :  { %v219_v8 = vld [vmem:[#allocation5 + $0x1b8] sm:$0xff] }
  0xd6   :  { %605 = vmatpush1.bf16.msra.mxu1 %v5791_v56  ;;  %687 = vmatpush1.bf16.msra.mxu0 %v5795_v15  ;;  %v5749_v56 = vcombine.low %v175_v48, %v179_v49  ;;  %v227_v11 = vld [vmem:[#allocation5 + $0x1f8] sm:$0xff]  ;;  %v5789_v13 = vcombine.low %v215_v7, %v219_v8 }
  0xd7   :  { %631 = vmatprep.subr.bf16.mxu1 %v5738_v58  ;;  %2369 = vmatprep.subr.bf16.mxu0 %v6590_v17  ;;  %v195_v58 = vld [vmem:[#allocation5 + $0xf8] sm:$0xff] }
  0xd8   :  { %v5766_v63 = vcombine.high %v191_v57, %v195_v58  ;;  %v6563_v15 = vld [vmem:[#allocation8 + $0x4] ss:$16 sps:$4 sm:$0xff]   ;;  %v6561_v17 = vld [vmem:[#allocation8] ss:$16 sps:$4 sm:$0xff]  }
  0xd9   :  { %623 = vmatmul.mubr.bf16.vlgmr.msra.gmra.mrb[0].mxu1 %v7630_v1  ;;  %705 = vmatmul.mubr.bf16.vlgmr.msra.gmra.mrb[0].mxu0 %v7630_v1  ;;  %v6564_v19 = vld [vmem:[#allocation8 + $0x20] ss:$16 sps:$4 sm:$0xff]   ;;  %v6578_v26 = vld [vmem:[#allocation8 + $0xa4] ss:$16 sps:$4 sm:$0xff]  }
  0xda   :  { %632 = vmatpush1.bf16.msra.mxu1 %v5737_v2  ;;  %663 = vmatprep.mubr.bf16.mxu1 %v7431_v0  ;;  %v5765_v2 = vcombine.low %v191_v57, %v195_v58  ;;  %v6573_v25 = vld [vmem:[#allocation8 + $0x80] ss:$16 sps:$4 sm:$0xff]   ;;  %v6587_v36 = vld [vmem:[#allocation8 + $0x104] ss:$16 sps:$4 sm:$0xff]  }
  0xdb   :  { %633 = vmatprep.subr.bf16.mxu1 %v5746_v3  ;;  %2370 = vmatpush1.bf16.msra.mxu0 %v6588_v21  ;;  %v207_v3 = vld [vmem:[#allocation5 + $0x158] sm:$0xff] }
  0xdc   :  { %2371 = vmatprep.subr.bf16.mxu0 %v6596_v23  ;;  %v5781_v9 = vcombine.low %v207_v3, %v211_v4  ;;  %v6567_v21 = vld [vmem:[#allocation8 + $0x40] ss:$16 sps:$4 sm:$0xff]   ;;  %v6653_v48 = vld [vmem:[#allocation8 + $0x364] ss:$16 sps:$4 sm:$0xff]  }
  0xdd   :  { %v6570_v23 = vld [vmem:[#allocation8 + $0x60] ss:$16 sps:$4 sm:$0xff]   ;;  %v6605_v49 = vld [vmem:[#allocation8 + $0x164] ss:$16 sps:$4 sm:$0xff]  }
  0xde   :  { %634 = vmatpush1.bf16.msra.mxu1 %v5745_v10  ;;  %v223_v10 = vld [vmem:[#allocation5 + $0x1d8] sm:$0xff] }
  0xdf   :  { %635 = vmatprep.subr.bf16.mxu1 %v5754_v12  ;;  %2372 = vmatpush1.bf16.msra.mxu0 %v6594_v27  ;;  %v5790_v12 = vcombine.high %v215_v7, %v219_v8  ;;  %v5798_v14 = vcombine.high %v223_v10, %v227_v11  ;;  %v6576_v27 = vld [vmem:[#allocation8 + $0xa0] ss:$16 sps:$4 sm:$0xff]   ;;  %v6611_v53 = vld [vmem:[#allocation8 + $0x184] ss:$16 sps:$4 sm:$0xff]   ;;  %v230_v7 = vlaneseq }
  0xe0   :  { %2373 = vmatprep.subr.bf16.mxu0 %v6602_v31  ;;  %v6624_v29 = vld [vmem:[#allocation8 + $0x2c0] ss:$16 sps:$4 sm:$0xff]   ;;  %v6632_v31 = vld [vmem:[#allocation8 + $0x2e4] ss:$16 sps:$4 sm:$0xff]  }
  0xe1   :  { %v6579_v30 = vld [vmem:[#allocation8 + $0xc0] ss:$16 sps:$4 sm:$0xff]   ;;  %v6617_v57 = vld [vmem:[#allocation8 + $0x1a4] ss:$16 sps:$4 sm:$0xff]   ;;  %v7638_v8 = vshrl.u32 %v230_v7, 7 }
  0xe2   :  { %636 = vmatpush1.bf16.msra.mxu1 %v5753_v16  ;;  %v5797_v16 = vcombine.low %v223_v10, %v227_v11  ;;  %v6633_v37 = vld [vmem:[#allocation8 + $0x300] ss:$16 sps:$4 sm:$0xff]  }
  0xe3   :  { %637 = vmatprep.subr.bf16.mxu1 %v5762_v18  ;;  %2374 = vmatpush1.bf16.msra.mxu0 %v6600_v33  ;;  %v6566_v18 = vld [vmem:[#allocation8 + $0x24] ss:$16 sps:$4 sm:$0xff]   ;;  %v6630_v33 = vld [vmem:[#allocation8 + $0x2e0] ss:$16 sps:$4 sm:$0xff]   ;;  %v7646_v10 = vsub.s32 1, %v7638_v8 }
  0xe4   :  { %2375 = vmatprep.subr.bf16.mxu0 %v6608_v34  ;;  %v6582_v34 = vld [vmem:[#allocation8 + $0xe0] ss:$16 sps:$4 sm:$0xff]  }
  0xe5   :  { %v6591_v42 = vld [vmem:[#allocation8 + $0x120] ss:$16 sps:$4 sm:$0xff]  }
  0xe6   :  { %638 = vmatpush1.bf16.msra.mxu1 %v5761_v22  ;;  %v6572_v22 = vld [vmem:[#allocation8 + $0x64] ss:$16 sps:$4 sm:$0xff]   ;;  %v6645_v43 = vld [vmem:[#allocation8 + $0x340] ss:$16 sps:$4 sm:$0xff]  }
  0xe7   :  { %639 = vmatprep.subr.bf16.mxu1 %v5770_v24  ;;  %2376 = vmatpush1.bf16.msra.mxu0 %v6606_v39  ;;  %v6575_v24 = vld [vmem:[#allocation8 + $0x84] ss:$16 sps:$4 sm:$0xff]   ;;  %v6639_v39 = vld [vmem:[#allocation8 + $0x320] ss:$16 sps:$4 sm:$0xff]  }
  0xe8   :  { %2377 = vmatprep.subr.bf16.mxu0 %v6614_v40  ;;  %v6641_v40 = vld [vmem:[#allocation8 + $0x324] ss:$16 sps:$4 sm:$0xff]   ;;  %v6609_v54 = vld [vmem:[#allocation8 + $0x180] ss:$16 sps:$4 sm:$0xff]  }
  0xe9   :  { %v6615_v58 = vld [vmem:[#allocation8 + $0x1a0] ss:$16 sps:$4 sm:$0xff]  }
  0xea   :  { %640 = vmatpush1.bf16.msra.mxu1 %v5769_v28  ;;  %v6626_v28 = vld [vmem:[#allocation8 + $0x2c4] ss:$16 sps:$4 sm:$0xff]   ;;  %v6621_v61 = vld [vmem:[#allocation8 + $0x1c0] ss:$16 sps:$4 sm:$0xff]  }
  0xeb   :  { %641 = vmatprep.subr.bf16.mxu1 %v5778_v32  ;;  %2378 = vmatpush1.bf16.msra.mxu0 %v6612_v45  ;;  %v6584_v32 = vld [vmem:[#allocation8 + $0xe4] ss:$16 sps:$4 sm:$0xff]   ;;  %v6669_v62 = vld [vmem:[#allocation8 + $0x3c0] ss:$16 sps:$4 sm:$0xff]  }
  0xec   :  { %2379 = vmatprep.subr.bf16.mxu0 %v6620_v46  ;;  %v6599_v45 = vld [vmem:[#allocation8 + $0x144] ss:$16 sps:$4 sm:$0xff]   ;;  %v6597_v46 = vld [vmem:[#allocation8 + $0x140] ss:$16 sps:$4 sm:$0xff]  }
  0xed   :  { %v6693_v7 = vld [vmem:[#allocation8 + $0x440] ss:$16 sps:$4 sm:$0xff]  }
  0xee   :  { %642 = vmatpush1.bf16.msra.mxu1 %v5777_v35  ;;  %v6635_v35 = vld [vmem:[#allocation8 + $0x304] ss:$16 sps:$4 sm:$0xff]  }
  0xef   :  { %643 = vmatprep.subr.bf16.mxu1 %v5786_v38  ;;  %2380 = vmatpush1.bf16.msra.mxu0 %v6618_v51  ;;  %v6585_v38 = vld [vmem:[#allocation8 + $0x100] ss:$16 sps:$4 sm:$0xff]  }
  0xf0   :  { %2381 = vmatprep.subr.bf16.mxu0 %v6626_v28  ;;  %v6657_v51 = vld [vmem:[#allocation8 + $0x380] ss:$16 sps:$4 sm:$0xff]  }
  0xf2   :  { %644 = vmatpush1.bf16.msra.mxu1 %v5785_v41  ;;  %v6593_v41 = vld [vmem:[#allocation8 + $0x124] ss:$16 sps:$4 sm:$0xff]  }
  0xf3   :  { %645 = vmatprep.subr.bf16.mxu1 %v5794_v44  ;;  %2382 = vmatpush1.bf16.msra.mxu0 %v6624_v29  ;;  %v6647_v44 = vld [vmem:[#allocation8 + $0x344] ss:$16 sps:$4 sm:$0xff]   ;;  %v6648_v29 = vld [vmem:[#allocation8 + $0x48] ss:$16 sps:$4 sm:$0xff]  }
  0xf4   :  { %2383 = vmatprep.subr.bf16.mxu0 %v6632_v31  ;;  %v6656_v31 = vld [vmem:[#allocation8 + $0x6c] ss:$16 sps:$4 sm:$0xff]  }
  0xf6   :  { %646 = vmatpush1.bf16.msra.mxu1 %v5793_v47  ;;  %v6651_v47 = vld [vmem:[#allocation8 + $0x360] ss:$16 sps:$4 sm:$0xff]  }
  0xf7   :  { %713 = vmatprep.subr.bf16.mxu1 %v5742_v50  ;;  %2384 = vmatpush1.bf16.msra.mxu0 %v6630_v33  ;;  %v6603_v50 = vld [vmem:[#allocation8 + $0x160] ss:$16 sps:$4 sm:$0xff]   ;;  %v6662_v33 = vld [vmem:[#allocation8 + $0x8c] ss:$16 sps:$4 sm:$0xff]  }
  0xf8   :  { %2385 = vmatprep.subr.bf16.mxu0 %v6635_v35  ;;  %v6668_v35 = vld [vmem:[#allocation8 + $0xac] ss:$16 sps:$4 sm:$0xff]  }
  0xf9   :  { %664 = vmatmul.mubr.bf16.vlgmr.msra.gmra.mrb[4].mxu1 %v7630_v1 }
  0xfa   :  { %714 = vmatpush1.bf16.msra.mxu1 %v5741_v52  ;;  %745 = vmatprep.mubr.bf16.mxu1 %v7431_v0  ;;  %v5782_v0 = vcombine.high %v207_v3, %v211_v4  ;;  %v6659_v52 = vld [vmem:[#allocation8 + $0x384] ss:$16 sps:$4 sm:$0xff]   ;;  %v6627_v3 = vld [vmem:[#allocation8 + $0x1e0] ss:$16 sps:$4 sm:$0xff]  }
  0xfb   :  { %715 = vmatprep.subr.bf16.mxu1 %v5750_v55  ;;  %2386 = vmatpush1.bf16.msra.mxu0 %v6633_v37  ;;  %v6663_v55 = vld [vmem:[#allocation8 + $0x3a0] ss:$16 sps:$4 sm:$0xff]   ;;  %v7659_v37 = vsub.s32 2, %v7638_v8 }
  0xfc   :  { %2387 = vmatprep.subr.bf16.mxu0 %v6641_v40  ;;  %v6675_v4 = vld [vmem:[#allocation8 + $0x3e0] ss:$16 sps:$4 sm:$0xff]   ;;  %v6674_v40 = vld [vmem:[#allocation8 + $0xcc] ss:$16 sps:$4 sm:$0xff]  }
  0xfe   :  { %716 = vmatpush1.bf16.msra.mxu1 %v5749_v56  ;;  %v6665_v56 = vld [vmem:[#allocation8 + $0x3a4] ss:$16 sps:$4 sm:$0xff]  }
  0xff   :  { %717 = vmatprep.subr.bf16.mxu1 %v5758_v59  ;;  %2388 = vmatpush1.bf16.msra.mxu0 %v6639_v39  ;;  %v6623_v59 = vld [vmem:[#allocation8 + $0x1c4] ss:$16 sps:$4 sm:$0xff]   ;;  %v7662_v39 = vsub.s32 3, %v7638_v8 }
 0x100   :  { %2389 = vmatprep.subr.bf16.mxu0 %v6647_v44 }
 0x102   :  { %718 = vmatpush1.bf16.msra.mxu1 %v5757_v60  ;;  %v6671_v60 = vld [vmem:[#allocation8 + $0x3c4] ss:$16 sps:$4 sm:$0xff]  }
 0x103   :  { %719 = vmatprep.subr.bf16.mxu1 %v5766_v63  ;;  %2390 = vmatpush1.bf16.msra.mxu0 %v6645_v43  ;;  %v6629_v63 = vld [vmem:[#allocation8 + $0x1e4] ss:$16 sps:$4 sm:$0xff]   ;;  %v6672_v43 = vld [vmem:[#allocation8 + $0xc8] ss:$16 sps:$4 sm:$0xff]  }
 0x104   :  { %2391 = vmatprep.subr.bf16.mxu0 %v6653_v48 }
 0x106   :  { %720 = vmatpush1.bf16.msra.mxu1 %v5765_v2  ;;  %v6677_v2 = vld [vmem:[#allocation8 + $0x3e4] ss:$16 sps:$4 sm:$0xff]  }
 0x107   :  { %721 = vmatprep.subr.bf16.mxu1 %v5774_v5  ;;  %2392 = vmatpush1.bf16.msra.mxu0 %v6651_v47  ;;  %v6638_v5 = vld [vmem:[#allocation8 + $0xc] ss:$16 sps:$4 sm:$0xff]  }
 0x108   :  { %2393 = vmatprep.subr.bf16.mxu0 %v6659_v52 }
 0x10a   :  { %722 = vmatpush1.bf16.msra.mxu1 %v5773_v6  ;;  %v6683_v6 = vld [vmem:[#allocation8 + $0x404] ss:$16 sps:$4 sm:$0xff]  }
 0x10b   :  { %723 = vmatprep.subr.bf16.mxu1 %v5782_v0  ;;  %2394 = vmatpush1.bf16.msra.mxu0 %v6657_v51  ;;  %v7641_v0 = vsub.s32 0, %v7638_v8  ;;  %v6678_v51 = vld [vmem:[#allocation8 + $0xe8] ss:$16 sps:$4 sm:$0xff]  }
 0x10c   :  { %2395 = vmatprep.subr.bf16.mxu0 %v6665_v56 }
 0x10e   :  { %724 = vmatpush1.bf16.msra.mxu1 %v5781_v9  ;;  %v7643_v9 = vld [vmem:[#allocation7] sm:$0xff] }
 0x10f   :  { %725 = vmatprep.subr.bf16.mxu1 %v5790_v12  ;;  %2396 = vmatpush1.bf16.msra.mxu0 %v6663_v55  ;;  %v233_v11 = vrot.slane %v7643_v9, %v7641_v0  ;;  %v237_v12 = vrot.slane %v7643_v9, %v7646_v10  ;;  %v245_v44 = vrot.slane %v7643_v9, %v7662_v39 }
 0x110   :  { %2397 = vmatprep.subr.bf16.mxu0 %v6671_v60  ;;  %v6681_v60 = vld [vmem:[#allocation8 + $0x400] ss:$16 sps:$4 sm:$0xff]  }
 0x112   :  { %726 = vmatpush1.bf16.msra.mxu1 %v5789_v13 }
 0x113   :  { %727 = vmatprep.subr.bf16.mxu1 %v5798_v14  ;;  %2398 = vmatpush1.bf16.msra.mxu0 %v6669_v62  ;;  %v6689_v62 = vld [vmem:[#allocation8 + $0x424] ss:$16 sps:$4 sm:$0xff]  }
 0x114   :  { %2399 = vmatprep.subr.bf16.mxu0 %v6677_v2 }
 0x116   :  { %728 = vmatpush1.bf16.msra.mxu1 %v5797_v16 }
 0x117   :  { %2328 = vmatprep.subr.bf16.mxu1 %v6563_v15  ;;  %2400 = vmatpush1.bf16.msra.mxu0 %v6675_v4  ;;  %v6690_v4 = vld [vmem:[#allocation8 + $0x128] ss:$16 sps:$4 sm:$0xff]  }
 0x118   :  { %2410 = vmatprep.subr.bf16.mxu0 %v6683_v6  ;;  %v6698_v6 = vld [vmem:[#allocation8 + $0x14c] ss:$16 sps:$4 sm:$0xff]  }
 0x119   :  { %746 = vmatmul.mubr.bf16.vlgmr.msra.gmra.mrb[8].mxu1 %v7630_v1  ;;  %v6581_v1 = vld [vmem:[#allocation8 + $0xc4] ss:$16 sps:$4 sm:$0xff]  }
 0x11a   :  { %2329 = vmatpush1.bf16.msra.mxu1 %v6561_v17 }
 0x11b   :  { %2330 = vmatprep.subr.bf16.mxu1 %v6566_v18 }
 0x11e   :  { %2331 = vmatpush1.bf16.msra.mxu1 %v6564_v19 }
 0x11f   :  { %2332 = vmatprep.subr.bf16.mxu1 %v6569_v20 }
 0x122   :  { %2333 = vmatpush1.bf16.msra.mxu1 %v6567_v21 }
 0x123   :  { %2334 = vmatprep.subr.bf16.mxu1 %v6572_v22  ;;  %v6636_v22 = vld [vmem:[#allocation8 + $0x8] ss:$16 sps:$4 sm:$0xff]  }
 0x126   :  { %2335 = vmatpush1.bf16.msra.mxu1 %v6570_v23 }
 0x127   :  { %2336 = vmatprep.subr.bf16.mxu1 %v6575_v24  ;;  %v6644_v24 = vld [vmem:[#allocation8 + $0x2c] ss:$16 sps:$4 sm:$0xff]  }
 0x12a   :  { %2337 = vmatpush1.bf16.msra.mxu1 %v6573_v25  ;;  %v6642_v25 = vld [vmem:[#allocation8 + $0x28] ss:$16 sps:$4 sm:$0xff]  }
 0x12b   :  { %2338 = vmatprep.subr.bf16.mxu1 %v6578_v26  ;;  %v6650_v26 = vld [vmem:[#allocation8 + $0x4c] ss:$16 sps:$4 sm:$0xff]  }
 0x12e   :  { %2339 = vmatpush1.bf16.msra.mxu1 %v6576_v27 }
 0x12f   :  { %2340 = vmatprep.subr.bf16.mxu1 %v6581_v1 }
 0x132   :  { %2341 = vmatpush1.bf16.msra.mxu1 %v6579_v30 }
 0x133   :  { %2342 = vmatprep.subr.bf16.mxu1 %v6584_v32  ;;  %v6654_v32 = vld [vmem:[#allocation8 + $0x68] ss:$16 sps:$4 sm:$0xff]  }
 0x136   :  { %2343 = vmatpush1.bf16.msra.mxu1 %v6582_v34  ;;  %v6660_v34 = vld [vmem:[#allocation8 + $0x88] ss:$16 sps:$4 sm:$0xff]  }
 0x137   :  { %2344 = vmatprep.subr.bf16.mxu1 %v6587_v36  ;;  %v252_v36 = vsub.s32 5, %v7638_v8 }
 0x13a   :  { %2345 = vmatpush1.bf16.msra.mxu1 %v6585_v38  ;;  %v6666_v38 = vld [vmem:[#allocation8 + $0xa8] ss:$16 sps:$4 sm:$0xff]  }
 0x13b   :  { %2346 = vmatprep.subr.bf16.mxu1 %v6593_v41  ;;  %v253_v41 = vrot.slane %v7643_v9, %v252_v36 }
 0x13e   :  { %2347 = vmatpush1.bf16.msra.mxu1 %v6591_v42  ;;  %v241_v42 = vrot.slane %v7643_v9, %v7659_v37 }
 0x13f   :  { %2348 = vmatprep.subr.bf16.mxu1 %v6599_v45  ;;  %v6680_v45 = vld [vmem:[#allocation8 + $0xec] ss:$16 sps:$4 sm:$0xff]  }
 0x142   :  { %2349 = vmatpush1.bf16.msra.mxu1 %v6597_v46 }
 0x143   :  { %2350 = vmatprep.subr.bf16.mxu1 %v6605_v49 }
 0x146   :  { %2351 = vmatpush1.bf16.msra.mxu1 %v6603_v50 }
 0x147   :  { %2352 = vmatprep.subr.bf16.mxu1 %v6611_v53 }
 0x14a   :  { %2353 = vmatpush1.bf16.msra.mxu1 %v6609_v54  ;;  %v6686_v54 = vld [vmem:[#allocation8 + $0x10c] ss:$16 sps:$4 sm:$0xff]  }
 0x14b   :  { %2354 = vmatprep.subr.bf16.mxu1 %v6617_v57 }
 0x14e   :  { %2355 = vmatpush1.bf16.msra.mxu1 %v6615_v58 }
 0x14f   :  { %2356 = vmatprep.subr.bf16.mxu1 %v6623_v59 }
 0x152   :  { %2357 = vmatpush1.bf16.msra.mxu1 %v6621_v61  ;;  %v6684_v61 = vld [vmem:[#allocation8 + $0x108] ss:$16 sps:$4 sm:$0xff]  }
 0x153   :  { %2358 = vmatprep.subr.bf16.mxu1 %v6629_v63  ;;  %v6692_v63 = vld [vmem:[#allocation8 + $0x12c] ss:$16 sps:$4 sm:$0xff]  }
 0x156   :  { %2359 = vmatpush1.bf16.msra.mxu1 %v6627_v3  ;;  %v6687_v3 = vld [vmem:[#allocation8 + $0x420] ss:$16 sps:$4 sm:$0xff]  }
 0x157   :  { %2492 = vmatprep.subr.bf16.mxu1 %v6638_v5  ;;  %v6695_v5 = vld [vmem:[#allocation8 + $0x444] ss:$16 sps:$4 sm:$0xff]  }
 0x1ac   :  { %v624_v13 = vpop.f32.mrb[0].mxu1  ;;  %v7655_v27 = vpop.f32.mrb[0].mxu0 }
 0x1ad   :  { %v625_v14 = vadd.f32 %v624_v13, %v233_v11  ;;  %v626_v15 = vpop.f32.mrb[1].mxu1  ;;  %v708_v28 = vpop.f32.mrb[1].mxu0  ;;  %v6696_v11 = vld [vmem:[#allocation8 + $0x148] ss:$16 sps:$4 sm:$0xff]   ;;  %v6704_v13 = vld [vmem:[#allocation8 + $0x16c] ss:$16 sps:$4 sm:$0xff]  }
 0x1ae   :  { %v627_v16 = vadd.f32 %v626_v15, %v237_v12  ;;  %v628_v17 = vpop.f32.mrb[2].mxu1  ;;  %v710_v1 = vpop.f32.mrb[2].mxu0  ;;  %v709_v47 = vadd.f32 %v708_v28, %v253_v41  ;;  %v6701_v12 = vld [vmem:[#allocation8 + $0x464] ss:$16 sps:$4 sm:$0xff]   ;;  %v6702_v15 = vld [vmem:[#allocation8 + $0x168] ss:$16 sps:$4 sm:$0xff]  }
 0x1af   :  { %v754_v18 = vmax.f32 %v625_v14, 0.0  ;;  %v629_v19 = vpop.f32.mrb[3].mxu1  ;;  %v711_v30 = vpop.f32.mrb[3].mxu0  ;;  %v6699_v14 = vld [vmem:[#allocation8 + $0x460] ss:$16 sps:$4 sm:$0xff]  }
 0x1b0   :  { %v755_v20 = vmax.f32 %v627_v16, 0.0  ;;  %v759_v57 = vmax.f32 %v709_v47, 0.0  ;;  %v6707_v16 = vld [vmem:[#allocation8 + $0x484] ss:$16 sps:$4 sm:$0xff]   ;;  %v6710_v17 = vld [vmem:[#allocation8 + $0x18c] ss:$16 sps:$4 sm:$0xff]  }
 0x1b1   :  { %v7652_v23 = vpack.c.bf16 %v754_v18, %v754_v18  ;;  %v6705_v18 = vld [vmem:[#allocation8 + $0x480] ss:$16 sps:$4 sm:$0xff]   ;;  %v6708_v19 = vld [vmem:[#allocation8 + $0x188] ss:$16 sps:$4 sm:$0xff]   ;;  %v6728_v30 = vld [vmem:[#allocation8 + $0x1ec] ss:$16 sps:$4 sm:$0xff]  }
 0x1b2   :  { %v763_v21 = vpack.c.bf16 %v755_v20, %v755_v20  ;;  %v7676_v2 = vpack.c.bf16 %v759_v57, %v759_v57  ;;  %v6713_v20 = vld [vmem:[#allocation8 + $0x4a4] ss:$16 sps:$4 sm:$0xff]   ;;  %v6717_v28 = vld [vmem:[#allocation8 + $0x4c0] ss:$16 sps:$4 sm:$0xff]   ;;  %v6720_v1 = vld [vmem:[#allocation8 + $0x1c8] ss:$16 sps:$4 sm:$0xff]  }
 0x1b3   :  { %v6738_v47 = vld [vmem:[#allocation8 + $0x228] ss:$16 sps:$4 sm:$0xff]   ;;  %v248_v57 = vsub.s32 4, %v7638_v8 }
 0x1b4   :  { %2360 = vmatprep.mubr.bf16.mxu1 %v763_v21 }
 0x1b5   :  { %2361 = vmatmul.mubr.bf16.vlgmr.msra.gmra.mrb[12].mxu1 %v7652_v23 }
 0x1b6   :  { %2493 = vmatpush1.bf16.msra.mxu1 %v6636_v22  ;;  %2524 = vmatprep.mubr.bf16.mxu1 %v763_v21  ;;  %v6716_v21 = vld [vmem:[#allocation8 + $0x1ac] ss:$16 sps:$4 sm:$0xff]   ;;  %v6711_v22 = vld [vmem:[#allocation8 + $0x4a0] ss:$16 sps:$4 sm:$0xff]  }
 0x1b7   :  { %2494 = vmatprep.subr.bf16.mxu1 %v6644_v24  ;;  %v6714_v24 = vld [vmem:[#allocation8 + $0x1a8] ss:$16 sps:$4 sm:$0xff]  }
 0x1ba   :  { %2495 = vmatpush1.bf16.msra.mxu1 %v6642_v25  ;;  %v6719_v25 = vld [vmem:[#allocation8 + $0x4c4] ss:$16 sps:$4 sm:$0xff]  }
 0x1bb   :  { %2496 = vmatprep.subr.bf16.mxu1 %v6650_v26  ;;  %v6722_v26 = vld [vmem:[#allocation8 + $0x1cc] ss:$16 sps:$4 sm:$0xff]  }
 0x1be   :  { %2497 = vmatpush1.bf16.msra.mxu1 %v6648_v29  ;;  %v6725_v29 = vld [vmem:[#allocation8 + $0x4e4] ss:$16 sps:$4 sm:$0xff]  }
 0x1bf   :  { %2498 = vmatprep.subr.bf16.mxu1 %v6656_v31 }
 0x1c2   :  { %2499 = vmatpush1.bf16.msra.mxu1 %v6654_v32 }
 0x1c3   :  { %2500 = vmatprep.subr.bf16.mxu1 %v6662_v33  ;;  %v6723_v33 = vld [vmem:[#allocation8 + $0x4e0] ss:$16 sps:$4 sm:$0xff]  }
 0x1c6   :  { %2501 = vmatpush1.bf16.msra.mxu1 %v6660_v34  ;;  %v6726_v34 = vld [vmem:[#allocation8 + $0x1e8] ss:$16 sps:$4 sm:$0xff]  }
 0x1c7   :  { %2502 = vmatprep.subr.bf16.mxu1 %v6668_v35 }
 0x1ca   :  { %2503 = vmatpush1.bf16.msra.mxu1 %v6666_v38  ;;  %v6731_v38 = vld [vmem:[#allocation8 + $0x504] ss:$16 sps:$4 sm:$0xff]  }
 0x1cb   :  { %2504 = vmatprep.subr.bf16.mxu1 %v6674_v40  ;;  %v6734_v40 = vld [vmem:[#allocation8 + $0x20c] ss:$16 sps:$4 sm:$0xff]  }
 0x1cc   :  { %v665_v46 = vpop.f32.mrb[4].mxu1 }
 0x1cd   :  { %v666_v48 = vadd.f32 %v665_v46, %v241_v42  ;;  %v667_v49 = vpop.f32.mrb[5].mxu1  ;;  %v6729_v42 = vld [vmem:[#allocation8 + $0x500] ss:$16 sps:$4 sm:$0xff]  }
 0x1ce   :  { %v668_v50 = vadd.f32 %v667_v49, %v245_v44  ;;  %2505 = vmatpush1.bf16.msra.mxu1 %v6672_v43  ;;  %v669_v52 = vpop.f32.mrb[6].mxu1  ;;  %v6732_v43 = vld [vmem:[#allocation8 + $0x208] ss:$16 sps:$4 sm:$0xff]   ;;  %v6737_v44 = vld [vmem:[#allocation8 + $0x524] ss:$16 sps:$4 sm:$0xff]  }
 0x1cf   :  { %v756_v53 = vmax.f32 %v666_v48, 0.0  ;;  %2506 = vmatprep.subr.bf16.mxu1 %v6680_v45  ;;  %v670_v55 = vpop.f32.mrb[7].mxu1  ;;  %v6740_v45 = vld [vmem:[#allocation8 + $0x22c] ss:$16 sps:$4 sm:$0xff]   ;;  %v6735_v46 = vld [vmem:[#allocation8 + $0x520] ss:$16 sps:$4 sm:$0xff]  }
 0x1d0   :  { %v757_v56 = vmax.f32 %v668_v50, 0.0  ;;  %v6743_v48 = vld [vmem:[#allocation8 + $0x544] ss:$16 sps:$4 sm:$0xff]   ;;  %v6746_v49 = vld [vmem:[#allocation8 + $0x24c] ss:$16 sps:$4 sm:$0xff]  }
 0x1d1   :  { %v7671_v58 = vpack.c.bf16 %v756_v53, %v756_v53  ;;  %v6741_v50 = vld [vmem:[#allocation8 + $0x540] ss:$16 sps:$4 sm:$0xff]   ;;  %v6749_v52 = vld [vmem:[#allocation8 + $0x564] ss:$16 sps:$4 sm:$0xff]   ;;  %v6752_v53 = vld [vmem:[#allocation8 + $0x26c] ss:$16 sps:$4 sm:$0xff]  }
 0x1d2   :  { %v7673_v59 = vpack.c.bf16 %v757_v56, %v757_v56  ;;  %2507 = vmatpush1.bf16.msra.mxu1 %v6678_v51  ;;  %v6744_v51 = vld [vmem:[#allocation8 + $0x248] ss:$16 sps:$4 sm:$0xff]   ;;  %v6755_v55 = vld [vmem:[#allocation8 + $0x584] ss:$16 sps:$4 sm:$0xff]   ;;  %v6758_v56 = vld [vmem:[#allocation8 + $0x28c] ss:$16 sps:$4 sm:$0xff]  }
 0x1d3   :  { %2508 = vmatprep.subr.bf16.mxu1 %v6686_v54  ;;  %v6750_v54 = vld [vmem:[#allocation8 + $0x268] ss:$16 sps:$4 sm:$0xff]  }
 0x1d4   :  { %2401 = vmatprep.mubr.bf16.mxu0 %v7673_v59 }
 0x1d5   :  { %2402 = vmatmul.mubr.bf16.vlgmr.msra.gmra.mrb[4].mxu0 %v7671_v58 }
 0x1d6   :  { %2411 = vmatpush1.bf16.msra.mxu0 %v6681_v60  ;;  %2509 = vmatpush1.bf16.msra.mxu1 %v6684_v61  ;;  %v6756_v60 = vld [vmem:[#allocation8 + $0x288] ss:$16 sps:$4 sm:$0xff]   ;;  %v6761_v61 = vld [vmem:[#allocation8 + $0x5a4] ss:$16 sps:$4 sm:$0xff]  }
 0x1d7   :  { %2412 = vmatprep.subr.bf16.mxu0 %v6689_v62  ;;  %2510 = vmatprep.subr.bf16.mxu1 %v6692_v63  ;;  %v6764_v62 = vld [vmem:[#allocation8 + $0x2ac] ss:$16 sps:$4 sm:$0xff]   ;;  %v260_v63 = vsub.s32 7, %v7638_v8 }
 0x1d8   :  { %2442 = vmatprep.mubr.bf16.mxu0 %v7676_v2 }
 0x1da   :  { %2413 = vmatpush1.bf16.msra.mxu0 %v6687_v3  ;;  %2511 = vmatpush1.bf16.msra.mxu1 %v6690_v4  ;;  %v249_v3 = vrot.slane %v7643_v9, %v248_v57  ;;  %v6759_v4 = vld [vmem:[#allocation8 + $0x5a0] ss:$16 sps:$4 sm:$0xff]  }
 0x1db   :  { %2414 = vmatprep.subr.bf16.mxu0 %v6695_v5  ;;  %2512 = vmatprep.subr.bf16.mxu1 %v6698_v6  ;;  %v6762_v5 = vld [vmem:[#allocation8 + $0x2a8] ss:$16 sps:$4 sm:$0xff]   ;;  %v6767_v6 = vld [vmem:[#allocation8 + $0x5c4] ss:$16 sps:$4 sm:$0xff]  }
 0x1de   :  { %2415 = vmatpush1.bf16.msra.mxu0 %v6693_v7  ;;  %2513 = vmatpush1.bf16.msra.mxu1 %v6696_v11  ;;  %v6770_v7 = vld [vmem:[#allocation8 + $0x2cc] ss:$16 sps:$4 sm:$0xff]   ;;  %v261_v11 = vrot.slane %v7643_v9, %v260_v63 }
 0x1df   :  { %2416 = vmatprep.subr.bf16.mxu0 %v6701_v12  ;;  %2514 = vmatprep.subr.bf16.mxu1 %v6704_v13  ;;  %v707_v12 = vadd.f32 %v7655_v27, %v249_v3  ;;  %v6765_v13 = vld [vmem:[#allocation8 + $0x5c0] ss:$16 sps:$4 sm:$0xff]  }
 0x1e0   :  { %v6825_v3 = vld [vmem:[#allocation8 + $0x700] ss:$16 sps:$4 sm:$0xff]  }
 0x1e2   :  { %2417 = vmatpush1.bf16.msra.mxu0 %v6699_v14  ;;  %2515 = vmatpush1.bf16.msra.mxu1 %v6702_v15  ;;  %v6768_v14 = vld [vmem:[#allocation8 + $0x2c8] ss:$16 sps:$4 sm:$0xff]   ;;  %v6773_v15 = vld [vmem:[#allocation8 + $0x5e4] ss:$16 sps:$4 sm:$0xff]  }
 0x1e3   :  { %2418 = vmatprep.subr.bf16.mxu0 %v6707_v16  ;;  %2516 = vmatprep.subr.bf16.mxu1 %v6710_v17  ;;  %v6776_v16 = vld [vmem:[#allocation8 + $0x2ec] ss:$16 sps:$4 sm:$0xff]  }
 0x1e6   :  { %2419 = vmatpush1.bf16.msra.mxu0 %v6705_v18  ;;  %2517 = vmatpush1.bf16.msra.mxu1 %v6708_v19  ;;  %v758_v18 = vmax.f32 %v707_v12, 0.0  ;;  %v6771_v19 = vld [vmem:[#allocation8 + $0x5e0] ss:$16 sps:$4 sm:$0xff]   ;;  %v6839_v12 = vld [vmem:[#allocation8 + $0x744] ss:$16 sps:$4 sm:$0xff]  }
 0x1e7   :  { %2420 = vmatprep.subr.bf16.mxu0 %v6713_v20  ;;  %2518 = vmatprep.subr.bf16.mxu1 %v6716_v21  ;;  %v6774_v20 = vld [vmem:[#allocation8 + $0x2e8] ss:$16 sps:$4 sm:$0xff]   ;;  %v6779_v21 = vld [vmem:[#allocation8 + $0x604] ss:$16 sps:$4 sm:$0xff]  }
 0x1ea   :  { %2421 = vmatpush1.bf16.msra.mxu0 %v6711_v22  ;;  %2519 = vmatpush1.bf16.msra.mxu1 %v6714_v24  ;;  %v6782_v22 = vld [vmem:[#allocation8 + $0x30c] ss:$16 sps:$4 sm:$0xff]   ;;  %v7696_v24 = vpack.c.bf16 %v758_v18, %v758_v18  ;;  %v6846_v18 = vld [vmem:[#allocation8 + $0x468] ss:$16 sps:$4 sm:$0xff]  }
 0x1eb   :  { %2422 = vmatprep.subr.bf16.mxu0 %v6719_v25  ;;  %2520 = vmatprep.subr.bf16.mxu1 %v6722_v26  ;;  %v6777_v25 = vld [vmem:[#allocation8 + $0x600] ss:$16 sps:$4 sm:$0xff]   ;;  %v6780_v26 = vld [vmem:[#allocation8 + $0x308] ss:$16 sps:$4 sm:$0xff]  }
 0x1ec   :  { %v7680_v31 = vpop.f32.mrb[8].mxu1 }
 0x1ed   :  { %v7682_v32 = vpop.f32.mrb[9].mxu1 }
 0x1ee   :  { %2423 = vmatpush1.bf16.msra.mxu0 %v6717_v28  ;;  %2521 = vmatpush1.bf16.msra.mxu1 %v6720_v1  ;;  %v751_v35 = vpop.f32.mrb[10].mxu1  ;;  %v750_v17 = vadd.f32 %v7682_v32, %v261_v11  ;;  %v6785_v28 = vld [vmem:[#allocation8 + $0x624] ss:$16 sps:$4 sm:$0xff]   ;;  %v6788_v1 = vld [vmem:[#allocation8 + $0x32c] ss:$16 sps:$4 sm:$0xff]  }
 0x1ef   :  { %2424 = vmatprep.subr.bf16.mxu0 %v6725_v29  ;;  %2522 = vmatprep.subr.bf16.mxu1 %v6728_v30  ;;  %v752_v41 = vpop.f32.mrb[11].mxu1  ;;  %v6783_v30 = vld [vmem:[#allocation8 + $0x620] ss:$16 sps:$4 sm:$0xff]   ;;  %v6786_v32 = vld [vmem:[#allocation8 + $0x328] ss:$16 sps:$4 sm:$0xff]  }
 0x1f0   :  { %v761_v27 = vmax.f32 %v750_v17, 0.0  ;;  %v6789_v35 = vld [vmem:[#allocation8 + $0x640] ss:$16 sps:$4 sm:$0xff]   ;;  %v6800_v41 = vld [vmem:[#allocation8 + $0x36c] ss:$16 sps:$4 sm:$0xff]  }
 0x1f1   :  { %v6834_v11 = vld [vmem:[#allocation8 + $0x428] ss:$16 sps:$4 sm:$0xff]   ;;  %v6848_v17 = vld [vmem:[#allocation8 + $0x46c] ss:$16 sps:$4 sm:$0xff]  }
 0x1f2   :  { %2425 = vmatpush1.bf16.msra.mxu0 %v6723_v33  ;;  %2523 = vmatpush1.bf16.msra.mxu1 %v6726_v34  ;;  %v7698_v29 = vpack.c.bf16 %v761_v27, %v761_v27  ;;  %v6791_v33 = vld [vmem:[#allocation8 + $0x644] ss:$16 sps:$4 sm:$0xff]   ;;  %v6794_v34 = vld [vmem:[#allocation8 + $0x34c] ss:$16 sps:$4 sm:$0xff]  }
 0x1f3   :  { %2426 = vmatprep.subr.bf16.mxu0 %v6731_v38  ;;  %2533 = vmatprep.subr.bf16.mxu1 %v6734_v40  ;;  %v6792_v38 = vld [vmem:[#allocation8 + $0x348] ss:$16 sps:$4 sm:$0xff]   ;;  %v6797_v40 = vld [vmem:[#allocation8 + $0x664] ss:$16 sps:$4 sm:$0xff]  }
 0x1f4   :  { %v6857_v27 = vld [vmem:[#allocation8 + $0x7a4] ss:$16 sps:$4 sm:$0xff]  }
 0x1f5   :  { %2525 = vmatmul.mubr.bf16.vlgmr.msra.gmra.mrb[16].mxu1 %v7652_v23  ;;  %v6747_v23 = vld [vmem:[#allocation8 + $0x560] ss:$16 sps:$4 sm:$0xff]  }
 0x1f6   :  { %2427 = vmatpush1.bf16.msra.mxu0 %v6729_v42  ;;  %2534 = vmatpush1.bf16.msra.mxu1 %v6732_v43  ;;  %v6795_v42 = vld [vmem:[#allocation8 + $0x660] ss:$16 sps:$4 sm:$0xff]   ;;  %v6798_v43 = vld [vmem:[#allocation8 + $0x368] ss:$16 sps:$4 sm:$0xff]  }
 0x1f7   :  { %2565 = vmatprep.mubr.bf16.mxu1 %v7673_v59  ;;  %2428 = vmatprep.subr.bf16.mxu0 %v6737_v44  ;;  %v6753_v59 = vld [vmem:[#allocation8 + $0x580] ss:$16 sps:$4 sm:$0xff]   ;;  %v6803_v44 = vld [vmem:[#allocation8 + $0x684] ss:$16 sps:$4 sm:$0xff]  }
 0x1f8   :  { %2535 = vmatprep.subr.bf16.mxu1 %v6740_v45  ;;  %v6806_v45 = vld [vmem:[#allocation8 + $0x38c] ss:$16 sps:$4 sm:$0xff]  }
 0x1fa   :  { %2429 = vmatpush1.bf16.msra.mxu0 %v6735_v46  ;;  %2536 = vmatpush1.bf16.msra.mxu1 %v6738_v47  ;;  %v6801_v46 = vld [vmem:[#allocation8 + $0x680] ss:$16 sps:$4 sm:$0xff]   ;;  %v6804_v47 = vld [vmem:[#allocation8 + $0x388] ss:$16 sps:$4 sm:$0xff]  }
 0x1fb   :  { %2430 = vmatprep.subr.bf16.mxu0 %v6743_v48  ;;  %2537 = vmatprep.subr.bf16.mxu1 %v6746_v49  ;;  %v6809_v48 = vld [vmem:[#allocation8 + $0x6a4] ss:$16 sps:$4 sm:$0xff]   ;;  %v6812_v49 = vld [vmem:[#allocation8 + $0x3ac] ss:$16 sps:$4 sm:$0xff]  }
 0x1fe   :  { %2431 = vmatpush1.bf16.msra.mxu0 %v6741_v50  ;;  %2538 = vmatpush1.bf16.msra.mxu1 %v6744_v51  ;;  %v6807_v50 = vld [vmem:[#allocation8 + $0x6a0] ss:$16 sps:$4 sm:$0xff]   ;;  %v6810_v51 = vld [vmem:[#allocation8 + $0x3a8] ss:$16 sps:$4 sm:$0xff]  }
 0x1ff   :  { %2432 = vmatprep.subr.bf16.mxu0 %v6749_v52  ;;  %2539 = vmatprep.subr.bf16.mxu1 %v6752_v53  ;;  %v6815_v52 = vld [vmem:[#allocation8 + $0x6c4] ss:$16 sps:$4 sm:$0xff]   ;;  %v6818_v53 = vld [vmem:[#allocation8 + $0x3cc] ss:$16 sps:$4 sm:$0xff]  }
 0x202   :  { %2433 = vmatpush1.bf16.msra.mxu0 %v6747_v23  ;;  %2540 = vmatpush1.bf16.msra.mxu1 %v6750_v54  ;;  %v6813_v23 = vld [vmem:[#allocation8 + $0x6c0] ss:$16 sps:$4 sm:$0xff]   ;;  %v6816_v54 = vld [vmem:[#allocation8 + $0x3c8] ss:$16 sps:$4 sm:$0xff]  }
 0x203   :  { %2434 = vmatprep.subr.bf16.mxu0 %v6755_v55  ;;  %2541 = vmatprep.subr.bf16.mxu1 %v6758_v56  ;;  %v6821_v55 = vld [vmem:[#allocation8 + $0x6e4] ss:$16 sps:$4 sm:$0xff]   ;;  %v6824_v56 = vld [vmem:[#allocation8 + $0x3ec] ss:$16 sps:$4 sm:$0xff]  }
 0x206   :  { %2435 = vmatpush1.bf16.msra.mxu0 %v6753_v59  ;;  %2542 = vmatpush1.bf16.msra.mxu1 %v6756_v60  ;;  %v6819_v59 = vld [vmem:[#allocation8 + $0x6e0] ss:$16 sps:$4 sm:$0xff]   ;;  %v6822_v60 = vld [vmem:[#allocation8 + $0x3e8] ss:$16 sps:$4 sm:$0xff]  }
 0x207   :  { %2436 = vmatprep.subr.bf16.mxu0 %v6761_v61  ;;  %2543 = vmatprep.subr.bf16.mxu1 %v6764_v62  ;;  %v6827_v61 = vld [vmem:[#allocation8 + $0x704] ss:$16 sps:$4 sm:$0xff]   ;;  %v6830_v62 = vld [vmem:[#allocation8 + $0x40c] ss:$16 sps:$4 sm:$0xff]  }
 0x20a   :  { %2437 = vmatpush1.bf16.msra.mxu0 %v6759_v4  ;;  %2544 = vmatpush1.bf16.msra.mxu1 %v6762_v5  ;;  %v6828_v4 = vld [vmem:[#allocation8 + $0x408] ss:$16 sps:$4 sm:$0xff]   ;;  %v6833_v5 = vld [vmem:[#allocation8 + $0x724] ss:$16 sps:$4 sm:$0xff]  }
 0x20b   :  { %2438 = vmatprep.subr.bf16.mxu0 %v6767_v6  ;;  %2545 = vmatprep.subr.bf16.mxu1 %v6770_v7  ;;  %v6836_v6 = vld [vmem:[#allocation8 + $0x42c] ss:$16 sps:$4 sm:$0xff]   ;;  %v6831_v7 = vld [vmem:[#allocation8 + $0x720] ss:$16 sps:$4 sm:$0xff]  }
 0x20e   :  { %2439 = vmatpush1.bf16.msra.mxu0 %v6765_v13  ;;  %2546 = vmatpush1.bf16.msra.mxu1 %v6768_v14  ;;  %v6842_v13 = vld [vmem:[#allocation8 + $0x44c] ss:$16 sps:$4 sm:$0xff]   ;;  %v6837_v14 = vld [vmem:[#allocation8 + $0x740] ss:$16 sps:$4 sm:$0xff]  }
 0x20f   :  { %2440 = vmatprep.subr.bf16.mxu0 %v6773_v15  ;;  %2547 = vmatprep.subr.bf16.mxu1 %v6776_v16  ;;  %v6840_v15 = vld [vmem:[#allocation8 + $0x448] ss:$16 sps:$4 sm:$0xff]   ;;  %v6845_v16 = vld [vmem:[#allocation8 + $0x764] ss:$16 sps:$4 sm:$0xff]  }
 0x212   :  { %2441 = vmatpush1.bf16.msra.mxu0 %v6771_v19  ;;  %2548 = vmatpush1.bf16.msra.mxu1 %v6774_v20  ;;  %v6851_v19 = vld [vmem:[#allocation8 + $0x784] ss:$16 sps:$4 sm:$0xff]   ;;  %v6849_v20 = vld [vmem:[#allocation8 + $0x780] ss:$16 sps:$4 sm:$0xff]  }
 0x213   :  { %2451 = vmatprep.subr.bf16.mxu0 %v6779_v21  ;;  %2549 = vmatprep.subr.bf16.mxu1 %v6782_v22  ;;  %v6852_v21 = vld [vmem:[#allocation8 + $0x488] ss:$16 sps:$4 sm:$0xff]   ;;  %v256_v22 = vsub.s32 6, %v7638_v8 }
 0x214   :  { %v7151_v8 = vld [vmem:[#allocation17 + $0x78] sm:$0xff]  }
 0x215   :  { %2443 = vmatmul.mubr.bf16.vlgmr.msra.gmra.mrb[4].mxu0 %v7696_v24 }
 0x216   :  { %2452 = vmatpush1.bf16.msra.mxu0 %v6777_v25  ;;  %2550 = vmatpush1.bf16.msra.mxu1 %v6780_v26  ;;  %v6860_v25 = vld [vmem:[#allocation8 + $0x4ac] ss:$16 sps:$4 sm:$0xff]   ;;  %v6855_v26 = vld [vmem:[#allocation8 + $0x7a0] ss:$16 sps:$4 sm:$0xff]  }
 0x217   :  { %2453 = vmatprep.subr.bf16.mxu0 %v6785_v28  ;;  %2551 = vmatprep.subr.bf16.mxu1 %v6788_v1  ;;  %v6858_v28 = vld [vmem:[#allocation8 + $0x4a8] ss:$16 sps:$4 sm:$0xff]   ;;  %v257_v1 = vrot.slane %v7643_v9, %v256_v22 }
 0x218   :  { %2483 = vmatprep.mubr.bf16.mxu0 %v7698_v29  ;;  %v6870_v9 = vld [vmem:[#allocation8 + $0x4e8] ss:$16 sps:$4 sm:$0xff]  }
 0x21a   :  { %2454 = vmatpush1.bf16.msra.mxu0 %v6783_v30  ;;  %2552 = vmatpush1.bf16.msra.mxu1 %v6786_v32  ;;  %v6863_v30 = vld [vmem:[#allocation8 + $0x7c4] ss:$16 sps:$4 sm:$0xff]   ;;  %v6866_v32 = vld [vmem:[#allocation8 + $0x4cc] ss:$16 sps:$4 sm:$0xff]  }
 0x21b   :  { %2455 = vmatprep.subr.bf16.mxu0 %v6791_v33  ;;  %2553 = vmatprep.subr.bf16.mxu1 %v6794_v34  ;;  %v6861_v33 = vld [vmem:[#allocation8 + $0x7c0] ss:$16 sps:$4 sm:$0xff]   ;;  %v6864_v34 = vld [vmem:[#allocation8 + $0x4c8] ss:$16 sps:$4 sm:$0xff]  }
 0x21e   :  { %2456 = vmatpush1.bf16.msra.mxu0 %v6789_v35  ;;  %2554 = vmatpush1.bf16.msra.mxu1 %v6792_v38  ;;  %v748_v35 = vadd.f32 %v7680_v31, %v257_v1  ;;  %v6869_v38 = vld [vmem:[#allocation8 + $0x7e4] ss:$16 sps:$4 sm:$0xff]   ;;  %v6873_v31 = vld [vmem:[#allocation8 + $0x508] ss:$16 sps:$4 sm:$0xff]  }
 0x21f   :  { %2457 = vmatprep.subr.bf16.mxu0 %v6797_v40  ;;  %2555 = vmatprep.subr.bf16.mxu1 %v6800_v41  ;;  %v6872_v40 = vld [vmem:[#allocation8 + $0x4ec] ss:$16 sps:$4 sm:$0xff]   ;;  %v2664_v41 = vld [vmem:[#allocation11] sm:$0xff] }
 0x220   :  { %v2724_v1 = vld [vmem:[#allocation11 + $0x1e0] sm:$0xff] }
 0x222   :  { %2458 = vmatpush1.bf16.msra.mxu0 %v6795_v42  ;;  %2556 = vmatpush1.bf16.msra.mxu1 %v6798_v43  ;;  %v2668_v42 = vld [vmem:[#allocation11 + $0x20] sm:$0xff]  ;;  %v6867_v43 = vld [vmem:[#allocation8 + $0x7e0] ss:$16 sps:$4 sm:$0xff]  }
 0x223   :  { %2459 = vmatprep.subr.bf16.mxu0 %v6803_v44  ;;  %2557 = vmatprep.subr.bf16.mxu1 %v6806_v45  ;;  %v760_v44 = vmax.f32 %v748_v35, 0.0  ;;  %v6875_v45 = vld [vmem:[#allocation8 + $0x50c] ss:$16 sps:$4 sm:$0xff]   ;;  %v2728_v35 = vld [vmem:[#allocation11 + $0x200] sm:$0xff] }
 0x226   :  { %2460 = vmatpush1.bf16.msra.mxu0 %v6801_v46  ;;  %2558 = vmatpush1.bf16.msra.mxu1 %v6804_v47  ;;  %v6056_v46 = vcombine.high %v2664_v41, %v2668_v42  ;;  %v2672_v47 = vld [vmem:[#allocation11 + $0x40] sm:$0xff] }
 0x227   :  { %2461 = vmatprep.subr.bf16.mxu0 %v6809_v48  ;;  %2559 = vmatprep.subr.bf16.mxu1 %v6812_v49  ;;  %v2676_v48 = vld [vmem:[#allocation11 + $0x60] sm:$0xff]  ;;  %v6055_v49 = vcombine.low %v2664_v41, %v2668_v42  ;;  %v6899_v42 = vld [vmem:[#allocation8 + $0x60c] ss:$16 sps:$4 sm:$0xff]  }
 0x22a   :  { %2462 = vmatpush1.bf16.msra.mxu0 %v6807_v50  ;;  %2560 = vmatpush1.bf16.msra.mxu1 %v6810_v51  ;;  %v7709_v50 = vpack.c.bf16 %v760_v44, %v760_v44  ;;  %v6878_v51 = vld [vmem:[#allocation8 + $0x52c] ss:$16 sps:$4 sm:$0xff]   ;;  %v2740_v44 = vld [vmem:[#allocation11 + $0x260] sm:$0xff] }
 0x22b   :  { %2463 = vmatprep.subr.bf16.mxu0 %v6815_v52  ;;  %2561 = vmatprep.subr.bf16.mxu1 %v6818_v53  ;;  %v6064_v52 = vcombine.high %v2672_v47, %v2676_v48  ;;  %v2680_v53 = vld [vmem:[#allocation11 + $0x80] sm:$0xff] }
 0x22e   :  { %2464 = vmatpush1.bf16.msra.mxu0 %v6813_v23  ;;  %2562 = vmatpush1.bf16.msra.mxu1 %v6816_v54  ;;  %v2684_v23 = vld [vmem:[#allocation11 + $0xa0] sm:$0xff] }
 0x22f   :  { %2465 = vmatprep.subr.bf16.mxu0 %v6821_v55  ;;  %2563 = vmatprep.subr.bf16.mxu1 %v6824_v56  ;;  %v6876_v54 = vld [vmem:[#allocation8 + $0x528] ss:$16 sps:$4 sm:$0xff]   ;;  %v6063_v55 = vcombine.low %v2672_v47, %v2676_v48  ;;  %v6881_v56 = vld [vmem:[#allocation8 + $0x54c] ss:$16 sps:$4 sm:$0xff]  }
 0x232   :  { %2466 = vmatpush1.bf16.msra.mxu0 %v6819_v59  ;;  %2564 = vmatpush1.bf16.msra.mxu1 %v6822_v60  ;;  %v6072_v59 = vcombine.high %v2680_v53, %v2684_v23  ;;  %v2688_v60 = vld [vmem:[#allocation11 + $0xc0] sm:$0xff] }
 0x233   :  { %2467 = vmatprep.subr.bf16.mxu0 %v6827_v61  ;;  %2574 = vmatprep.subr.bf16.mxu1 %v6830_v62  ;;  %v2692_v61 = vld [vmem:[#allocation11 + $0xe0] sm:$0xff] }
 0x234   :  { %v6879_v62 = vld [vmem:[#allocation8 + $0x548] ss:$16 sps:$4 sm:$0xff]  }
 0x235   :  { %2566 = vmatmul.mubr.bf16.vlgmr.msra.gmra.mrb[16].mxu1 %v7671_v58  ;;  %v6843_v58 = vld [vmem:[#allocation8 + $0x760] ss:$16 sps:$4 sm:$0xff]  }
 0x236   :  { %2468 = vmatpush1.bf16.msra.mxu0 %v6825_v3  ;;  %2575 = vmatpush1.bf16.msra.mxu1 %v6828_v4  ;;  %v6071_v3 = vcombine.low %v2680_v53, %v2684_v23  ;;  %v6884_v4 = vld [vmem:[#allocation8 + $0x56c] ss:$16 sps:$4 sm:$0xff]  }
 0x237   :  { %2606 = vmatprep.mubr.bf16.mxu1 %v7676_v2  ;;  %2469 = vmatprep.subr.bf16.mxu0 %v6833_v5  ;;  %v6854_v2 = vld [vmem:[#allocation8 + $0x48c] ss:$16 sps:$4 sm:$0xff]   ;;  %v6080_v5 = vcombine.high %v2688_v60, %v2692_v61 }
 0x238   :  { %2576 = vmatprep.subr.bf16.mxu1 %v6836_v6  ;;  %v2696_v6 = vld [vmem:[#allocation11 + $0x100] sm:$0xff] }
 0x23a   :  { %2470 = vmatpush1.bf16.msra.mxu0 %v6831_v7  ;;  %2577 = vmatpush1.bf16.msra.mxu1 %v6834_v11  ;;  %v2700_v7 = vld [vmem:[#allocation11 + $0x120] sm:$0xff] }
 0x23b   :  { %2471 = vmatprep.subr.bf16.mxu0 %v6839_v12  ;;  %2578 = vmatprep.subr.bf16.mxu1 %v6842_v13  ;;  %v6882_v11 = vld [vmem:[#allocation8 + $0x568] ss:$16 sps:$4 sm:$0xff]   ;;  %v6079_v12 = vcombine.low %v2688_v60, %v2692_v61  ;;  %v6887_v13 = vld [vmem:[#allocation8 + $0x58c] ss:$16 sps:$4 sm:$0xff]  }
 0x23c   :  { %v2760_v61 = vld [vmem:[#allocation11 + $0x300] sm:$0xff] }
 0x23e   :  { %2472 = vmatpush1.bf16.msra.mxu0 %v6837_v14  ;;  %2579 = vmatpush1.bf16.msra.mxu1 %v6840_v15  ;;  %v6088_v14 = vcombine.high %v2696_v6, %v2700_v7  ;;  %v2704_v15 = vld [vmem:[#allocation11 + $0x140] sm:$0xff] }
 0x23f   :  { %2473 = vmatprep.subr.bf16.mxu0 %v6845_v16  ;;  %2580 = vmatprep.subr.bf16.mxu1 %v6848_v17  ;;  %v2708_v16 = vld [vmem:[#allocation11 + $0x160] sm:$0xff] }
 0x240   :  { %v6885_v17 = vld [vmem:[#allocation8 + $0x588] ss:$16 sps:$4 sm:$0xff]  }
 0x242   :  { %2474 = vmatpush1.bf16.msra.mxu0 %v6843_v58  ;;  %2581 = vmatpush1.bf16.msra.mxu1 %v6846_v18  ;;  %v6087_v58 = vcombine.low %v2696_v6, %v2700_v7  ;;  %v6890_v18 = vld [vmem:[#allocation8 + $0x5ac] ss:$16 sps:$4 sm:$0xff]   ;;  %v2768_v6 = vld [vmem:[#allocation11 + $0x340] sm:$0xff] }
 0x243   :  { %2475 = vmatprep.subr.bf16.mxu0 %v6851_v19  ;;  %2582 = vmatprep.subr.bf16.mxu1 %v6854_v2  ;;  %v6096_v19 = vcombine.high %v2704_v15, %v2708_v16  ;;  %v2712_v2 = vld [vmem:[#allocation11 + $0x180] sm:$0xff] }
 0x244   :  { %v2772_v7 = vld [vmem:[#allocation11 + $0x360] sm:$0xff] }
 0x246   :  { %2476 = vmatpush1.bf16.msra.mxu0 %v6849_v20  ;;  %2583 = vmatpush1.bf16.msra.mxu1 %v6852_v21  ;;  %v2716_v20 = vld [vmem:[#allocation11 + $0x1a0] sm:$0xff] }
 0x247   :  { %2477 = vmatprep.subr.bf16.mxu0 %v6857_v27  ;;  %2584 = vmatprep.subr.bf16.mxu1 %v6860_v25  ;;  %v6888_v21 = vld [vmem:[#allocation8 + $0x5a8] ss:$16 sps:$4 sm:$0xff]   ;;  %v6095_v27 = vcombine.low %v2704_v15, %v2708_v16  ;;  %v6893_v25 = vld [vmem:[#allocation8 + $0x5cc] ss:$16 sps:$4 sm:$0xff]  }
 0x248   :  { %v6912_v15 = vld [vmem:[#allocation8 + $0x6a8] ss:$16 sps:$4 sm:$0xff]   ;;  %v6917_v16 = vld [vmem:[#allocation8 + $0x6cc] ss:$16 sps:$4 sm:$0xff]  }
 0x24a   :  { %2478 = vmatpush1.bf16.msra.mxu0 %v6855_v26  ;;  %2585 = vmatpush1.bf16.msra.mxu1 %v6858_v28  ;;  %v6104_v26 = vcombine.high %v2712_v2, %v2716_v20  ;;  %v2720_v28 = vld [vmem:[#allocation11 + $0x1c0] sm:$0xff] }
 0x24b   :  { %2479 = vmatprep.subr.bf16.mxu0 %v6863_v30  ;;  %2586 = vmatprep.subr.bf16.mxu1 %v6866_v32  ;;  %v6891_v30 = vld [vmem:[#allocation8 + $0x5c8] ss:$16 sps:$4 sm:$0xff]   ;;  %v6103_v32 = vcombine.low %v2712_v2, %v2716_v20  ;;  %v6111_v41 = vcombine.low %v2720_v28, %v2724_v1 }
 0x24c   :  { %v6915_v2 = vld [vmem:[#allocation8 + $0x6c8] ss:$16 sps:$4 sm:$0xff]  }
 0x24e   :  { %2480 = vmatpush1.bf16.msra.mxu0 %v6861_v33  ;;  %2587 = vmatpush1.bf16.msra.mxu1 %v6864_v34  ;;  %v6896_v33 = vld [vmem:[#allocation8 + $0x5ec] ss:$16 sps:$4 sm:$0xff]   ;;  %v6112_v34 = vcombine.high %v2720_v28, %v2724_v1  ;;  %v6924_v1 = vld [vmem:[#allocation8 + $0x728] ss:$16 sps:$4 sm:$0xff]  }
 0x24f   :  { %2481 = vmatprep.subr.bf16.mxu0 %v6869_v38  ;;  %2588 = vmatprep.subr.bf16.mxu1 %v6872_v40  ;;  %v2732_v38 = vld [vmem:[#allocation11 + $0x220] sm:$0xff]  ;;  %v6926_v28 = vld [vmem:[#allocation8 + $0x72c] ss:$16 sps:$4 sm:$0xff]  }
 0x250   :  { %v6894_v40 = vld [vmem:[#allocation8 + $0x5e8] ss:$16 sps:$4 sm:$0xff]   ;;  %v6119_v47 = vcombine.low %v2728_v35, %v2732_v38 }
 0x252   :  { %2482 = vmatpush1.bf16.msra.mxu0 %v6867_v43  ;;  %2589 = vmatpush1.bf16.msra.mxu1 %v6870_v9  ;;  %v6120_v43 = vcombine.high %v2728_v35, %v2732_v38  ;;  %v2736_v9 = vld [vmem:[#allocation11 + $0x240] sm:$0xff]  ;;  %v6935_v35 = vld [vmem:[#allocation8 + $0x78c] ss:$16 sps:$4 sm:$0xff]  }
 0x253   :  { %2590 = vmatprep.subr.bf16.mxu1 %v6875_v45  ;;  %4242 = vmatprep.subr.bf16.mxu0 %v6056_v46  ;;  %v6897_v45 = vld [vmem:[#allocation8 + $0x608] ss:$16 sps:$4 sm:$0xff]   ;;  %v6902_v46 = vld [vmem:[#allocation8 + $0x62c] ss:$16 sps:$4 sm:$0xff]   ;;  %v6128_v48 = vcombine.high %v2736_v9, %v2740_v44  ;;  %v6127_v53 = vcombine.low %v2736_v9, %v2740_v44 }
 0x254   :  { %v6933_v38 = vld [vmem:[#allocation8 + $0x788] ss:$16 sps:$4 sm:$0xff]  }
 0x255   :  { %2484 = vmatmul.mubr.bf16.vlgmr.msra.gmra.mrb[4].mxu0 %v7709_v50  ;;  %v2780_v9 = vld [vmem:[#allocation11 + $0x3a0] sm:$0xff] }
 0x256   :  { %2591 = vmatpush1.bf16.msra.mxu1 %v6873_v31  ;;  %4243 = vmatpush1.bf16.msra.mxu0 %v6055_v49  ;;  %v2744_v31 = vld [vmem:[#allocation11 + $0x280] sm:$0xff] }
 0x257   :  { %2592 = vmatprep.subr.bf16.mxu1 %v6878_v51  ;;  %4244 = vmatprep.subr.bf16.mxu0 %v6064_v52  ;;  %v2748_v49 = vld [vmem:[#allocation11 + $0x2a0] sm:$0xff]  ;;  %v6905_v52 = vld [vmem:[#allocation8 + $0x64c] ss:$16 sps:$4 sm:$0xff]  }
 0x258   :  { %v6900_v51 = vld [vmem:[#allocation8 + $0x628] ss:$16 sps:$4 sm:$0xff]   ;;  %v6136_v23 = vcombine.high %v2744_v31, %v2748_v49 }
 0x25a   :  { %2593 = vmatpush1.bf16.msra.mxu1 %v6876_v54  ;;  %4245 = vmatpush1.bf16.msra.mxu0 %v6063_v55  ;;  %v2752_v54 = vld [vmem:[#allocation11 + $0x2c0] sm:$0xff] }
 0x25b   :  { %2594 = vmatprep.subr.bf16.mxu1 %v6881_v56  ;;  %4246 = vmatprep.subr.bf16.mxu0 %v6072_v59  ;;  %v2756_v55 = vld [vmem:[#allocation11 + $0x2e0] sm:$0xff]  ;;  %v6908_v59 = vld [vmem:[#allocation8 + $0x66c] ss:$16 sps:$4 sm:$0xff]  }
 0x25c   :  { %v6903_v56 = vld [vmem:[#allocation8 + $0x648] ss:$16 sps:$4 sm:$0xff]   ;;  %v6144_v60 = vcombine.high %v2752_v54, %v2756_v55 }
 0x25e   :  { %2595 = vmatpush1.bf16.msra.mxu1 %v6879_v62  ;;  %4247 = vmatpush1.bf16.msra.mxu0 %v6071_v3  ;;  %v2764_v62 = vld [vmem:[#allocation11 + $0x320] sm:$0xff]  ;;  %v6911_v3 = vld [vmem:[#allocation8 + $0x68c] ss:$16 sps:$4 sm:$0xff]  }
 0x25f   :  { %2596 = vmatprep.subr.bf16.mxu1 %v6884_v4  ;;  %4248 = vmatprep.subr.bf16.mxu0 %v6080_v5  ;;  %v6143_v4 = vcombine.low %v2752_v54, %v2756_v55  ;;  %v6152_v5 = vcombine.high %v2760_v61, %v2764_v62  ;;  %v2673_v55 = vld [vmem:[#allocation11 + $0x48] sm:$0xff] }
 0x262   :  { %2597 = vmatpush1.bf16.msra.mxu1 %v6882_v11  ;;  %4249 = vmatpush1.bf16.msra.mxu0 %v6079_v12  ;;  %v6909_v11 = vld [vmem:[#allocation8 + $0x688] ss:$16 sps:$4 sm:$0xff]   ;;  %v6914_v12 = vld [vmem:[#allocation8 + $0x6ac] ss:$16 sps:$4 sm:$0xff]  }
 0x263   :  { %2598 = vmatprep.subr.bf16.mxu1 %v6887_v13  ;;  %4250 = vmatprep.subr.bf16.mxu0 %v6088_v14  ;;  %v6151_v13 = vcombine.low %v2760_v61, %v2764_v62  ;;  %v6160_v14 = vcombine.high %v2768_v6, %v2772_v7 }
 0x266   :  { %2599 = vmatpush1.bf16.msra.mxu1 %v6885_v17  ;;  %4251 = vmatpush1.bf16.msra.mxu0 %v6087_v58  ;;  %v6159_v17 = vcombine.low %v2768_v6, %v2772_v7  ;;  %v2689_v7 = vld [vmem:[#allocation11 + $0xc8] sm:$0xff] }
 0x267   :  { %2600 = vmatprep.subr.bf16.mxu1 %v6890_v18  ;;  %4252 = vmatprep.subr.bf16.mxu0 %v6096_v19 }
 0x26a   :  { %2601 = vmatpush1.bf16.msra.mxu1 %v6888_v21  ;;  %4253 = vmatpush1.bf16.msra.mxu0 %v6095_v27  ;;  %v6920_v21 = vld [vmem:[#allocation8 + $0x6ec] ss:$16 sps:$4 sm:$0xff]   ;;  %v6918_v27 = vld [vmem:[#allocation8 + $0x6e8] ss:$16 sps:$4 sm:$0xff]  }
 0x26b   :  { %2602 = vmatprep.subr.bf16.mxu1 %v6893_v25  ;;  %4254 = vmatprep.subr.bf16.mxu0 %v6104_v26  ;;  %v6923_v25 = vld [vmem:[#allocation8 + $0x70c] ss:$16 sps:$4 sm:$0xff]   ;;  %v6921_v26 = vld [vmem:[#allocation8 + $0x708] ss:$16 sps:$4 sm:$0xff]  }
 0x26e   :  { %2603 = vmatpush1.bf16.msra.mxu1 %v6891_v30  ;;  %4255 = vmatpush1.bf16.msra.mxu0 %v6103_v32  ;;  %v6929_v30 = vld [vmem:[#allocation8 + $0x74c] ss:$16 sps:$4 sm:$0xff]   ;;  %v6927_v32 = vld [vmem:[#allocation8 + $0x748] ss:$16 sps:$4 sm:$0xff]  }
 0x26f   :  { %2604 = vmatprep.subr.bf16.mxu1 %v6896_v33  ;;  %4256 = vmatprep.subr.bf16.mxu0 %v6112_v34  ;;  %v6932_v33 = vld [vmem:[#allocation8 + $0x76c] ss:$16 sps:$4 sm:$0xff]   ;;  %v6930_v34 = vld [vmem:[#allocation8 + $0x768] ss:$16 sps:$4 sm:$0xff]  }
 0x272   :  { %2605 = vmatpush1.bf16.msra.mxu1 %v6894_v40  ;;  %4257 = vmatpush1.bf16.msra.mxu0 %v6111_v41  ;;  %v6938_v40 = vld [vmem:[#allocation8 + $0x7ac] ss:$16 sps:$4 sm:$0xff]   ;;  %v6936_v41 = vld [vmem:[#allocation8 + $0x7a8] ss:$16 sps:$4 sm:$0xff]  }
 0x273   :  { %2615 = vmatprep.subr.bf16.mxu1 %v6899_v42  ;;  %4258 = vmatprep.subr.bf16.mxu0 %v6120_v43  ;;  %v6941_v42 = vld [vmem:[#allocation8 + $0x7cc] ss:$16 sps:$4 sm:$0xff]   ;;  %v2776_v43 = vld [vmem:[#allocation11 + $0x380] sm:$0xff] }
 0x274   :  { %v6168_v44 = vcombine.high %v2776_v43, %v2780_v9 }
 0x275   :  { %2607 = vmatmul.mubr.bf16.vlgmr.msra.gmra.mrb[16].mxu1 %v7696_v24  ;;  %v6135_v24 = vcombine.low %v2744_v31, %v2748_v49  ;;  %v2788_v31 = vld [vmem:[#allocation11 + $0x3e0] sm:$0xff]  ;;  %v2665_v49 = vld [vmem:[#allocation11 + $0x8] sm:$0xff] }
 0x276   :  { %2616 = vmatpush1.bf16.msra.mxu1 %v6897_v45  ;;  %2647 = vmatprep.mubr.bf16.mxu1 %v7698_v29  ;;  %v6906_v29 = vld [vmem:[#allocation8 + $0x668] ss:$16 sps:$4 sm:$0xff]   ;;  %v6167_v45 = vcombine.low %v2776_v43, %v2780_v9  ;;  %v2745_v9 = vld [vmem:[#allocation11 + $0x288] sm:$0xff] }
 0x277   :  { %2617 = vmatprep.subr.bf16.mxu1 %v6902_v46  ;;  %4259 = vmatpush1.bf16.msra.mxu0 %v6119_v47  ;;  %v6939_v46 = vld [vmem:[#allocation8 + $0x7c8] ss:$16 sps:$4 sm:$0xff]   ;;  %v6944_v47 = vld [vmem:[#allocation8 + $0x7ec] ss:$16 sps:$4 sm:$0xff]  }
 0x278   :  { %4260 = vmatprep.subr.bf16.mxu0 %v6128_v48  ;;  %v2784_v48 = vld [vmem:[#allocation11 + $0x3c0] sm:$0xff] }
 0x27a   :  { %2618 = vmatpush1.bf16.msra.mxu1 %v6900_v51  ;;  %v2669_v51 = vld [vmem:[#allocation11 + $0x28] sm:$0xff] }
 0x27b   :  { %2619 = vmatprep.subr.bf16.mxu1 %v6905_v52  ;;  %4261 = vmatpush1.bf16.msra.mxu0 %v6127_v53  ;;  %v6176_v52 = vcombine.high %v2784_v48, %v2788_v31  ;;  %v6175_v53 = vcombine.low %v2784_v48, %v2788_v31  ;;  %v6058_v54 = vcombine.high %v2665_v49, %v2669_v51  ;;  %v2757_v48 = vld [vmem:[#allocation11 + $0x2e8] sm:$0xff] }
 0x27c   :  { %4262 = vmatprep.subr.bf16.mxu0 %v6136_v23  ;;  %v6942_v23 = vld [vmem:[#allocation8 + $0x7e8] ss:$16 sps:$4 sm:$0xff]  }
 0x27e   :  { %2620 = vmatpush1.bf16.msra.mxu1 %v6903_v56  ;;  %v2677_v56 = vld [vmem:[#allocation11 + $0x68] sm:$0xff] }
 0x27f   :  { %2621 = vmatprep.subr.bf16.mxu1 %v6908_v59  ;;  %4263 = vmatpush1.bf16.msra.mxu0 %v6135_v24  ;;  %v7718_v59 = vld [vmem:[#allocation11 + $0x400] sm:$0xff] }
 0x280   :  { %4264 = vmatprep.subr.bf16.mxu0 %v6144_v60  ;;  %v7720_v24 = vld [vmem:[#allocation11 + $0x420] sm:$0xff]  ;;  %v6057_v60 = vcombine.low %v2665_v49, %v2669_v51  ;;  %v2761_v51 = vld [vmem:[#allocation11 + $0x308] sm:$0xff] }
 0x281   :  { %v6183_v61 = vcombine.low %v7718_v59, %v7720_v24  ;;  %v6184_v62 = vcombine.high %v7718_v59, %v7720_v24  ;;  %v2824_v24 = vld [vmem:[#allocation11 + $0x500] sm:$0xff] }
 0x282   :  { %2622 = vmatpush1.bf16.msra.mxu1 %v6906_v29  ;;  %v6066_v29 = vcombine.high %v2673_v55, %v2677_v56 }
 0x283   :  { %2623 = vmatprep.subr.bf16.mxu1 %v6911_v3  ;;  %4265 = vmatpush1.bf16.msra.mxu0 %v6143_v4  ;;  %v2681_v3 = vld [vmem:[#allocation11 + $0x88] sm:$0xff] }
 0x284   :  { %4266 = vmatprep.subr.bf16.mxu0 %v6152_v5  ;;  %v2685_v4 = vld [vmem:[#allocation11 + $0xa8] sm:$0xff]  ;;  %v6065_v5 = vcombine.low %v2673_v55, %v2677_v56 }
 0x285   :  { %v6074_v6 = vcombine.high %v2681_v3, %v2685_v4  ;;  %v2773_v55 = vld [vmem:[#allocation11 + $0x368] sm:$0xff] }
 0x286   :  { %2624 = vmatpush1.bf16.msra.mxu1 %v6909_v11  ;;  %v2693_v11 = vld [vmem:[#allocation11 + $0xe8] sm:$0xff] }
 0x287   :  { %2625 = vmatprep.subr.bf16.mxu1 %v6914_v12  ;;  %4267 = vmatpush1.bf16.msra.mxu0 %v6151_v13  ;;  %v6073_v12 = vcombine.low %v2681_v3, %v2685_v4  ;;  %v6082_v13 = vcombine.high %v2689_v7, %v2693_v11 }
 0x288   :  { %v7714_v58 = vpop.f32.mrb[12].mxu1  ;;  %4268 = vmatprep.subr.bf16.mxu0 %v6160_v14  ;;  %v2697_v14 = vld [vmem:[#allocation11 + $0x108] sm:$0xff] }
 0x289   :  { %v7716_v18 = vpop.f32.mrb[13].mxu1 }
 0x28a   :  { %2626 = vmatpush1.bf16.msra.mxu1 %v6912_v15  ;;  %v2366_v19 = vpop.f32.mrb[14].mxu1  ;;  %v2701_v15 = vld [vmem:[#allocation11 + $0x128] sm:$0xff] }
 0x28b   :  { %v2367_v20 = vpop.f32.mrb[15].mxu1  ;;  %2627 = vmatprep.subr.bf16.mxu1 %v6917_v16  ;;  %4269 = vmatpush1.bf16.msra.mxu0 %v6159_v17  ;;  %v6081_v16 = vcombine.low %v2689_v7, %v2693_v11  ;;  %v6090_v17 = vcombine.high %v2697_v14, %v2701_v15  ;;  %v2705_v19 = vld [vmem:[#allocation11 + $0x148] sm:$0xff] }
 0x28c   :  { %4270 = vmatprep.subr.bf16.mxu0 %v6168_v44  ;;  %v2749_v44 = vld [vmem:[#allocation11 + $0x2a8] sm:$0xff] }
 0x28d   :  { %v6137_v31 = vcombine.low %v2745_v9, %v2749_v44 }
 0x28e   :  { %2628 = vmatpush1.bf16.msra.mxu1 %v6915_v2  ;;  %v2709_v2 = vld [vmem:[#allocation11 + $0x168] sm:$0xff] }
 0x28f   :  { %2629 = vmatprep.subr.bf16.mxu1 %v6920_v21  ;;  %4271 = vmatpush1.bf16.msra.mxu0 %v6167_v45  ;;  %v6098_v20 = vcombine.high %v2705_v19, %v2709_v2  ;;  %v2713_v21 = vld [vmem:[#allocation11 + $0x188] sm:$0xff] }
 0x290   :  { %4272 = vmatprep.subr.bf16.mxu0 %v6176_v52  ;;  %v2765_v52 = vld [vmem:[#allocation11 + $0x328] sm:$0xff] }
 0x291   :  { %v6153_v56 = vcombine.low %v2761_v51, %v2765_v52 }
 0x292   :  { %2630 = vmatpush1.bf16.msra.mxu1 %v6918_v27  ;;  %v2717_v27 = vld [vmem:[#allocation11 + $0x1a8] sm:$0xff] }
 0x293   :  { %2631 = vmatprep.subr.bf16.mxu1 %v6923_v25  ;;  %4273 = vmatpush1.bf16.msra.mxu0 %v6175_v53  ;;  %v6097_v25 = vcombine.low %v2705_v19, %v2709_v2 }
 0x294   :  { %4283 = vmatprep.subr.bf16.mxu0 %v6184_v62  ;;  %v2777_v62 = vld [vmem:[#allocation11 + $0x388] sm:$0xff] }
 0x296   :  { %2632 = vmatpush1.bf16.msra.mxu1 %v6921_v26  ;;  %v6106_v26 = vcombine.high %v2713_v21, %v2717_v27 }
 0x297   :  { %2633 = vmatprep.subr.bf16.mxu1 %v6926_v28  ;;  %v2721_v28 = vld [vmem:[#allocation11 + $0x1c8] sm:$0xff] }
 0x29a   :  { %2634 = vmatpush1.bf16.msra.mxu1 %v6924_v1  ;;  %v2725_v1 = vld [vmem:[#allocation11 + $0x1e8] sm:$0xff] }
 0x29b   :  { %2635 = vmatprep.subr.bf16.mxu1 %v6929_v30  ;;  %v6105_v30 = vcombine.low %v2713_v21, %v2717_v27 }
 0x29e   :  { %2636 = vmatpush1.bf16.msra.mxu1 %v6927_v32  ;;  %v6114_v32 = vcombine.high %v2721_v28, %v2725_v1 }
 0x29f   :  { %2637 = vmatprep.subr.bf16.mxu1 %v6932_v33  ;;  %v2729_v33 = vld [vmem:[#allocation11 + $0x208] sm:$0xff] }
 0x2a2   :  { %2638 = vmatpush1.bf16.msra.mxu1 %v6930_v34  ;;  %v2733_v34 = vld [vmem:[#allocation11 + $0x228] sm:$0xff] }
 0x2a3   :  { %2639 = vmatprep.subr.bf16.mxu1 %v6935_v35  ;;  %v6113_v35 = vcombine.low %v2721_v28, %v2725_v1 }
 0x2a6   :  { %2640 = vmatpush1.bf16.msra.mxu1 %v6933_v38  ;;  %v6122_v38 = vcombine.high %v2729_v33, %v2733_v34 }
 0x2a7   :  { %2641 = vmatprep.subr.bf16.mxu1 %v6938_v40  ;;  %v2737_v40 = vld [vmem:[#allocation11 + $0x248] sm:$0xff] }
 0x2aa   :  { %2642 = vmatpush1.bf16.msra.mxu1 %v6936_v41  ;;  %v2741_v41 = vld [vmem:[#allocation11 + $0x268] sm:$0xff] }
 0x2ab   :  { %2643 = vmatprep.subr.bf16.mxu1 %v6941_v42  ;;  %v6121_v42 = vcombine.low %v2729_v33, %v2733_v34  ;;  %v6130_v43 = vcombine.high %v2737_v40, %v2741_v41  ;;  %v6129_v45 = vcombine.low %v2737_v40, %v2741_v41  ;;  %v2804_v33 = vld [vmem:[#allocation11 + $0x460] sm:$0xff]  ;;  %v2801_v34 = vld [vmem:[#allocation11 + $0x448] sm:$0xff] }
 0x2ae   :  { %2644 = vmatpush1.bf16.msra.mxu1 %v6939_v46  ;;  %v6138_v46 = vcombine.high %v2745_v9, %v2749_v44  ;;  %v2809_v9 = vld [vmem:[#allocation11 + $0x488] sm:$0xff] }
 0x2af   :  { %2645 = vmatprep.subr.bf16.mxu1 %v6944_v47  ;;  %v2753_v47 = vld [vmem:[#allocation11 + $0x2c8] sm:$0xff] }
 0x2b0   :  { %v6146_v49 = vcombine.high %v2753_v47, %v2757_v48  ;;  %v6145_v53 = vcombine.low %v2753_v47, %v2757_v48  ;;  %v2813_v44 = vld [vmem:[#allocation11 + $0x4a8] sm:$0xff] }
 0x2b1   :  { %v6202_v48 = vcombine.high %v2809_v9, %v2813_v44 }
 0x2b2   :  { %2646 = vmatpush1.bf16.msra.mxu1 %v6942_v23  ;;  %v6154_v23 = vcombine.high %v2761_v51, %v2765_v52  ;;  %v2817_v51 = vld [vmem:[#allocation11 + $0x4c8] sm:$0xff] }
 0x2b3   :  { %4324 = vmatprep.subr.bf16.mxu1 %v6058_v54  ;;  %v2769_v54 = vld [vmem:[#allocation11 + $0x348] sm:$0xff] }
 0x2b4   :  { %v6161_v3 = vcombine.low %v2769_v54, %v2773_v55  ;;  %v2821_v52 = vld [vmem:[#allocation11 + $0x4e8] sm:$0xff] }
 0x2b5   :  { %2648 = vmatmul.mubr.bf16.vlgmr.msra.gmra.mrb[16].mxu1 %v7709_v50  ;;  %v6089_v50 = vcombine.low %v2697_v14, %v2701_v15  ;;  %v6210_v59 = vcombine.high %v2817_v51, %v2821_v52 }
 0x2b6   :  { %4325 = vmatpush1.bf16.msra.mxu1 %v6057_v60  ;;  %v6162_v60 = vcombine.high %v2769_v54, %v2773_v55  ;;  %v2825_v55 = vld [vmem:[#allocation11 + $0x508] sm:$0xff] }
 0x2b7   :  { %4326 = vmatprep.subr.bf16.mxu1 %v6066_v29  ;;  %v2781_v29 = vld [vmem:[#allocation11 + $0x3a8] sm:$0xff] }
 0x2b8   :  { %v6170_v4 = vcombine.high %v2777_v62, %v2781_v29  ;;  %v6169_v7 = vcombine.low %v2777_v62, %v2781_v29  ;;  %v6209_v62 = vcombine.low %v2817_v51, %v2821_v52 }
 0x2ba   :  { %4327 = vmatpush1.bf16.msra.mxu1 %v6065_v5  ;;  %v2785_v5 = vld [vmem:[#allocation11 + $0x3c8] sm:$0xff] }
 0x2bb   :  { %4328 = vmatprep.subr.bf16.mxu1 %v6074_v6  ;;  %v2789_v6 = vld [vmem:[#allocation11 + $0x3e8] sm:$0xff] }
 0x2bc   :  { %v6178_v11 = vcombine.high %v2785_v5, %v2789_v6  ;;  %v6177_v14 = vcombine.low %v2785_v5, %v2789_v6  ;;  %v2836_v5 = vld [vmem:[#allocation11 + $0x560] sm:$0xff]  ;;  %v2833_v6 = vld [vmem:[#allocation11 + $0x548] sm:$0xff] }
 0x2be   :  { %4329 = vmatpush1.bf16.msra.mxu1 %v6073_v12  ;;  %v2793_v12 = vld [vmem:[#allocation11 + $0x408] sm:$0xff] }
 0x2bf   :  { %4330 = vmatprep.subr.bf16.mxu1 %v6082_v13  ;;  %v2797_v13 = vld [vmem:[#allocation11 + $0x428] sm:$0xff] }
 0x2c0   :  { %v6186_v15 = vcombine.high %v2793_v12, %v2797_v13  ;;  %v6185_v40 = vcombine.low %v2793_v12, %v2797_v13 }
 0x2c2   :  { %4331 = vmatpush1.bf16.msra.mxu1 %v6081_v16  ;;  %v7727_v16 = vld [vmem:[#allocation10] sm:$0xf] }
 0x2c3   :  { %4332 = vmatprep.subr.bf16.mxu1 %v6090_v17  ;;  %v1031_v17 = vrot.slane %v7727_v16, %v7641_v0  ;;  %v1035_v19 = vrot.slane %v7727_v16, %v7646_v10 }
 0x2c5   :  { %v2363_v2 = vadd.f32 %v7714_v58, %v1031_v17  ;;  %v2844_v17 = vld [vmem:[#allocation11 + $0x5a0] sm:$0xff] }
 0x2c6   :  { %4333 = vmatpush1.bf16.msra.mxu1 %v6089_v50  ;;  %v2365_v50 = vadd.f32 %v7716_v18, %v1035_v19  ;;  %v2808_v18 = vld [vmem:[#allocation11 + $0x480] sm:$0xff]  ;;  %v2841_v19 = vld [vmem:[#allocation11 + $0x588] sm:$0xff] }
 0x2c7   :  { %4334 = vmatprep.subr.bf16.mxu1 %v6098_v20 }
 0x2ca   :  { %4335 = vmatpush1.bf16.msra.mxu1 %v6097_v25 }
 0x2cb   :  { %4336 = vmatprep.subr.bf16.mxu1 %v6106_v26 }
 0x2ce   :  { %4337 = vmatpush1.bf16.msra.mxu1 %v6105_v30  ;;  %v2800_v30 = vld [vmem:[#allocation11 + $0x440] sm:$0xff] }
 0x2cf   :  { %4338 = vmatprep.subr.bf16.mxu1 %v6114_v32  ;;  %v6192_v58 = vcombine.high %v2800_v30, %v2804_v33 }
 0x2d2   :  { %4339 = vmatpush1.bf16.msra.mxu1 %v6113_v35  ;;  %v2805_v35 = vld [vmem:[#allocation11 + $0x468] sm:$0xff] }
 0x2d3   :  { %4340 = vmatprep.subr.bf16.mxu1 %v6122_v38 }
 0x2d6   :  { %4341 = vmatpush1.bf16.msra.mxu1 %v6121_v42  ;;  %v6194_v42 = vcombine.high %v2801_v34, %v2805_v35 }
 0x2d7   :  { %4342 = vmatprep.subr.bf16.mxu1 %v6130_v43  ;;  %v2812_v43 = vld [vmem:[#allocation11 + $0x4a0] sm:$0xff] }
 0x2d8   :  { %v6200_v47 = vcombine.high %v2808_v18, %v2812_v43 }
 0x2da   :  { %4343 = vmatpush1.bf16.msra.mxu1 %v6129_v45  ;;  %v6191_v45 = vcombine.low %v2800_v30, %v2804_v33 }
 0x2db   :  { %4344 = vmatprep.subr.bf16.mxu1 %v6138_v46  ;;  %v6193_v46 = vcombine.low %v2801_v34, %v2805_v35  ;;  %v2856_v35 = vld [vmem:[#allocation11 + $0x600] sm:$0xff] }
 0x2de   :  { %4345 = vmatpush1.bf16.msra.mxu1 %v6137_v31  ;;  %v2816_v31 = vld [vmem:[#allocation11 + $0x4c0] sm:$0xff] }
 0x2df   :  { %4346 = vmatprep.subr.bf16.mxu1 %v6146_v49  ;;  %v2820_v49 = vld [vmem:[#allocation11 + $0x4e0] sm:$0xff] }
 0x2e0   :  { %v6208_v54 = vcombine.high %v2816_v31, %v2820_v49 }
 0x2e2   :  { %4347 = vmatpush1.bf16.msra.mxu1 %v6145_v53  ;;  %v6199_v53 = vcombine.low %v2808_v18, %v2812_v43 }
 0x2e3   :  { %4348 = vmatprep.subr.bf16.mxu1 %v6154_v23  ;;  %v6201_v23 = vcombine.low %v2809_v9, %v2813_v44 }
 0x2e6   :  { %4349 = vmatpush1.bf16.msra.mxu1 %v6153_v56  ;;  %v2829_v56 = vld [vmem:[#allocation11 + $0x528] sm:$0xff] }
 0x2e7   :  { %4350 = vmatprep.subr.bf16.mxu1 %v6162_v60  ;;  %v6207_v60 = vcombine.low %v2816_v31, %v2820_v49  ;;  %v6217_v12 = vcombine.low %v2825_v55, %v2829_v56 }
 0x2ea   :  { %4351 = vmatpush1.bf16.msra.mxu1 %v6161_v3  ;;  %v6218_v3 = vcombine.high %v2825_v55, %v2829_v56 }
 0x2eb   :  { %4352 = vmatprep.subr.bf16.mxu1 %v6170_v4  ;;  %v2832_v4 = vld [vmem:[#allocation11 + $0x540] sm:$0xff] }
 0x2ec   :  { %v6224_v13 = vcombine.high %v2832_v4, %v2836_v5 }
 0x2ee   :  { %4353 = vmatpush1.bf16.msra.mxu1 %v6169_v7  ;;  %v2837_v7 = vld [vmem:[#allocation11 + $0x568] sm:$0xff] }
 0x2ef   :  { %4354 = vmatprep.subr.bf16.mxu1 %v6178_v11 }
 0x2f2   :  { %4355 = vmatpush1.bf16.msra.mxu1 %v6177_v14  ;;  %v6226_v14 = vcombine.high %v2833_v6, %v2837_v7 }
 0x2f3   :  { %4365 = vmatprep.subr.bf16.mxu1 %v6186_v15  ;;  %v2840_v15 = vld [vmem:[#allocation11 + $0x580] sm:$0xff] }
 0x2f4   :  { %v6231_v30 = vcombine.low %v2840_v15, %v2844_v17 }
 0x328   :  { %v2485_v20 = vpop.f32.mrb[4].mxu0 }
 0x329   :  { %v6478_v21 = vadd.f32 %v2485_v20, %v2363_v2  ;;  %v2487_v27 = vpop.f32.mrb[5].mxu0  ;;  %v2845_v2 = vld [vmem:[#allocation11 + $0x5a8] sm:$0xff]  ;;  %v6225_v20 = vcombine.low %v2833_v6, %v2837_v7 }
 0x32a   :  { %v6480_v25 = vadd.f32 %v2487_v27, %v2365_v50  ;;  %v2489_v26 = vpop.f32.mrb[6].mxu0  ;;  %v6223_v50 = vcombine.low %v2832_v4, %v2836_v5  ;;  %v6234_v27 = vcombine.high %v2841_v19, %v2845_v2 }
 0x32b   :  { %v2656_v28 = vmax.f32 %v6478_v21, 0.0  ;;  %v2490_v1 = vpop.f32.mrb[7].mxu0  ;;  %v6232_v21 = vcombine.high %v2840_v15, %v2844_v17  ;;  %v2852_v26 = vld [vmem:[#allocation11 + $0x5e0] sm:$0xff] }
 0x32c   :  { %v2657_v32 = vmax.f32 %v6480_v25, 0.0  ;;  %v2848_v25 = vld [vmem:[#allocation11 + $0x5c0] sm:$0xff]  ;;  %v2853_v1 = vld [vmem:[#allocation11 + $0x5e8] sm:$0xff] }
 0x32d   :  { %v7737_v41 = vpack.c.bf16 %v2656_v28, %v2656_v28  ;;  %v2849_v28 = vld [vmem:[#allocation11 + $0x5c8] sm:$0xff]  ;;  %v6240_v33 = vcombine.high %v2848_v25, %v2852_v26  ;;  %v6239_v18 = vcombine.low %v2848_v25, %v2852_v26 }
 0x32e   :  { %v7735_v38 = vpack.c.bf16 %v2657_v32, %v2657_v32  ;;  %v6233_v32 = vcombine.low %v2841_v19, %v2845_v2  ;;  %v6242_v34 = vcombine.high %v2849_v28, %v2853_v1  ;;  %v6241_v43 = vcombine.low %v2849_v28, %v2853_v1 }
 0x330   :  { %4274 = vmatprep.mubr.bf16.mxu0 %v7735_v38  ;;  %4356 = vmatprep.mubr.bf16.mxu1 %v7735_v38 }
 0x331   :  { %4275 = vmatmul.mubr.bf16.vlgmr.msra.gmra.mrb[8].mxu0 %v7737_v41  ;;  %4357 = vmatmul.mubr.bf16.vlgmr.msra.gmra.mrb[20].mxu1 %v7737_v41 }
 0x332   :  { %4284 = vmatpush1.bf16.msra.mxu0 %v6183_v61  ;;  %4366 = vmatpush1.bf16.msra.mxu1 %v6185_v40  ;;  %v2828_v61 = vld [vmem:[#allocation11 + $0x520] sm:$0xff] }
 0x333   :  { %4285 = vmatprep.subr.bf16.mxu0 %v6192_v58  ;;  %4367 = vmatprep.subr.bf16.mxu1 %v6194_v42  ;;  %v6216_v29 = vcombine.high %v2824_v24, %v2828_v61  ;;  %v6215_v11 = vcombine.low %v2824_v24, %v2828_v61  ;;  %v2860_v40 = vld [vmem:[#allocation11 + $0x620] sm:$0xff]  ;;  %v2857_v58 = vld [vmem:[#allocation11 + $0x608] sm:$0xff] }
 0x334   :  { %v2861_v42 = vld [vmem:[#allocation11 + $0x628] sm:$0xff]  ;;  %v6248_v9 = vcombine.high %v2856_v35, %v2860_v40  ;;  %v6247_v31 = vcombine.low %v2856_v35, %v2860_v40 }
 0x335   :  { %v6250_v44 = vcombine.high %v2857_v58, %v2861_v42  ;;  %v6249_v49 = vcombine.low %v2857_v58, %v2861_v42 }
 0x336   :  { %4286 = vmatpush1.bf16.msra.mxu0 %v6191_v45  ;;  %4368 = vmatpush1.bf16.msra.mxu1 %v6193_v46  ;;  %v2864_v45 = vld [vmem:[#allocation11 + $0x640] sm:$0xff] }
 0x337   :  { %4287 = vmatprep.subr.bf16.mxu0 %v6200_v47  ;;  %4369 = vmatprep.subr.bf16.mxu1 %v6202_v48  ;;  %v2868_v46 = vld [vmem:[#allocation11 + $0x660] sm:$0xff]  ;;  %v2865_v47 = vld [vmem:[#allocation11 + $0x648] sm:$0xff] }
 0x338   :  { %v2869_v48 = vld [vmem:[#allocation11 + $0x668] sm:$0xff]  ;;  %v6256_v51 = vcombine.high %v2864_v45, %v2868_v46  ;;  %v6255_v24 = vcombine.low %v2864_v45, %v2868_v46 }
 0x339   :  { %v6258_v52 = vcombine.high %v2865_v47, %v2869_v48  ;;  %v6257_v61 = vcombine.low %v2865_v47, %v2869_v48 }
 0x33a   :  { %4288 = vmatpush1.bf16.msra.mxu0 %v6199_v53  ;;  %4370 = vmatpush1.bf16.msra.mxu1 %v6201_v23  ;;  %v2872_v53 = vld [vmem:[#allocation11 + $0x680] sm:$0xff] }
 0x33b   :  { %4289 = vmatprep.subr.bf16.mxu0 %v6208_v54  ;;  %4371 = vmatprep.subr.bf16.mxu1 %v6210_v59  ;;  %v2876_v23 = vld [vmem:[#allocation11 + $0x6a0] sm:$0xff]  ;;  %v2873_v54 = vld [vmem:[#allocation11 + $0x688] sm:$0xff] }
 0x33c   :  { %v2877_v59 = vld [vmem:[#allocation11 + $0x6a8] sm:$0xff]  ;;  %v6264_v55 = vcombine.high %v2872_v53, %v2876_v23  ;;  %v6263_v4 = vcombine.low %v2872_v53, %v2876_v23 }
 0x33d   :  { %v6266_v56 = vcombine.high %v2873_v54, %v2877_v59  ;;  %v6265_v5 = vcombine.low %v2873_v54, %v2877_v59 }
 0x33e   :  { %4290 = vmatpush1.bf16.msra.mxu0 %v6207_v60  ;;  %4372 = vmatpush1.bf16.msra.mxu1 %v6209_v62  ;;  %v2880_v60 = vld [vmem:[#allocation11 + $0x6c0] sm:$0xff] }
 0x33f   :  { %4291 = vmatprep.subr.bf16.mxu0 %v6216_v29  ;;  %4373 = vmatprep.subr.bf16.mxu1 %v6218_v3  ;;  %v2884_v62 = vld [vmem:[#allocation11 + $0x6e0] sm:$0xff]  ;;  %v2881_v29 = vld [vmem:[#allocation11 + $0x6c8] sm:$0xff] }
 0x340   :  { %v2885_v3 = vld [vmem:[#allocation11 + $0x6e8] sm:$0xff]  ;;  %v6272_v6 = vcombine.high %v2880_v60, %v2884_v62  ;;  %v6271_v15 = vcombine.low %v2880_v60, %v2884_v62 }
 0x341   :  { %v6274_v7 = vcombine.high %v2881_v29, %v2885_v3  ;;  %v6273_v17 = vcombine.low %v2881_v29, %v2885_v3 }
 0x342   :  { %4292 = vmatpush1.bf16.msra.mxu0 %v6215_v11  ;;  %4374 = vmatpush1.bf16.msra.mxu1 %v6217_v12  ;;  %v2888_v11 = vld [vmem:[#allocation11 + $0x700] sm:$0xff] }
 0x343   :  { %4293 = vmatprep.subr.bf16.mxu0 %v6224_v13  ;;  %4375 = vmatprep.subr.bf16.mxu1 %v6226_v14  ;;  %v2892_v12 = vld [vmem:[#allocation11 + $0x720] sm:$0xff]  ;;  %v2889_v13 = vld [vmem:[#allocation11 + $0x708] sm:$0xff] }
 0x344   :  { %v2893_v14 = vld [vmem:[#allocation11 + $0x728] sm:$0xff]  ;;  %v6280_v19 = vcombine.high %v2888_v11, %v2892_v12  ;;  %v6279_v25 = vcombine.low %v2888_v11, %v2892_v12  ;;  %v2675_v11 = vld [vmem:[#allocation11 + $0x58] sm:$0xff] }
 0x345   :  { %v6282_v2 = vcombine.high %v2889_v13, %v2893_v14  ;;  %v6281_v26 = vcombine.low %v2889_v13, %v2893_v14  ;;  %v2679_v12 = vld [vmem:[#allocation11 + $0x78] sm:$0xff] }
 0x346   :  { %4294 = vmatpush1.bf16.msra.mxu0 %v6223_v50  ;;  %4376 = vmatpush1.bf16.msra.mxu1 %v6225_v20  ;;  %v2896_v50 = vld [vmem:[#allocation11 + $0x740] sm:$0xff] }
 0x347   :  { %4295 = vmatprep.subr.bf16.mxu0 %v6232_v21  ;;  %4377 = vmatprep.subr.bf16.mxu1 %v6234_v27  ;;  %v2900_v20 = vld [vmem:[#allocation11 + $0x760] sm:$0xff]  ;;  %v2897_v21 = vld [vmem:[#allocation11 + $0x748] sm:$0xff] }
 0x348   :  { %v2901_v27 = vld [vmem:[#allocation11 + $0x768] sm:$0xff]  ;;  %v6288_v28 = vcombine.high %v2896_v50, %v2900_v20  ;;  %v6287_v35 = vcombine.low %v2896_v50, %v2900_v20  ;;  %v2686_v50 = vld [vmem:[#allocation11 + $0xb0] sm:$0xff]  ;;  %v2683_v20 = vld [vmem:[#allocation11 + $0x98] sm:$0xff] }
 0x349   :  { %v6290_v1 = vcombine.high %v2897_v21, %v2901_v27  ;;  %v6289_v40 = vcombine.low %v2897_v21, %v2901_v27  ;;  %v2687_v21 = vld [vmem:[#allocation11 + $0xb8] sm:$0xff] }
 0x34a   :  { %4296 = vmatpush1.bf16.msra.mxu0 %v6231_v30  ;;  %4378 = vmatpush1.bf16.msra.mxu1 %v6233_v32  ;;  %v2904_v30 = vld [vmem:[#allocation11 + $0x780] sm:$0xff] }
 0x34b   :  { %4297 = vmatprep.subr.bf16.mxu0 %v6240_v33  ;;  %4379 = vmatprep.subr.bf16.mxu1 %v6242_v34  ;;  %v2908_v32 = vld [vmem:[#allocation11 + $0x7a0] sm:$0xff]  ;;  %v2905_v33 = vld [vmem:[#allocation11 + $0x788] sm:$0xff] }
 0x34c   :  { %v2909_v34 = vld [vmem:[#allocation11 + $0x7a8] sm:$0xff]  ;;  %v6296_v58 = vcombine.high %v2904_v30, %v2908_v32  ;;  %v6295_v45 = vcombine.low %v2904_v30, %v2908_v32  ;;  %v2694_v30 = vld [vmem:[#allocation11 + $0xf0] sm:$0xff]  ;;  %v2691_v32 = vld [vmem:[#allocation11 + $0xd8] sm:$0xff] }
 0x34d   :  { %v6298_v42 = vcombine.high %v2905_v33, %v2909_v34  ;;  %v6297_v46 = vcombine.low %v2905_v33, %v2909_v34  ;;  %v2695_v33 = vld [vmem:[#allocation11 + $0xf8] sm:$0xff] }
 0x34e   :  { %4298 = vmatpush1.bf16.msra.mxu0 %v6239_v18  ;;  %4380 = vmatpush1.bf16.msra.mxu1 %v6241_v43  ;;  %v2912_v18 = vld [vmem:[#allocation11 + $0x7c0] sm:$0xff] }
 0x34f   :  { %4299 = vmatprep.subr.bf16.mxu0 %v6248_v9  ;;  %4381 = vmatprep.subr.bf16.mxu1 %v6250_v44  ;;  %v2916_v43 = vld [vmem:[#allocation11 + $0x7e0] sm:$0xff]  ;;  %v2913_v9 = vld [vmem:[#allocation11 + $0x7c8] sm:$0xff] }
 0x350   :  { %v2917_v44 = vld [vmem:[#allocation11 + $0x7e8] sm:$0xff]  ;;  %v6304_v47 = vcombine.high %v2912_v18, %v2916_v43  ;;  %v6303_v53 = vcombine.low %v2912_v18, %v2916_v43  ;;  %v2702_v18 = vld [vmem:[#allocation11 + $0x130] sm:$0xff]  ;;  %v2699_v43 = vld [vmem:[#allocation11 + $0x118] sm:$0xff] }
 0x351   :  { %v6306_v48 = vcombine.high %v2913_v9, %v2917_v44  ;;  %v6305_v23 = vcombine.low %v2913_v9, %v2917_v44  ;;  %v6085_v44 = vcombine.low %v2691_v32, %v2695_v33 }
 0x352   :  { %4300 = vmatpush1.bf16.msra.mxu0 %v6247_v31  ;;  %4382 = vmatpush1.bf16.msra.mxu1 %v6249_v49  ;;  %v2666_v31 = vld [vmem:[#allocation11 + $0x10] sm:$0xff] }
 0x353   :  { %4301 = vmatprep.subr.bf16.mxu0 %v6256_v51  ;;  %4383 = vmatprep.subr.bf16.mxu1 %v6258_v52  ;;  %v2670_v49 = vld [vmem:[#allocation11 + $0x30] sm:$0xff]  ;;  %v2667_v51 = vld [vmem:[#allocation11 + $0x18] sm:$0xff] }
 0x354   :  { %v2671_v52 = vld [vmem:[#allocation11 + $0x38] sm:$0xff]  ;;  %v6060_v54 = vcombine.high %v2666_v31, %v2670_v49  ;;  %v6059_v14 = vcombine.low %v2666_v31, %v2670_v49 }
 0x355   :  { %v6062_v59 = vcombine.high %v2667_v51, %v2671_v52  ;;  %v2707_v31 = vld [vmem:[#allocation11 + $0x158] sm:$0xff] }
 0x356   :  { %4302 = vmatpush1.bf16.msra.mxu0 %v6255_v24  ;;  %4384 = vmatpush1.bf16.msra.mxu1 %v6257_v61  ;;  %v1039_v24 = vrot.slane %v7727_v16, %v7659_v37  ;;  %v1043_v61 = vrot.slane %v7727_v16, %v7662_v39  ;;  %v2711_v49 = vld [vmem:[#allocation11 + $0x178] sm:$0xff] }
 0x357   :  { %4303 = vmatprep.subr.bf16.mxu0 %v6264_v55  ;;  %4385 = vmatprep.subr.bf16.mxu1 %v6266_v56 }
 0x35a   :  { %4304 = vmatpush1.bf16.msra.mxu0 %v6263_v4  ;;  %4386 = vmatpush1.bf16.msra.mxu1 %v6265_v5 }
 0x35b   :  { %4305 = vmatprep.subr.bf16.mxu0 %v6272_v6  ;;  %4387 = vmatprep.subr.bf16.mxu1 %v6274_v7  ;;  %v2674_v6 = vld [vmem:[#allocation11 + $0x50] sm:$0xff] }
 0x35c   :  { %v2678_v7 = vld [vmem:[#allocation11 + $0x70] sm:$0xff] }
 0x35d   :  { %v6068_v16 = vcombine.high %v2674_v6, %v2678_v7  ;;  %v6067_v27 = vcombine.low %v2674_v6, %v2678_v7 }
 0x35e   :  { %4306 = vmatpush1.bf16.msra.mxu0 %v6271_v15  ;;  %4388 = vmatpush1.bf16.msra.mxu1 %v6273_v17  ;;  %v6061_v15 = vcombine.low %v2667_v51, %v2671_v52 }
 0x35f   :  { %4307 = vmatprep.subr.bf16.mxu0 %v6280_v19  ;;  %4389 = vmatprep.subr.bf16.mxu1 %v6282_v2  ;;  %v2682_v19 = vld [vmem:[#allocation11 + $0x90] sm:$0xff]  ;;  %v6070_v2 = vcombine.high %v2675_v11, %v2679_v12 }
 0x360   :  { %v6075_v34 = vcombine.low %v2682_v19, %v2686_v50 }
 0x362   :  { %4308 = vmatpush1.bf16.msra.mxu0 %v6279_v25  ;;  %4390 = vmatpush1.bf16.msra.mxu1 %v6281_v26  ;;  %v6069_v25 = vcombine.low %v2675_v11, %v2679_v12  ;;  %v6076_v26 = vcombine.high %v2682_v19, %v2686_v50  ;;  %v2731_v19 = vld [vmem:[#allocation11 + $0x218] sm:$0xff] }
 0x363   :  { %4309 = vmatprep.subr.bf16.mxu0 %v6288_v28  ;;  %4391 = vmatprep.subr.bf16.mxu1 %v6290_v1  ;;  %v6078_v28 = vcombine.high %v2683_v20, %v2687_v21  ;;  %v2690_v1 = vld [vmem:[#allocation11 + $0xd0] sm:$0xff] }
 0x364   :  { %v6083_v9 = vcombine.low %v2690_v1, %v2694_v30 }
 0x366   :  { %4310 = vmatpush1.bf16.msra.mxu0 %v6287_v35  ;;  %4392 = vmatpush1.bf16.msra.mxu1 %v6289_v40  ;;  %v6077_v35 = vcombine.low %v2683_v20, %v2687_v21  ;;  %v6084_v40 = vcombine.high %v2690_v1, %v2694_v30 }
 0x367   :  { %4311 = vmatprep.subr.bf16.mxu0 %v6296_v58  ;;  %4393 = vmatprep.subr.bf16.mxu1 %v6298_v42  ;;  %v6086_v58 = vcombine.high %v2691_v32, %v2695_v33  ;;  %v2698_v42 = vld [vmem:[#allocation11 + $0x110] sm:$0xff] }
 0x368   :  { %v6091_v51 = vcombine.low %v2698_v42, %v2702_v18 }
 0x36a   :  { %4312 = vmatpush1.bf16.msra.mxu0 %v6295_v45  ;;  %4394 = vmatpush1.bf16.msra.mxu1 %v6297_v46  ;;  %v6092_v45 = vcombine.high %v2698_v42, %v2702_v18 }
 0x36b   :  { %4313 = vmatprep.subr.bf16.mxu0 %v6304_v47  ;;  %4395 = vmatprep.subr.bf16.mxu1 %v6306_v48  ;;  %v2706_v47 = vld [vmem:[#allocation11 + $0x150] sm:$0xff] }
 0x36c   :  { %v2710_v48 = vld [vmem:[#allocation11 + $0x170] sm:$0xff] }
 0x36e   :  { %4314 = vmatpush1.bf16.msra.mxu0 %v6303_v53  ;;  %4396 = vmatpush1.bf16.msra.mxu1 %v6305_v23  ;;  %v6100_v53 = vcombine.high %v2706_v47, %v2710_v48  ;;  %v6102_v23 = vcombine.high %v2707_v31, %v2711_v49 }
 0x36f   :  { %4406 = vmatprep.subr.bf16.mxu0 %v6060_v54  ;;  %4488 = vmatprep.subr.bf16.mxu1 %v6062_v59  ;;  %v2714_v54 = vld [vmem:[#allocation11 + $0x190] sm:$0xff] }
 0x370   :  { %v2718_v59 = vld [vmem:[#allocation11 + $0x1b0] sm:$0xff] }
 0x371   :  { %v6107_v6 = vcombine.low %v2714_v54, %v2718_v59 }
 0x388   :  { %v2649_v55 = vpop.f32.mrb[16].mxu1 }
 0x389   :  { %v6481_v56 = vadd.f32 %v2649_v55, %v1039_v24  ;;  %v2651_v60 = vpop.f32.mrb[17].mxu1  ;;  %v2715_v24 = vld [vmem:[#allocation11 + $0x198] sm:$0xff]  ;;  %v6099_v55 = vcombine.low %v2706_v47, %v2710_v48 }
 0x38a   :  { %v6482_v62 = vadd.f32 %v2651_v60, %v1043_v61  ;;  %v2653_v29 = vpop.f32.mrb[18].mxu1  ;;  %v2719_v61 = vld [vmem:[#allocation11 + $0x1b8] sm:$0xff]  ;;  %v6108_v60 = vcombine.high %v2714_v54, %v2718_v59 }
 0x38b   :  { %v2658_v3 = vmax.f32 %v6481_v56, 0.0  ;;  %v2654_v4 = vpop.f32.mrb[19].mxu1  ;;  %v6101_v56 = vcombine.low %v2707_v31, %v2711_v49  ;;  %v2722_v29 = vld [vmem:[#allocation11 + $0x1d0] sm:$0xff]  ;;  %v6109_v7 = vcombine.low %v2715_v24, %v2719_v61 }
 0x38c   :  { %v2659_v5 = vmax.f32 %v6482_v62, 0.0  ;;  %v6110_v62 = vcombine.high %v2715_v24, %v2719_v61  ;;  %v2723_v4 = vld [vmem:[#allocation11 + $0x1d8] sm:$0xff] }
 0x38d   :  { %v7752_v17 = vpack.c.bf16 %v2658_v3, %v2658_v3  ;;  %v2726_v3 = vld [vmem:[#allocation11 + $0x1f0] sm:$0xff] }
 0x38e   :  { %v7750_v13 = vpack.c.bf16 %v2659_v5, %v2659_v5  ;;  %v2727_v5 = vld [vmem:[#allocation11 + $0x1f8] sm:$0xff]  ;;  %v6116_v11 = vcombine.high %v2722_v29, %v2726_v3 }
 0x38f   :  { %v6118_v12 = vcombine.high %v2723_v4, %v2727_v5  ;;  %v6117_v50 = vcombine.low %v2723_v4, %v2727_v5 }
 0x390   :  { %4315 = vmatprep.mubr.bf16.mxu0 %v7750_v13  ;;  %4397 = vmatprep.mubr.bf16.mxu1 %v7750_v13 }
 0x391   :  { %4316 = vmatmul.mubr.bf16.vlgmr.msra.gmra.mrb[8].mxu0 %v7752_v17  ;;  %4398 = vmatmul.mubr.bf16.vlgmr.msra.gmra.mrb[20].mxu1 %v7752_v17 }
 0x392   :  { %4407 = vmatpush1.bf16.msra.mxu0 %v6059_v14  ;;  %4489 = vmatpush1.bf16.msra.mxu1 %v6061_v15  ;;  %v2730_v14 = vld [vmem:[#allocation11 + $0x210] sm:$0xff] }
 0x393   :  { %4438 = vmatprep.mubr.bf16.mxu0 %v7735_v38  ;;  %4520 = vmatprep.mubr.bf16.mxu1 %v7735_v38  ;;  %v2703_v38 = vld [vmem:[#allocation11 + $0x138] sm:$0xff]  ;;  %v2734_v15 = vld [vmem:[#allocation11 + $0x230] sm:$0xff] }
 0x394   :  { %4408 = vmatprep.subr.bf16.mxu0 %v6068_v16  ;;  %4490 = vmatprep.subr.bf16.mxu1 %v6070_v2  ;;  %v6094_v46 = vcombine.high %v2699_v43, %v2703_v38  ;;  %v6093_v52 = vcombine.low %v2699_v43, %v2703_v38  ;;  %v2735_v16 = vld [vmem:[#allocation11 + $0x238] sm:$0xff]  ;;  %v6115_v2 = vcombine.low %v2722_v29, %v2726_v3 }
 0x395   :  { %v6124_v20 = vcombine.high %v2730_v14, %v2734_v15  ;;  %v6126_v21 = vcombine.high %v2731_v19, %v2735_v16  ;;  %v6123_v1 = vcombine.low %v2730_v14, %v2734_v15  ;;  %v6125_v30 = vcombine.low %v2731_v19, %v2735_v16 }
 0x396   :  { %4409 = vmatpush1.bf16.msra.mxu0 %v6067_v27  ;;  %4491 = vmatpush1.bf16.msra.mxu1 %v6069_v25  ;;  %v2738_v27 = vld [vmem:[#allocation11 + $0x250] sm:$0xff] }
 0x397   :  { %4410 = vmatprep.subr.bf16.mxu0 %v6076_v26  ;;  %4492 = vmatprep.subr.bf16.mxu1 %v6078_v28  ;;  %v2742_v25 = vld [vmem:[#allocation11 + $0x270] sm:$0xff]  ;;  %v2739_v26 = vld [vmem:[#allocation11 + $0x258] sm:$0xff] }
 0x398   :  { %v2743_v28 = vld [vmem:[#allocation11 + $0x278] sm:$0xff]  ;;  %v6132_v32 = vcombine.high %v2738_v27, %v2742_v25  ;;  %v6131_v42 = vcombine.low %v2738_v27, %v2742_v25 }
 0x399   :  { %v6134_v33 = vcombine.high %v2739_v26, %v2743_v28  ;;  %v6133_v18 = vcombine.low %v2739_v26, %v2743_v28 }
 0x39a   :  { %4411 = vmatpush1.bf16.msra.mxu0 %v6075_v34  ;;  %4493 = vmatpush1.bf16.msra.mxu1 %v6077_v35  ;;  %v2746_v34 = vld [vmem:[#allocation11 + $0x290] sm:$0xff] }
 0x39b   :  { %4412 = vmatprep.subr.bf16.mxu0 %v6084_v40  ;;  %4494 = vmatprep.subr.bf16.mxu1 %v6086_v58  ;;  %v2750_v35 = vld [vmem:[#allocation11 + $0x2b0] sm:$0xff]  ;;  %v2747_v40 = vld [vmem:[#allocation11 + $0x298] sm:$0xff] }
 0x39c   :  { %v2751_v58 = vld [vmem:[#allocation11 + $0x2b8] sm:$0xff]  ;;  %v6140_v43 = vcombine.high %v2746_v34, %v2750_v35  ;;  %v6139_v47 = vcombine.low %v2746_v34, %v2750_v35 }
 0x39d   :  { %v6142_v38 = vcombine.high %v2747_v40, %v2751_v58  ;;  %v6141_v48 = vcombine.low %v2747_v40, %v2751_v58 }
 0x39e   :  { %4413 = vmatpush1.bf16.msra.mxu0 %v6083_v9  ;;  %4495 = vmatpush1.bf16.msra.mxu1 %v6085_v44  ;;  %v2754_v9 = vld [vmem:[#allocation11 + $0x2d0] sm:$0xff] }
 0x39f   :  { %4414 = vmatprep.subr.bf16.mxu0 %v6092_v45  ;;  %4496 = vmatprep.subr.bf16.mxu1 %v6094_v46  ;;  %v2758_v44 = vld [vmem:[#allocation11 + $0x2f0] sm:$0xff]  ;;  %v2755_v45 = vld [vmem:[#allocation11 + $0x2d8] sm:$0xff] }
 0x3a0   :  { %v2759_v46 = vld [vmem:[#allocation11 + $0x2f8] sm:$0xff]  ;;  %v6148_v31 = vcombine.high %v2754_v9, %v2758_v44  ;;  %v6147_v54 = vcombine.low %v2754_v9, %v2758_v44 }
 0x3a1   :  { %v6150_v49 = vcombine.high %v2755_v45, %v2759_v46  ;;  %v6149_v59 = vcombine.low %v2755_v45, %v2759_v46 }
 0x3a2   :  { %4415 = vmatpush1.bf16.msra.mxu0 %v6091_v51  ;;  %4497 = vmatpush1.bf16.msra.mxu1 %v6093_v52  ;;  %v2762_v51 = vld [vmem:[#allocation11 + $0x310] sm:$0xff] }
 0x3a3   :  { %4416 = vmatprep.subr.bf16.mxu0 %v6100_v53  ;;  %4498 = vmatprep.subr.bf16.mxu1 %v6102_v23  ;;  %v2766_v52 = vld [vmem:[#allocation11 + $0x330] sm:$0xff]  ;;  %v2763_v53 = vld [vmem:[#allocation11 + $0x318] sm:$0xff] }
 0x3a4   :  { %v2767_v23 = vld [vmem:[#allocation11 + $0x338] sm:$0xff]  ;;  %v6156_v24 = vcombine.high %v2762_v51, %v2766_v52  ;;  %v6155_v29 = vcombine.low %v2762_v51, %v2766_v52 }
 0x3a5   :  { %v6158_v61 = vcombine.high %v2763_v53, %v2767_v23  ;;  %v6157_v3 = vcombine.low %v2763_v53, %v2767_v23 }
 0x3a6   :  { %4417 = vmatpush1.bf16.msra.mxu0 %v6099_v55  ;;  %4499 = vmatpush1.bf16.msra.mxu1 %v6101_v56  ;;  %v2770_v55 = vld [vmem:[#allocation11 + $0x350] sm:$0xff] }
 0x3a7   :  { %4418 = vmatprep.subr.bf16.mxu0 %v6108_v60  ;;  %4500 = vmatprep.subr.bf16.mxu1 %v6110_v62  ;;  %v2774_v56 = vld [vmem:[#allocation11 + $0x370] sm:$0xff]  ;;  %v2771_v60 = vld [vmem:[#allocation11 + $0x358] sm:$0xff] }
 0x3a8   :  { %v2775_v62 = vld [vmem:[#allocation11 + $0x378] sm:$0xff]  ;;  %v6164_v4 = vcombine.high %v2770_v55, %v2774_v56  ;;  %v6163_v14 = vcombine.low %v2770_v55, %v2774_v56 }
 0x3a9   :  { %v6166_v5 = vcombine.high %v2771_v60, %v2775_v62  ;;  %v6165_v15 = vcombine.low %v2771_v60, %v2775_v62  ;;  %v2826_v62 = vld [vmem:[#allocation11 + $0x510] sm:$0xff] }
 0x3aa   :  { %4419 = vmatpush1.bf16.msra.mxu0 %v6107_v6  ;;  %4501 = vmatpush1.bf16.msra.mxu1 %v6109_v7  ;;  %v2778_v6 = vld [vmem:[#allocation11 + $0x390] sm:$0xff] }
 0x3ab   :  { %4420 = vmatprep.subr.bf16.mxu0 %v6116_v11  ;;  %4502 = vmatprep.subr.bf16.mxu1 %v6118_v12  ;;  %v2782_v7 = vld [vmem:[#allocation11 + $0x3b0] sm:$0xff]  ;;  %v2779_v11 = vld [vmem:[#allocation11 + $0x398] sm:$0xff] }
 0x3ac   :  { %v2783_v12 = vld [vmem:[#allocation11 + $0x3b8] sm:$0xff]  ;;  %v6172_v19 = vcombine.high %v2778_v6, %v2782_v7  ;;  %v6171_v27 = vcombine.low %v2778_v6, %v2782_v7 }
 0x3ad   :  { %v6174_v16 = vcombine.high %v2779_v11, %v2783_v12  ;;  %v6173_v25 = vcombine.low %v2779_v11, %v2783_v12  ;;  %v2834_v11 = vld [vmem:[#allocation11 + $0x550] sm:$0xff] }
 0x3ae   :  { %4421 = vmatpush1.bf16.msra.mxu0 %v6115_v2  ;;  %4503 = vmatpush1.bf16.msra.mxu1 %v6117_v50  ;;  %v2786_v2 = vld [vmem:[#allocation11 + $0x3d0] sm:$0xff] }
 0x3af   :  { %4422 = vmatprep.subr.bf16.mxu0 %v6124_v20  ;;  %4504 = vmatprep.subr.bf16.mxu1 %v6126_v21  ;;  %v2790_v50 = vld [vmem:[#allocation11 + $0x3f0] sm:$0xff]  ;;  %v2787_v20 = vld [vmem:[#allocation11 + $0x3d8] sm:$0xff] }
 0x3b0   :  { %v2791_v21 = vld [vmem:[#allocation11 + $0x3f8] sm:$0xff]  ;;  %v6180_v26 = vcombine.high %v2786_v2, %v2790_v50  ;;  %v6179_v34 = vcombine.low %v2786_v2, %v2790_v50  ;;  %v2838_v12 = vld [vmem:[#allocation11 + $0x570] sm:$0xff] }
 0x3b1   :  { %v6182_v28 = vcombine.high %v2787_v20, %v2791_v21  ;;  %v6181_v35 = vcombine.low %v2787_v20, %v2791_v21  ;;  %v6228_v2 = vcombine.high %v2834_v11, %v2838_v12  ;;  %v2842_v20 = vld [vmem:[#allocation11 + $0x590] sm:$0xff] }
 0x3b2   :  { %4423 = vmatpush1.bf16.msra.mxu0 %v6123_v1  ;;  %4505 = vmatpush1.bf16.msra.mxu1 %v6125_v30  ;;  %v2794_v1 = vld [vmem:[#allocation11 + $0x410] sm:$0xff] }
 0x3b3   :  { %4424 = vmatprep.subr.bf16.mxu0 %v6132_v32  ;;  %4506 = vmatprep.subr.bf16.mxu1 %v6134_v33  ;;  %v2798_v30 = vld [vmem:[#allocation11 + $0x430] sm:$0xff]  ;;  %v2795_v32 = vld [vmem:[#allocation11 + $0x418] sm:$0xff] }
 0x3b4   :  { %v2799_v33 = vld [vmem:[#allocation11 + $0x438] sm:$0xff]  ;;  %v6188_v40 = vcombine.high %v2794_v1, %v2798_v30  ;;  %v6187_v9 = vcombine.low %v2794_v1, %v2798_v30  ;;  %v2846_v21 = vld [vmem:[#allocation11 + $0x5b0] sm:$0xff] }
 0x3b5   :  { %v6190_v58 = vcombine.high %v2795_v32, %v2799_v33  ;;  %v6189_v44 = vcombine.low %v2795_v32, %v2799_v33  ;;  %v6236_v1 = vcombine.high %v2842_v20, %v2846_v21  ;;  %v2850_v32 = vld [vmem:[#allocation11 + $0x5d0] sm:$0xff] }
 0x3b6   :  { %4425 = vmatpush1.bf16.msra.mxu0 %v6131_v42  ;;  %4507 = vmatpush1.bf16.msra.mxu1 %v6133_v18  ;;  %v2802_v42 = vld [vmem:[#allocation11 + $0x450] sm:$0xff] }
 0x3b7   :  { %4426 = vmatprep.subr.bf16.mxu0 %v6140_v43  ;;  %4508 = vmatprep.subr.bf16.mxu1 %v6142_v38  ;;  %v2806_v18 = vld [vmem:[#allocation11 + $0x470] sm:$0xff]  ;;  %v2803_v43 = vld [vmem:[#allocation11 + $0x458] sm:$0xff] }
 0x3b8   :  { %v2807_v38 = vld [vmem:[#allocation11 + $0x478] sm:$0xff]  ;;  %v6196_v45 = vcombine.high %v2802_v42, %v2806_v18  ;;  %v6195_v51 = vcombine.low %v2802_v42, %v2806_v18  ;;  %v2854_v33 = vld [vmem:[#allocation11 + $0x5f0] sm:$0xff] }
 0x3b9   :  { %v6198_v46 = vcombine.high %v2803_v43, %v2807_v38  ;;  %v6197_v52 = vcombine.low %v2803_v43, %v2807_v38  ;;  %v6244_v42 = vcombine.high %v2850_v32, %v2854_v33  ;;  %v2858_v43 = vld [vmem:[#allocation11 + $0x610] sm:$0xff] }
 0x3ba   :  { %4427 = vmatpush1.bf16.msra.mxu0 %v6139_v47  ;;  %4509 = vmatpush1.bf16.msra.mxu1 %v6141_v48  ;;  %v2810_v47 = vld [vmem:[#allocation11 + $0x490] sm:$0xff] }
 0x3bb   :  { %4428 = vmatprep.subr.bf16.mxu0 %v6148_v31  ;;  %4510 = vmatprep.subr.bf16.mxu1 %v6150_v49  ;;  %v2814_v48 = vld [vmem:[#allocation11 + $0x4b0] sm:$0xff]  ;;  %v2811_v31 = vld [vmem:[#allocation11 + $0x498] sm:$0xff] }
 0x3bc   :  { %v2815_v49 = vld [vmem:[#allocation11 + $0x4b8] sm:$0xff]  ;;  %v6204_v53 = vcombine.high %v2810_v47, %v2814_v48  ;;  %v2862_v38 = vld [vmem:[#allocation11 + $0x630] sm:$0xff] }
 0x3bd   :  { %v6206_v23 = vcombine.high %v2811_v31, %v2815_v49  ;;  %v6205_v55 = vcombine.low %v2811_v31, %v2815_v49  ;;  %v2866_v31 = vld [vmem:[#allocation11 + $0x650] sm:$0xff] }
 0x3be   :  { %4429 = vmatpush1.bf16.msra.mxu0 %v6147_v54  ;;  %4511 = vmatpush1.bf16.msra.mxu1 %v6149_v59  ;;  %v2818_v54 = vld [vmem:[#allocation11 + $0x4d0] sm:$0xff] }
 0x3bf   :  { %4430 = vmatprep.subr.bf16.mxu0 %v6156_v24  ;;  %4512 = vmatprep.subr.bf16.mxu1 %v6158_v61  ;;  %v2822_v59 = vld [vmem:[#allocation11 + $0x4f0] sm:$0xff]  ;;  %v2819_v24 = vld [vmem:[#allocation11 + $0x4d8] sm:$0xff] }
 0x3c0   :  { %v2823_v61 = vld [vmem:[#allocation11 + $0x4f8] sm:$0xff]  ;;  %v6212_v56 = vcombine.high %v2818_v54, %v2822_v59  ;;  %v2870_v49 = vld [vmem:[#allocation11 + $0x670] sm:$0xff] }
 0x3c1   :  { %v6214_v60 = vcombine.high %v2819_v24, %v2823_v61 }
 0x3c2   :  { %4431 = vmatpush1.bf16.msra.mxu0 %v6155_v29  ;;  %4513 = vmatpush1.bf16.msra.mxu1 %v6157_v3  ;;  %v2830_v29 = vld [vmem:[#allocation11 + $0x530] sm:$0xff]  ;;  %v2831_v3 = vld [vmem:[#allocation11 + $0x538] sm:$0xff] }
 0x3c3   :  { %4432 = vmatprep.subr.bf16.mxu0 %v6164_v4  ;;  %4514 = vmatprep.subr.bf16.mxu1 %v6166_v5  ;;  %v6211_v4 = vcombine.low %v2818_v54, %v2822_v59  ;;  %v6213_v5 = vcombine.low %v2819_v24, %v2823_v61  ;;  %v6220_v6 = vcombine.high %v2826_v62, %v2830_v29  ;;  %v2874_v24 = vld [vmem:[#allocation11 + $0x690] sm:$0xff] }
 0x3c4   :  { %v6260_v54 = vcombine.high %v2866_v31, %v2870_v49  ;;  %v2878_v61 = vld [vmem:[#allocation11 + $0x6b0] sm:$0xff] }
 0x3c6   :  { %4433 = vmatpush1.bf16.msra.mxu0 %v6163_v14  ;;  %4515 = vmatpush1.bf16.msra.mxu1 %v6165_v15  ;;  %v2835_v14 = vld [vmem:[#allocation11 + $0x558] sm:$0xff] }
 0x3c7   :  { %4434 = vmatprep.subr.bf16.mxu0 %v6172_v19  ;;  %4516 = vmatprep.subr.bf16.mxu1 %v6174_v16  ;;  %v2839_v15 = vld [vmem:[#allocation11 + $0x578] sm:$0xff]  ;;  %v6219_v19 = vcombine.low %v2826_v62, %v2830_v29  ;;  %v6268_v62 = vcombine.high %v2874_v24, %v2878_v61 }
 0x3c8   :  { %v6230_v50 = vcombine.high %v2835_v14, %v2839_v15 }
 0x3ca   :  { %4435 = vmatpush1.bf16.msra.mxu0 %v6171_v27  ;;  %4517 = vmatpush1.bf16.msra.mxu1 %v6173_v25  ;;  %v2843_v27 = vld [vmem:[#allocation11 + $0x598] sm:$0xff] }
 0x3cb   :  { %4436 = vmatprep.subr.bf16.mxu0 %v6180_v26  ;;  %4518 = vmatprep.subr.bf16.mxu1 %v6182_v28  ;;  %v2847_v25 = vld [vmem:[#allocation11 + $0x5b8] sm:$0xff]  ;;  %v6227_v26 = vcombine.low %v2834_v11, %v2838_v12  ;;  %v6229_v28 = vcombine.low %v2835_v14, %v2839_v15  ;;  %v2890_v14 = vld [vmem:[#allocation11 + $0x710] sm:$0xff] }
 0x3cc   :  { %v6238_v30 = vcombine.high %v2843_v27, %v2847_v25  ;;  %v2894_v15 = vld [vmem:[#allocation11 + $0x730] sm:$0xff] }
 0x3ce   :  { %4437 = vmatpush1.bf16.msra.mxu0 %v6179_v34  ;;  %4519 = vmatpush1.bf16.msra.mxu1 %v6181_v35  ;;  %v2851_v34 = vld [vmem:[#allocation11 + $0x5d8] sm:$0xff] }
 0x3cf   :  { %4447 = vmatprep.subr.bf16.mxu0 %v6188_v40  ;;  %4529 = vmatprep.subr.bf16.mxu1 %v6190_v58  ;;  %v2855_v35 = vld [vmem:[#allocation11 + $0x5f8] sm:$0xff]  ;;  %v6235_v40 = vcombine.low %v2842_v20, %v2846_v21  ;;  %v6237_v58 = vcombine.low %v2843_v27, %v2847_v25  ;;  %v6284_v20 = vcombine.high %v2890_v14, %v2894_v15  ;;  %v2898_v27 = vld [vmem:[#allocation11 + $0x750] sm:$0xff] }
 0x3d0   :  { %v6246_v18 = vcombine.high %v2851_v34, %v2855_v35  ;;  %v2902_v25 = vld [vmem:[#allocation11 + $0x770] sm:$0xff] }
 0x3d1   :  { %4439 = vmatmul.mubr.bf16.vlgmr.msra.gmra.mrb[12].mxu0 %v7737_v41  ;;  %4521 = vmatmul.mubr.bf16.vlgmr.msra.gmra.mrb[24].mxu1 %v7737_v41  ;;  %v6203_v41 = vcombine.low %v2810_v47, %v2814_v48  ;;  %v6252_v47 = vcombine.high %v2858_v43, %v2862_v38 }
 0x3d2   :  { %4448 = vmatpush1.bf16.msra.mxu0 %v6187_v9  ;;  %4479 = vmatprep.mubr.bf16.mxu0 %v7750_v13  ;;  %v2859_v9 = vld [vmem:[#allocation11 + $0x618] sm:$0xff] }
 0x3d3   :  { %4530 = vmatpush1.bf16.msra.mxu1 %v6189_v44  ;;  %4561 = vmatprep.mubr.bf16.mxu1 %v7750_v13  ;;  %v2827_v13 = vld [vmem:[#allocation11 + $0x518] sm:$0xff] }
 0x3d4   :  { %4449 = vmatprep.subr.bf16.mxu0 %v6196_v45  ;;  %4531 = vmatprep.subr.bf16.mxu1 %v6198_v46  ;;  %v6222_v7 = vcombine.high %v2827_v13, %v2831_v3  ;;  %v6221_v16 = vcombine.low %v2827_v13, %v2831_v3  ;;  %v2863_v44 = vld [vmem:[#allocation11 + $0x638] sm:$0xff]  ;;  %v6243_v45 = vcombine.low %v2850_v32, %v2854_v33  ;;  %v2882_v13 = vld [vmem:[#allocation11 + $0x6d0] sm:$0xff] }
 0x3d5   :  { %v6245_v46 = vcombine.low %v2851_v34, %v2855_v35  ;;  %v6254_v48 = vcombine.high %v2859_v9, %v2863_v44  ;;  %v2886_v3 = vld [vmem:[#allocation11 + $0x6f0] sm:$0xff]  ;;  %v6292_v32 = vcombine.high %v2898_v27, %v2902_v25 }
 0x3d6   :  { %4450 = vmatpush1.bf16.msra.mxu0 %v6195_v51  ;;  %v2867_v51 = vld [vmem:[#allocation11 + $0x658] sm:$0xff]  ;;  %v6276_v11 = vcombine.high %v2882_v13, %v2886_v3  ;;  %v2906_v34 = vld [vmem:[#allocation11 + $0x790] sm:$0xff] }
 0x3d7   :  { %4532 = vmatpush1.bf16.msra.mxu1 %v6197_v52  ;;  %4451 = vmatprep.subr.bf16.mxu0 %v6204_v53  ;;  %v2871_v52 = vld [vmem:[#allocation11 + $0x678] sm:$0xff]  ;;  %v6251_v53 = vcombine.low %v2858_v43, %v2862_v38  ;;  %v2910_v35 = vld [vmem:[#allocation11 + $0x7b0] sm:$0xff] }
 0x3d8   :  { %4533 = vmatprep.subr.bf16.mxu1 %v6206_v23  ;;  %v6253_v23 = vcombine.low %v2859_v9, %v2863_v44  ;;  %v6262_v59 = vcombine.high %v2867_v51, %v2871_v52  ;;  %v6300_v43 = vcombine.high %v2906_v34, %v2910_v35  ;;  %v2914_v9 = vld [vmem:[#allocation11 + $0x7d0] sm:$0xff] }
 0x3d9   :  { %v2918_v44 = vld [vmem:[#allocation11 + $0x7f0] sm:$0xff] }
 0x3da   :  { %4452 = vmatpush1.bf16.msra.mxu0 %v6203_v41  ;;  %v2875_v41 = vld [vmem:[#allocation11 + $0x698] sm:$0xff] }
 0x3db   :  { %4534 = vmatpush1.bf16.msra.mxu1 %v6205_v55  ;;  %4453 = vmatprep.subr.bf16.mxu0 %v6212_v56  ;;  %v2879_v55 = vld [vmem:[#allocation11 + $0x6b8] sm:$0xff]  ;;  %v6259_v56 = vcombine.low %v2866_v31, %v2870_v49  ;;  %v6308_v31 = vcombine.high %v2914_v9, %v2918_v44 }
 0x3dc   :  { %4535 = vmatprep.subr.bf16.mxu1 %v6214_v60  ;;  %v6261_v60 = vcombine.low %v2867_v51, %v2871_v52  ;;  %v6270_v29 = vcombine.high %v2875_v41, %v2879_v55  ;;  %v6307_v51 = vcombine.low %v2914_v9, %v2918_v44 }
 0x3de   :  { %4454 = vmatpush1.bf16.msra.mxu0 %v6211_v4  ;;  %v2883_v4 = vld [vmem:[#allocation11 + $0x6d8] sm:$0xff] }
 0x3df   :  { %4536 = vmatpush1.bf16.msra.mxu1 %v6213_v5  ;;  %4455 = vmatprep.subr.bf16.mxu0 %v6220_v6  ;;  %v2887_v5 = vld [vmem:[#allocation11 + $0x6f8] sm:$0xff]  ;;  %v6267_v6 = vcombine.low %v2874_v24, %v2878_v61  ;;  %v6953_v24 = vld [vmem:[#allocation14 + $0x24] ss:$8 sps:$4 sm:$0xff]   ;;  %v6951_v61 = vld [vmem:[#allocation14 + $0x20] ss:$8 sps:$4 sm:$0xff]  }
 0x3e0   :  { %4537 = vmatprep.subr.bf16.mxu1 %v6222_v7  ;;  %v6269_v7 = vcombine.low %v2875_v41, %v2879_v55  ;;  %v6278_v12 = vcombine.high %v2883_v4, %v2887_v5  ;;  %v6956_v41 = vld [vmem:[#allocation14 + $0x34] ss:$8 sps:$4 sm:$0xff]   ;;  %v6954_v55 = vld [vmem:[#allocation14 + $0x30] ss:$8 sps:$4 sm:$0xff]  }
 0x3e2   :  { %4456 = vmatpush1.bf16.msra.mxu0 %v6219_v19  ;;  %v2891_v19 = vld [vmem:[#allocation11 + $0x718] sm:$0xff] }
 0x3e3   :  { %4538 = vmatpush1.bf16.msra.mxu1 %v6221_v16  ;;  %4457 = vmatprep.subr.bf16.mxu0 %v6228_v2  ;;  %v2895_v16 = vld [vmem:[#allocation11 + $0x738] sm:$0xff]  ;;  %v6275_v2 = vcombine.low %v2882_v13, %v2886_v3  ;;  %v6963_v13 = vld [vmem:[#allocation14 + $0x60] ss:$8 sps:$4 sm:$0xff]  }
 0x3e4   :  { %4539 = vmatprep.subr.bf16.mxu1 %v6230_v50  ;;  %v6277_v50 = vcombine.low %v2883_v4, %v2887_v5  ;;  %v6286_v21 = vcombine.high %v2891_v19, %v2895_v16  ;;  %v6968_v3 = vld [vmem:[#allocation14 + $0x74] ss:$8 sps:$4 sm:$0xff]   ;;  %v6966_v4 = vld [vmem:[#allocation14 + $0x70] ss:$8 sps:$4 sm:$0xff]   ;;  %v6971_v5 = vld [vmem:[#allocation14 + $0x84] ss:$8 sps:$4 sm:$0xff]  }
 0x3e6   :  { %4458 = vmatpush1.bf16.msra.mxu0 %v6227_v26  ;;  %v2899_v26 = vld [vmem:[#allocation11 + $0x758] sm:$0xff] }
 0x3e7   :  { %4540 = vmatpush1.bf16.msra.mxu1 %v6229_v28  ;;  %4459 = vmatprep.subr.bf16.mxu0 %v6236_v1  ;;  %v2903_v28 = vld [vmem:[#allocation11 + $0x778] sm:$0xff]  ;;  %v6283_v1 = vcombine.low %v2890_v14, %v2894_v15  ;;  %v6975_v14 = vld [vmem:[#allocation14 + $0xa0] ss:$8 sps:$4 sm:$0xff]  }
 0x3e8   :  { %4541 = vmatprep.subr.bf16.mxu1 %v6238_v30  ;;  %v6285_v30 = vcombine.low %v2891_v19, %v2895_v16  ;;  %v6294_v33 = vcombine.high %v2899_v26, %v2903_v28  ;;  %v6980_v15 = vld [vmem:[#allocation14 + $0xb4] ss:$8 sps:$4 sm:$0xff]   ;;  %v6978_v19 = vld [vmem:[#allocation14 + $0xb0] ss:$8 sps:$4 sm:$0xff]   ;;  %v6983_v16 = vld [vmem:[#allocation14 + $0xc4] ss:$8 sps:$4 sm:$0xff]  }
 0x3ea   :  { %4460 = vmatpush1.bf16.msra.mxu0 %v6235_v40  ;;  %v2907_v40 = vld [vmem:[#allocation11 + $0x798] sm:$0xff] }
 0x3eb   :  { %4542 = vmatpush1.bf16.msra.mxu1 %v6237_v58  ;;  %4461 = vmatprep.subr.bf16.mxu0 %v6244_v42  ;;  %v2911_v58 = vld [vmem:[#allocation11 + $0x7b8] sm:$0xff]  ;;  %v6291_v42 = vcombine.low %v2898_v27, %v2902_v25  ;;  %v6987_v27 = vld [vmem:[#allocation14 + $0xe0] ss:$8 sps:$4 sm:$0xff]  }
 0x3ec   :  { %4543 = vmatprep.subr.bf16.mxu1 %v6246_v18  ;;  %v6293_v18 = vcombine.low %v2899_v26, %v2903_v28  ;;  %v6302_v38 = vcombine.high %v2907_v40, %v2911_v58  ;;  %v6992_v25 = vld [vmem:[#allocation14 + $0xf4] ss:$8 sps:$4 sm:$0xff]   ;;  %v6990_v26 = vld [vmem:[#allocation14 + $0xf0] ss:$8 sps:$4 sm:$0xff]   ;;  %v6995_v28 = vld [vmem:[#allocation14 + $0x104] ss:$8 sps:$4 sm:$0xff]  }
 0x3ee   :  { %4462 = vmatpush1.bf16.msra.mxu0 %v6243_v45  ;;  %v2915_v45 = vld [vmem:[#allocation11 + $0x7d8] sm:$0xff] }
 0x3ef   :  { %4544 = vmatpush1.bf16.msra.mxu1 %v6245_v46  ;;  %4463 = vmatprep.subr.bf16.mxu0 %v6252_v47  ;;  %v2919_v46 = vld [vmem:[#allocation11 + $0x7f8] sm:$0xff]  ;;  %v6299_v47 = vcombine.low %v2906_v34, %v2910_v35 }
 0x3f0   :  { %4545 = vmatprep.subr.bf16.mxu1 %v6254_v48  ;;  %v6301_v48 = vcombine.low %v2907_v40, %v2911_v58  ;;  %v6310_v49 = vcombine.high %v2915_v45, %v2919_v46  ;;  %v6309_v52 = vcombine.low %v2915_v45, %v2919_v46 }
 0x3f2   :  { %4464 = vmatpush1.bf16.msra.mxu0 %v6251_v53  ;;  %v6947_v53 = vld [vmem:[#allocation14 + $0x4] ss:$8 sps:$4 sm:$0xff]  }
 0x3f3   :  { %4546 = vmatpush1.bf16.msra.mxu1 %v6253_v23  ;;  %4465 = vmatprep.subr.bf16.mxu0 %v6260_v54  ;;  %v6945_v23 = vld [vmem:[#allocation14] ss:$8 sps:$4 sm:$0xff]   ;;  %v6950_v54 = vld [vmem:[#allocation14 + $0x14] ss:$8 sps:$4 sm:$0xff]  }
 0x3f4   :  { %4547 = vmatprep.subr.bf16.mxu1 %v6262_v59  ;;  %v6948_v59 = vld [vmem:[#allocation14 + $0x10] ss:$8 sps:$4 sm:$0xff]  }
 0x3f6   :  { %4466 = vmatpush1.bf16.msra.mxu0 %v6259_v56  ;;  %v6959_v56 = vld [vmem:[#allocation14 + $0x44] ss:$8 sps:$4 sm:$0xff]  }
 0x3f7   :  { %4548 = vmatpush1.bf16.msra.mxu1 %v6261_v60  ;;  %4467 = vmatprep.subr.bf16.mxu0 %v6268_v62  ;;  %v6957_v60 = vld [vmem:[#allocation14 + $0x40] ss:$8 sps:$4 sm:$0xff]   ;;  %v6962_v62 = vld [vmem:[#allocation14 + $0x54] ss:$8 sps:$4 sm:$0xff]  }
 0x3f8   :  { %4549 = vmatprep.subr.bf16.mxu1 %v6270_v29  ;;  %v6960_v29 = vld [vmem:[#allocation14 + $0x50] ss:$8 sps:$4 sm:$0xff]  }
 0x3fa   :  { %4468 = vmatpush1.bf16.msra.mxu0 %v6267_v6  ;;  %v6969_v6 = vld [vmem:[#allocation14 + $0x80] ss:$8 sps:$4 sm:$0xff]  }
 0x3fb   :  { %4550 = vmatpush1.bf16.msra.mxu1 %v6269_v7  ;;  %4469 = vmatprep.subr.bf16.mxu0 %v6276_v11  ;;  %v6974_v7 = vld [vmem:[#allocation14 + $0x94] ss:$8 sps:$4 sm:$0xff]   ;;  %v6972_v11 = vld [vmem:[#allocation14 + $0x90] ss:$8 sps:$4 sm:$0xff]  }
 0x3fc   :  { %4551 = vmatprep.subr.bf16.mxu1 %v6278_v12  ;;  %v6977_v12 = vld [vmem:[#allocation14 + $0xa4] ss:$8 sps:$4 sm:$0xff]  }
 0x3fe   :  { %4470 = vmatpush1.bf16.msra.mxu0 %v6275_v2  ;;  %v6981_v2 = vld [vmem:[#allocation14 + $0xc0] ss:$8 sps:$4 sm:$0xff]  }
 0x3ff   :  { %4552 = vmatpush1.bf16.msra.mxu1 %v6277_v50  ;;  %4471 = vmatprep.subr.bf16.mxu0 %v6284_v20  ;;  %v6986_v50 = vld [vmem:[#allocation14 + $0xd4] ss:$8 sps:$4 sm:$0xff]   ;;  %v6984_v20 = vld [vmem:[#allocation14 + $0xd0] ss:$8 sps:$4 sm:$0xff]  }
 0x400   :  { %4553 = vmatprep.subr.bf16.mxu1 %v6286_v21  ;;  %v6989_v21 = vld [vmem:[#allocation14 + $0xe4] ss:$8 sps:$4 sm:$0xff]  }
 0x402   :  { %4472 = vmatpush1.bf16.msra.mxu0 %v6283_v1  ;;  %v7766_v1 = vld [vmem:[#allocation13] sm:$0xff] }
 0x403   :  { %4554 = vmatpush1.bf16.msra.mxu1 %v6285_v30  ;;  %4473 = vmatprep.subr.bf16.mxu0 %v6292_v32  ;;  %v2925_v30 = vrot.slane %v7766_v1, %v7641_v0  ;;  %v2929_v32 = vrot.slane %v7766_v1, %v7646_v10 }
 0x404   :  { %4555 = vmatprep.subr.bf16.mxu1 %v6294_v33  ;;  %v2937_v33 = vrot.slane %v7766_v1, %v7662_v39 }
 0x406   :  { %4474 = vmatpush1.bf16.msra.mxu0 %v6291_v42 }
 0x407   :  { %4556 = vmatpush1.bf16.msra.mxu1 %v6293_v18  ;;  %4475 = vmatprep.subr.bf16.mxu0 %v6300_v43 }
 0x408   :  { %4557 = vmatprep.subr.bf16.mxu1 %v6302_v38 }
 0x40a   :  { %4476 = vmatpush1.bf16.msra.mxu0 %v6299_v47 }
 0x40b   :  { %4558 = vmatpush1.bf16.msra.mxu1 %v6301_v48  ;;  %4477 = vmatprep.subr.bf16.mxu0 %v6308_v31 }
 0x40c   :  { %4559 = vmatprep.subr.bf16.mxu1 %v6310_v49  ;;  %v6993_v49 = vld [vmem:[#allocation14 + $0x100] ss:$8 sps:$4 sm:$0xff]  }
 0x40e   :  { %4478 = vmatpush1.bf16.msra.mxu0 %v6307_v51 }
 0x40f   :  { %4560 = vmatpush1.bf16.msra.mxu1 %v6309_v52  ;;  %5366 = vmatprep.subr.bf16.mxu0 %v6947_v53  ;;  %v6998_v52 = vld [vmem:[#allocation14 + $0x114] ss:$8 sps:$4 sm:$0xff]   ;;  %v6996_v53 = vld [vmem:[#allocation14 + $0x110] ss:$8 sps:$4 sm:$0xff]  }
 0x411   :  { %4480 = vmatmul.mubr.bf16.vlgmr.msra.gmra.mrb[12].mxu0 %v7752_v17 }
 0x412   :  { %4562 = vmatmul.mubr.bf16.vlgmr.msra.gmra.mrb[24].mxu1 %v7752_v17  ;;  %5367 = vmatpush1.bf16.msra.mxu0 %v6945_v23  ;;  %v6965_v17 = vld [vmem:[#allocation14 + $0x64] ss:$8 sps:$4 sm:$0xff]  }
 0x413   :  { %5368 = vmatprep.subr.bf16.mxu0 %v6950_v54  ;;  %v7001_v23 = vld [vmem:[#allocation14 + $0x124] ss:$8 sps:$4 sm:$0xff]   ;;  %v6999_v54 = vld [vmem:[#allocation14 + $0x120] ss:$8 sps:$4 sm:$0xff]  }
 0x416   :  { %5369 = vmatpush1.bf16.msra.mxu0 %v6948_v59  ;;  %v7004_v59 = vld [vmem:[#allocation14 + $0x134] ss:$8 sps:$4 sm:$0xff]  }
 0x417   :  { %5370 = vmatprep.subr.bf16.mxu0 %v6953_v24  ;;  %v7002_v24 = vld [vmem:[#allocation14 + $0x130] ss:$8 sps:$4 sm:$0xff]  }
 0x41a   :  { %5371 = vmatpush1.bf16.msra.mxu0 %v6951_v61  ;;  %v7007_v61 = vld [vmem:[#allocation14 + $0x144] ss:$8 sps:$4 sm:$0xff]  }
 0x41b   :  { %5372 = vmatprep.subr.bf16.mxu0 %v6956_v41  ;;  %v7005_v41 = vld [vmem:[#allocation14 + $0x140] ss:$8 sps:$4 sm:$0xff]  }
 0x41e   :  { %5373 = vmatpush1.bf16.msra.mxu0 %v6954_v55  ;;  %v7010_v55 = vld [vmem:[#allocation14 + $0x154] ss:$8 sps:$4 sm:$0xff]  }
 0x41f   :  { %5374 = vmatprep.subr.bf16.mxu0 %v6959_v56  ;;  %v7008_v56 = vld [vmem:[#allocation14 + $0x150] ss:$8 sps:$4 sm:$0xff]  }
 0x422   :  { %5375 = vmatpush1.bf16.msra.mxu0 %v6957_v60  ;;  %v7013_v60 = vld [vmem:[#allocation14 + $0x164] ss:$8 sps:$4 sm:$0xff]  }
 0x423   :  { %5376 = vmatprep.subr.bf16.mxu0 %v6962_v62  ;;  %v7011_v62 = vld [vmem:[#allocation14 + $0x160] ss:$8 sps:$4 sm:$0xff]  }
 0x426   :  { %5377 = vmatpush1.bf16.msra.mxu0 %v6960_v29  ;;  %v7016_v29 = vld [vmem:[#allocation14 + $0x174] ss:$8 sps:$4 sm:$0xff]  }
 0x427   :  { %5378 = vmatprep.subr.bf16.mxu0 %v6965_v17  ;;  %v7014_v17 = vld [vmem:[#allocation14 + $0x170] ss:$8 sps:$4 sm:$0xff]  }
 0x42a   :  { %5379 = vmatpush1.bf16.msra.mxu0 %v6963_v13  ;;  %v7019_v13 = vld [vmem:[#allocation14 + $0x184] ss:$8 sps:$4 sm:$0xff]  }
 0x42b   :  { %5380 = vmatprep.subr.bf16.mxu0 %v6968_v3  ;;  %v7017_v3 = vld [vmem:[#allocation14 + $0x180] ss:$8 sps:$4 sm:$0xff]  }
 0x42e   :  { %5381 = vmatpush1.bf16.msra.mxu0 %v6966_v4  ;;  %v7022_v4 = vld [vmem:[#allocation14 + $0x194] ss:$8 sps:$4 sm:$0xff]  }
 0x42f   :  { %5382 = vmatprep.subr.bf16.mxu0 %v6971_v5  ;;  %v7020_v5 = vld [vmem:[#allocation14 + $0x190] ss:$8 sps:$4 sm:$0xff]  }
 0x432   :  { %5383 = vmatpush1.bf16.msra.mxu0 %v6969_v6  ;;  %v7025_v6 = vld [vmem:[#allocation14 + $0x1a4] ss:$8 sps:$4 sm:$0xff]  }
 0x433   :  { %5384 = vmatprep.subr.bf16.mxu0 %v6974_v7  ;;  %v7023_v7 = vld [vmem:[#allocation14 + $0x1a0] ss:$8 sps:$4 sm:$0xff]  }
 0x436   :  { %5385 = vmatpush1.bf16.msra.mxu0 %v6972_v11  ;;  %v7028_v11 = vld [vmem:[#allocation14 + $0x1b4] ss:$8 sps:$4 sm:$0xff]  }
 0x437   :  { %5386 = vmatprep.subr.bf16.mxu0 %v6977_v12  ;;  %v7026_v12 = vld [vmem:[#allocation14 + $0x1b0] ss:$8 sps:$4 sm:$0xff]  }
 0x43a   :  { %5387 = vmatpush1.bf16.msra.mxu0 %v6975_v14  ;;  %v7031_v14 = vld [vmem:[#allocation14 + $0x1c4] ss:$8 sps:$4 sm:$0xff]  }
 0x43b   :  { %5388 = vmatprep.subr.bf16.mxu0 %v6980_v15  ;;  %v7029_v15 = vld [vmem:[#allocation14 + $0x1c0] ss:$8 sps:$4 sm:$0xff]  }
 0x43e   :  { %5389 = vmatpush1.bf16.msra.mxu0 %v6978_v19  ;;  %v7034_v19 = vld [vmem:[#allocation14 + $0x1d4] ss:$8 sps:$4 sm:$0xff]  }
 0x43f   :  { %5390 = vmatprep.subr.bf16.mxu0 %v6983_v16  ;;  %v7032_v16 = vld [vmem:[#allocation14 + $0x1d0] ss:$8 sps:$4 sm:$0xff]  }
 0x442   :  { %5391 = vmatpush1.bf16.msra.mxu0 %v6981_v2  ;;  %v2933_v2 = vrot.slane %v7766_v1, %v7659_v37  ;;  %v7137_v37 = vld [vmem:[#allocation17 + $0x40] sm:$0xff]  }
 0x443   :  { %5392 = vmatprep.subr.bf16.mxu0 %v6986_v50  ;;  %v7037_v50 = vld [vmem:[#allocation14 + $0x1e4] ss:$8 sps:$4 sm:$0xff]   ;;  %6455 = vmatprep.subr.bf16.mxu1 %v7137_v37 }
 0x446   :  { %5393 = vmatpush1.bf16.msra.mxu0 %v6984_v20  ;;  %v7035_v20 = vld [vmem:[#allocation14 + $0x1e0] ss:$8 sps:$4 sm:$0xff]  }
 0x447   :  { %5394 = vmatprep.subr.bf16.mxu0 %v6989_v21 }
 0x44a   :  { %5395 = vmatpush1.bf16.msra.mxu0 %v6987_v27  ;;  %v7040_v27 = vld [vmem:[#allocation14 + $0x1f4] ss:$8 sps:$4 sm:$0xff]  }
 0x44b   :  { %5396 = vmatprep.subr.bf16.mxu0 %v6992_v25  ;;  %v7038_v25 = vld [vmem:[#allocation14 + $0x1f0] ss:$8 sps:$4 sm:$0xff]  }
 0x44e   :  { %5397 = vmatpush1.bf16.msra.mxu0 %v6990_v26 }
 0x44f   :  { %5407 = vmatprep.subr.bf16.mxu0 %v6995_v28  ;;  %v7043_v28 = vld [vmem:[#allocation14 + $0x204] ss:$8 sps:$4 sm:$0xff]  }
 0x464   :  { %v4317_v34 = vpop.f32.mrb[8].mxu0  ;;  %v7774_v35 = vpop.f32.mrb[20].mxu1 }
 0x465   :  { %v6483_v40 = vadd.f32 %v4317_v34, %v2925_v30  ;;  %v4319_v58 = vpop.f32.mrb[9].mxu0  ;;  %v4401_v42 = vpop.f32.mrb[21].mxu1  ;;  %v6485_v21 = vadd.f32 %v7774_v35, %v2933_v2  ;;  %v7041_v30 = vld [vmem:[#allocation14 + $0x200] ss:$8 sps:$4 sm:$0xff]   ;;  %v7049_v35 = vld [vmem:[#allocation14 + $0x224] ss:$8 sps:$4 sm:$0xff]  }
 0x466   :  { %v6484_v18 = vadd.f32 %v4319_v58, %v2929_v32  ;;  %v6486_v43 = vadd.f32 %v4401_v42, %v2937_v33  ;;  %v4321_v38 = vpop.f32.mrb[10].mxu0  ;;  %v4403_v9 = vpop.f32.mrb[22].mxu1  ;;  %v7046_v33 = vld [vmem:[#allocation14 + $0x214] ss:$8 sps:$4 sm:$0xff]   ;;  %v7138_v34 = vld [vmem:[#allocation17] sm:$0xff]   ;;  %v7140_v42 = vld [vmem:[#allocation17 + $0x8] sm:$0xff]  }
 0x467   :  { %v4570_v44 = vmax.f32 %v6483_v40, 0.0  ;;  %v4322_v45 = vpop.f32.mrb[11].mxu0  ;;  %v4404_v46 = vpop.f32.mrb[23].mxu1  ;;  %v4572_v26 = vmax.f32 %v6485_v21, 0.0  ;;  %v7139_v40 = vld [vmem:[#allocation17 + $0x48] sm:$0xff]   ;;  %6456 = vmatpush3.bf16.msra.mxu1 %v7138_v34  ;;  %v7142_v9 = vld [vmem:[#allocation17 + $0x10] sm:$0xff]  }
 0x468   :  { %v4571_v47 = vmax.f32 %v6484_v18, 0.0  ;;  %v4573_v48 = vmax.f32 %v6486_v43, 0.0  ;;  %v7044_v58 = vld [vmem:[#allocation14 + $0x210] ss:$8 sps:$4 sm:$0xff]   ;;  %6457 = vmatprep.subr.bf16.mxu1 %v7139_v40  ;;  %v7047_v43 = vld [vmem:[#allocation14 + $0x220] ss:$8 sps:$4 sm:$0xff]  }
 0x469   :  { %v4578_v51 = vpack.c.bf16 %v4570_v44, %v4570_v44  ;;  %v4580_v32 = vpack.c.bf16 %v4572_v26, %v4572_v26  ;;  %v7141_v18 = vld [vmem:[#allocation17 + $0x50] sm:$0xff]   ;;  %v7143_v44 = vld [vmem:[#allocation17 + $0x58] sm:$0xff]   ;;  %v7055_v46 = vld [vmem:[#allocation14 + $0x244] ss:$8 sps:$4 sm:$0xff]  }
 0x46a   :  { %v4579_v31 = vpack.c.bf16 %v4571_v47, %v4571_v47  ;;  %v4581_v39 = vpack.c.bf16 %v4573_v48, %v4573_v48  ;;  %v7052_v38 = vld [vmem:[#allocation14 + $0x234] ss:$8 sps:$4 sm:$0xff]   ;;  %v7050_v45 = vld [vmem:[#allocation14 + $0x230] ss:$8 sps:$4 sm:$0xff]   ;;  %v7145_v48 = vld [vmem:[#allocation17 + $0x60] sm:$0xff]  }
 0x46b   :  { %6458 = vmatpush3.bf16.msra.mxu1 %v7140_v42  ;;  %v7144_v47 = vld [vmem:[#allocation17 + $0x18] sm:$0xff]  }
 0x46c   :  { %5398 = vmatprep.mubr.bf16.mxu0 %v4579_v31  ;;  %6459 = vmatprep.subr.bf16.mxu1 %v7141_v18  ;;  %v7053_v31 = vld [vmem:[#allocation14 + $0x240] ss:$8 sps:$4 sm:$0xff]   ;;  %v7092_v42 = vld [vmem:[#allocation14 + $0x310] ss:$8 sps:$4 sm:$0xff]   ;;  %v7097_v18 = vld [vmem:[#allocation14 + $0x324] ss:$8 sps:$4 sm:$0xff]  }
 0x46d   :  { %5399 = vmatmul.mubr.bf16.vlgmr.msra.gmra.mrb[16].mxu0 %v4578_v51  ;;  %v7146_v51 = vld [vmem:[#allocation17 + $0x20] sm:$0xff]  }
 0x46e   :  { %5408 = vmatpush1.bf16.msra.mxu0 %v6993_v49  ;;  %5439 = vmatprep.mubr.bf16.mxu0 %v4581_v39  ;;  %v7058_v49 = vld [vmem:[#allocation14 + $0x254] ss:$8 sps:$4 sm:$0xff]   ;;  %v7056_v39 = vld [vmem:[#allocation14 + $0x250] ss:$8 sps:$4 sm:$0xff]   ;;  %v7089_v34 = vld [vmem:[#allocation14 + $0x300] ss:$8 sps:$4 sm:$0xff]  }
 0x46f   :  { %5409 = vmatprep.subr.bf16.mxu0 %v6998_v52  ;;  %6460 = vmatpush3.bf16.msra.mxu1 %v7142_v9  ;;  %v7147_v52 = vld [vmem:[#allocation17 + $0x68] sm:$0xff]  }
 0x470   :  { %6461 = vmatprep.subr.bf16.mxu1 %v7143_v44  ;;  %v7098_v9 = vld [vmem:[#allocation14 + $0x330] ss:$8 sps:$4 sm:$0xff]   ;;  %v7103_v44 = vld [vmem:[#allocation14 + $0x344] ss:$8 sps:$4 sm:$0xff]  }
 0x472   :  { %5410 = vmatpush1.bf16.msra.mxu0 %v6996_v53  ;;  %v7061_v53 = vld [vmem:[#allocation14 + $0x264] ss:$8 sps:$4 sm:$0xff]  }
 0x473   :  { %5411 = vmatprep.subr.bf16.mxu0 %v7001_v23  ;;  %6462 = vmatpush3.bf16.msra.mxu1 %v7144_v47  ;;  %v7148_v23 = vld [vmem:[#allocation17 + $0x28] sm:$0xff]  }
 0x474   :  { %6463 = vmatprep.subr.bf16.mxu1 %v7145_v48  ;;  %v7104_v47 = vld [vmem:[#allocation14 + $0x350] ss:$8 sps:$4 sm:$0xff]   ;;  %v7109_v48 = vld [vmem:[#allocation14 + $0x364] ss:$8 sps:$4 sm:$0xff]  }
 0x476   :  { %5412 = vmatpush1.bf16.msra.mxu0 %v6999_v54  ;;  %v7059_v54 = vld [vmem:[#allocation14 + $0x260] ss:$8 sps:$4 sm:$0xff]  }
 0x477   :  { %5413 = vmatprep.subr.bf16.mxu0 %v7004_v59  ;;  %6464 = vmatpush3.bf16.msra.mxu1 %v7146_v51  ;;  %v7064_v59 = vld [vmem:[#allocation14 + $0x274] ss:$8 sps:$4 sm:$0xff]   ;;  %v7110_v51 = vld [vmem:[#allocation14 + $0x370] ss:$8 sps:$4 sm:$0xff]  }
 0x478   :  { %6465 = vmatprep.subr.bf16.mxu1 %v7147_v52  ;;  %v7115_v52 = vld [vmem:[#allocation14 + $0x384] ss:$8 sps:$4 sm:$0xff]  }
 0x47a   :  { %5414 = vmatpush1.bf16.msra.mxu0 %v7002_v24  ;;  %v7062_v24 = vld [vmem:[#allocation14 + $0x270] ss:$8 sps:$4 sm:$0xff]  }
 0x47b   :  { %5415 = vmatprep.subr.bf16.mxu0 %v7007_v61  ;;  %6466 = vmatpush3.bf16.msra.mxu1 %v7148_v23  ;;  %v7067_v61 = vld [vmem:[#allocation14 + $0x284] ss:$8 sps:$4 sm:$0xff]   ;;  %v7116_v23 = vld [vmem:[#allocation14 + $0x390] ss:$8 sps:$4 sm:$0xff]  }
 0x47e   :  { %5416 = vmatpush1.bf16.msra.mxu0 %v7005_v41  ;;  %v7065_v41 = vld [vmem:[#allocation14 + $0x280] ss:$8 sps:$4 sm:$0xff]  }
 0x47f   :  { %5417 = vmatprep.subr.bf16.mxu0 %v7010_v55  ;;  %v7070_v55 = vld [vmem:[#allocation14 + $0x294] ss:$8 sps:$4 sm:$0xff]  }
 0x482   :  { %5418 = vmatpush1.bf16.msra.mxu0 %v7008_v56  ;;  %v7068_v56 = vld [vmem:[#allocation14 + $0x290] ss:$8 sps:$4 sm:$0xff]  }
 0x483   :  { %5419 = vmatprep.subr.bf16.mxu0 %v7013_v60  ;;  %v7073_v60 = vld [vmem:[#allocation14 + $0x2a4] ss:$8 sps:$4 sm:$0xff]  }
 0x486   :  { %5420 = vmatpush1.bf16.msra.mxu0 %v7011_v62  ;;  %v7071_v62 = vld [vmem:[#allocation14 + $0x2a0] ss:$8 sps:$4 sm:$0xff]  }
 0x487   :  { %5421 = vmatprep.subr.bf16.mxu0 %v7016_v29  ;;  %v7076_v29 = vld [vmem:[#allocation14 + $0x2b4] ss:$8 sps:$4 sm:$0xff]  }
 0x48a   :  { %5422 = vmatpush1.bf16.msra.mxu0 %v7014_v17  ;;  %v7074_v17 = vld [vmem:[#allocation14 + $0x2b0] ss:$8 sps:$4 sm:$0xff]  }
 0x48b   :  { %5423 = vmatprep.subr.bf16.mxu0 %v7019_v13  ;;  %v7079_v13 = vld [vmem:[#allocation14 + $0x2c4] ss:$8 sps:$4 sm:$0xff]  }
 0x48e   :  { %5424 = vmatpush1.bf16.msra.mxu0 %v7017_v3  ;;  %v7077_v3 = vld [vmem:[#allocation14 + $0x2c0] ss:$8 sps:$4 sm:$0xff]  }
 0x48f   :  { %5425 = vmatprep.subr.bf16.mxu0 %v7022_v4  ;;  %v7082_v4 = vld [vmem:[#allocation14 + $0x2d4] ss:$8 sps:$4 sm:$0xff]  }
 0x492   :  { %5426 = vmatpush1.bf16.msra.mxu0 %v7020_v5  ;;  %v7080_v5 = vld [vmem:[#allocation14 + $0x2d0] ss:$8 sps:$4 sm:$0xff]  }
 0x493   :  { %5427 = vmatprep.subr.bf16.mxu0 %v7025_v6  ;;  %v7085_v6 = vld [vmem:[#allocation14 + $0x2e4] ss:$8 sps:$4 sm:$0xff]  }
 0x496   :  { %5428 = vmatpush1.bf16.msra.mxu0 %v7023_v7  ;;  %v2941_v7 = vrot.slane %v7766_v1, %v248_v57 }
 0x497   :  { %5429 = vmatprep.subr.bf16.mxu0 %v7028_v11  ;;  %v2945_v11 = vrot.slane %v7766_v1, %v252_v36 }
 0x49a   :  { %5430 = vmatpush1.bf16.msra.mxu0 %v7026_v12  ;;  %v7083_v12 = vld [vmem:[#allocation14 + $0x2e0] ss:$8 sps:$4 sm:$0xff]  }
 0x49b   :  { %5431 = vmatprep.subr.bf16.mxu0 %v7031_v14  ;;  %v2953_v14 = vrot.slane %v7766_v1, %v260_v63 }
 0x49e   :  { %5432 = vmatpush1.bf16.msra.mxu0 %v7029_v15  ;;  %v7088_v15 = vld [vmem:[#allocation14 + $0x2f4] ss:$8 sps:$4 sm:$0xff]  }
 0x49f   :  { %5433 = vmatprep.subr.bf16.mxu0 %v7034_v19 }
 0x4a2   :  { %5434 = vmatpush1.bf16.msra.mxu0 %v7032_v16 }
 0x4a3   :  { %5435 = vmatprep.subr.bf16.mxu0 %v7037_v50 }
 0x4a6   :  { %5436 = vmatpush1.bf16.msra.mxu0 %v7035_v20 }
 0x4a7   :  { %5437 = vmatprep.subr.bf16.mxu0 %v7040_v27  ;;  %v7086_v27 = vld [vmem:[#allocation14 + $0x2f0] ss:$8 sps:$4 sm:$0xff]  }
 0x4aa   :  { %5438 = vmatpush1.bf16.msra.mxu0 %v7038_v25 }
 0x4ab   :  { %5448 = vmatprep.subr.bf16.mxu0 %v7043_v28 }
 0x4ad   :  { %5440 = vmatmul.mubr.bf16.vlgmr.msra.gmra.mrb[16].mxu0 %v4580_v32 }
 0x4ae   :  { %5449 = vmatpush1.bf16.msra.mxu0 %v7041_v30  ;;  %v7091_v30 = vld [vmem:[#allocation14 + $0x304] ss:$8 sps:$4 sm:$0xff]  }
 0x4af   :  { %5450 = vmatprep.subr.bf16.mxu0 %v7046_v33 }
 0x4b2   :  { %5451 = vmatpush1.bf16.msra.mxu0 %v7044_v58  ;;  %v7094_v58 = vld [vmem:[#allocation14 + $0x314] ss:$8 sps:$4 sm:$0xff]  }
 0x4b3   :  { %5452 = vmatprep.subr.bf16.mxu0 %v7049_v35 }
 0x4b6   :  { %5453 = vmatpush1.bf16.msra.mxu0 %v7047_v43  ;;  %v7095_v43 = vld [vmem:[#allocation14 + $0x320] ss:$8 sps:$4 sm:$0xff]  }
 0x4b7   :  { %5454 = vmatprep.subr.bf16.mxu0 %v7052_v38  ;;  %v7100_v38 = vld [vmem:[#allocation14 + $0x334] ss:$8 sps:$4 sm:$0xff]  }
 0x4ba   :  { %5455 = vmatpush1.bf16.msra.mxu0 %v7050_v45  ;;  %v7101_v45 = vld [vmem:[#allocation14 + $0x340] ss:$8 sps:$4 sm:$0xff]  }
 0x4bb   :  { %5456 = vmatprep.subr.bf16.mxu0 %v7055_v46  ;;  %v7106_v46 = vld [vmem:[#allocation14 + $0x354] ss:$8 sps:$4 sm:$0xff]  }
 0x4be   :  { %5457 = vmatpush1.bf16.msra.mxu0 %v7053_v31  ;;  %v7107_v31 = vld [vmem:[#allocation14 + $0x360] ss:$8 sps:$4 sm:$0xff]  }
 0x4bf   :  { %5458 = vmatprep.subr.bf16.mxu0 %v7058_v49  ;;  %v7112_v49 = vld [vmem:[#allocation14 + $0x374] ss:$8 sps:$4 sm:$0xff]  }
 0x4c2   :  { %5459 = vmatpush1.bf16.msra.mxu0 %v7056_v39  ;;  %v7113_v39 = vld [vmem:[#allocation14 + $0x380] ss:$8 sps:$4 sm:$0xff]  }
 0x4c3   :  { %5460 = vmatprep.subr.bf16.mxu0 %v7061_v53  ;;  %v7118_v53 = vld [vmem:[#allocation14 + $0x394] ss:$8 sps:$4 sm:$0xff]  }
 0x4c6   :  { %5461 = vmatpush1.bf16.msra.mxu0 %v7059_v54  ;;  %v7121_v54 = vld [vmem:[#allocation14 + $0x3a4] ss:$8 sps:$4 sm:$0xff]  }
 0x4c7   :  { %5462 = vmatprep.subr.bf16.mxu0 %v7064_v59  ;;  %v7119_v59 = vld [vmem:[#allocation14 + $0x3a0] ss:$8 sps:$4 sm:$0xff]  }
 0x4ca   :  { %5463 = vmatpush1.bf16.msra.mxu0 %v7062_v24  ;;  %v7124_v24 = vld [vmem:[#allocation14 + $0x3b4] ss:$8 sps:$4 sm:$0xff]  }
 0x4cb   :  { %5464 = vmatprep.subr.bf16.mxu0 %v7067_v61  ;;  %v7122_v61 = vld [vmem:[#allocation14 + $0x3b0] ss:$8 sps:$4 sm:$0xff]  }
 0x4ce   :  { %5465 = vmatpush1.bf16.msra.mxu0 %v7065_v41  ;;  %v7127_v41 = vld [vmem:[#allocation14 + $0x3c4] ss:$8 sps:$4 sm:$0xff]  }
 0x4cf   :  { %5466 = vmatprep.subr.bf16.mxu0 %v7070_v55  ;;  %v7125_v55 = vld [vmem:[#allocation14 + $0x3c0] ss:$8 sps:$4 sm:$0xff]  }
 0x4d2   :  { %5467 = vmatpush1.bf16.msra.mxu0 %v7068_v56  ;;  %v7130_v56 = vld [vmem:[#allocation14 + $0x3d4] ss:$8 sps:$4 sm:$0xff]  }
 0x4d3   :  { %5468 = vmatprep.subr.bf16.mxu0 %v7073_v60  ;;  %v7128_v60 = vld [vmem:[#allocation14 + $0x3d0] ss:$8 sps:$4 sm:$0xff]  }
 0x4d6   :  { %5469 = vmatpush1.bf16.msra.mxu0 %v7071_v62  ;;  %v2949_v62 = vrot.slane %v7766_v1, %v256_v22  ;;  %v7152_v22 = vld [vmem:[#allocation17 + $0x38] sm:$0xff]  }
 0x4d7   :  { %5470 = vmatprep.subr.bf16.mxu0 %v7076_v29  ;;  %v7133_v29 = vld [vmem:[#allocation14 + $0x3e4] ss:$8 sps:$4 sm:$0xff]   ;;  %v4714_v1 = vld [vmem:[#allocation16] sm:$0x3] }
 0x4da   :  { %5471 = vmatpush1.bf16.msra.mxu0 %v7074_v17  ;;  %v7131_v17 = vld [vmem:[#allocation14 + $0x3e0] ss:$8 sps:$4 sm:$0xff]  }
 0x4db   :  { %5472 = vmatprep.subr.bf16.mxu0 %v7079_v13 }
 0x4de   :  { %5473 = vmatpush1.bf16.msra.mxu0 %v7077_v3  ;;  %v7136_v3 = vld [vmem:[#allocation14 + $0x3f4] ss:$8 sps:$4 sm:$0xff]  }
 0x4df   :  { %5474 = vmatprep.subr.bf16.mxu0 %v7082_v4  ;;  %v7134_v4 = vld [vmem:[#allocation14 + $0x3f0] ss:$8 sps:$4 sm:$0xff]  }
 0x4e2   :  { %5475 = vmatpush1.bf16.msra.mxu0 %v7080_v5 }
 0x4e3   :  { %5476 = vmatprep.subr.bf16.mxu0 %v7085_v6 }
 0x4e4   :  { %v4481_v19 = vpop.f32.mrb[12].mxu0 }
 0x4e5   :  { %v6487_v16 = vadd.f32 %v4481_v19, %v2941_v7  ;;  %v7788_v2 = vpop.f32.mrb[24].mxu1  ;;  %v4483_v50 = vpop.f32.mrb[13].mxu0  ;;  %v7149_v7 = vld [vmem:[#allocation17 + $0x70] sm:$0xff]  }
 0x4e6   :  { %v6488_v20 = vadd.f32 %v4483_v50, %v2945_v11  ;;  %v4565_v21 = vpop.f32.mrb[25].mxu1  ;;  %v4485_v57 = vpop.f32.mrb[14].mxu0  ;;  %5477 = vmatpush1.bf16.msra.mxu0 %v7083_v12  ;;  %v6489_v13 = vadd.f32 %v7788_v2, %v2949_v62  ;;  %v7150_v11 = vld [vmem:[#allocation17 + $0x30] sm:$0xff]   ;;  %6467 = vmatprep.subr.bf16.mxu1 %v7149_v7  ;;  %v4719_v12 = vrot.slane %v4714_v1, %v7641_v0 }
 0x4e7   :  { %v4574_v25 = vmax.f32 %v6487_v16, 0.0  ;;  %v6490_v26 = vadd.f32 %v4565_v21, %v2953_v14  ;;  %v4567_v36 = vpop.f32.mrb[26].mxu1  ;;  %v4486_v28 = vpop.f32.mrb[15].mxu0  ;;  %5478 = vmatprep.subr.bf16.mxu0 %v7088_v15  ;;  %6468 = vmatpush3.bf16.msra.mxu1 %v7150_v11  ;;  %v4723_v14 = vrot.slane %v4714_v1, %v7646_v10 }
 0x4e8   :  { %v4575_v32 = vmax.f32 %v6488_v20, 0.0  ;;  %v4568_v63 = vpop.f32.mrb[27].mxu1  ;;  %v4576_v5 = vmax.f32 %v6489_v13, 0.0  ;;  %6469 = vmatprep.subr.bf16.mxu1 %v7151_v8 }
 0x4e9   :  { %v4577_v33 = vmax.f32 %v6490_v26, 0.0  ;;  %v4582_v40 = vpack.c.bf16 %v4574_v25, %v4574_v25 }
 0x4ea   :  { %v4583_v37 = vpack.c.bf16 %v4575_v32, %v4575_v32  ;;  %5479 = vmatpush1.bf16.msra.mxu0 %v7086_v27  ;;  %v4584_v6 = vpack.c.bf16 %v4576_v5, %v4576_v5 }
 0x4eb   :  { %5489 = vmatprep.subr.bf16.mxu0 %v7091_v30  ;;  %v4585_v35 = vpack.c.bf16 %v4577_v33, %v4577_v33  ;;  %6470 = vmatpush3.bf16.msra.mxu1 %v7152_v22 }
 0x4ec   :  { %5480 = vmatprep.mubr.bf16.mxu0 %v4583_v37 }
 0x4ed   :  { %5481 = vmatmul.mubr.bf16.vlgmr.msra.gmra.mrb[16].mxu0 %v4582_v40 }
 0x4ee   :  { %5490 = vmatpush1.bf16.msra.mxu0 %v7089_v34  ;;  %5521 = vmatprep.mubr.bf16.mxu0 %v4585_v35 }
 0x4ef   :  { %5491 = vmatprep.subr.bf16.mxu0 %v7094_v58 }
 0x4f2   :  { %5492 = vmatpush1.bf16.msra.mxu0 %v7092_v42 }
 0x4f3   :  { %5493 = vmatprep.subr.bf16.mxu0 %v7097_v18 }
 0x4f6   :  { %5494 = vmatpush1.bf16.msra.mxu0 %v7095_v43 }
 0x4f7   :  { %5495 = vmatprep.subr.bf16.mxu0 %v7100_v38 }
 0x4fa   :  { %5496 = vmatpush1.bf16.msra.mxu0 %v7098_v9 }
 0x4fb   :  { %5497 = vmatprep.subr.bf16.mxu0 %v7103_v44 }
 0x4fe   :  { %5498 = vmatpush1.bf16.msra.mxu0 %v7101_v45 }
 0x4ff   :  { %5499 = vmatprep.subr.bf16.mxu0 %v7106_v46 }
 0x502   :  { %5500 = vmatpush1.bf16.msra.mxu0 %v7104_v47 }
 0x503   :  { %5501 = vmatprep.subr.bf16.mxu0 %v7109_v48 }
 0x506   :  { %5502 = vmatpush1.bf16.msra.mxu0 %v7107_v31 }
 0x507   :  { %5503 = vmatprep.subr.bf16.mxu0 %v7112_v49 }
 0x50a   :  { %5504 = vmatpush1.bf16.msra.mxu0 %v7110_v51 }
 0x50b   :  { %5505 = vmatprep.subr.bf16.mxu0 %v7115_v52 }
 0x50e   :  { %5506 = vmatpush1.bf16.msra.mxu0 %v7113_v39 }
 0x50f   :  { %5507 = vmatprep.subr.bf16.mxu0 %v7118_v53 }
 0x512   :  { %5508 = vmatpush1.bf16.msra.mxu0 %v7116_v23 }
 0x513   :  { %5509 = vmatprep.subr.bf16.mxu0 %v7121_v54 }
 0x516   :  { %5510 = vmatpush1.bf16.msra.mxu0 %v7119_v59 }
 0x517   :  { %5511 = vmatprep.subr.bf16.mxu0 %v7124_v24 }
 0x51a   :  { %5512 = vmatpush1.bf16.msra.mxu0 %v7122_v61 }
 0x51b   :  { %5513 = vmatprep.subr.bf16.mxu0 %v7127_v41 }
 0x51e   :  { %5514 = vmatpush1.bf16.msra.mxu0 %v7125_v55 }
 0x51f   :  { %5515 = vmatprep.subr.bf16.mxu0 %v7130_v56 }
 0x522   :  { %5516 = vmatpush1.bf16.msra.mxu0 %v7128_v60 }
 0x523   :  { %5517 = vmatprep.subr.bf16.mxu0 %v7133_v29 }
 0x526   :  { %5518 = vmatpush1.bf16.msra.mxu0 %v7131_v17 }
 0x527   :  { %5519 = vmatprep.subr.bf16.mxu0 %v7136_v3 }
 0x52a   :  { %5520 = vmatpush1.bf16.msra.mxu0 %v7134_v4 }
 0x52d   :  { %5522 = vmatmul.mubr.bf16.vlgmr.msra.gmra.mrb[16].mxu0 %v4584_v6 }
 0x600   :  { %v5523_v15 = vpop.f32.mrb[16].mxu0 }
 0x601   :  { %v6491_v19 = vadd.f32 %v5523_v15, %v4719_v12  ;;  %v5525_v16 = vpop.f32.mrb[17].mxu0 }
 0x602   :  { %v6492_v2 = vadd.f32 %v5525_v16, %v4723_v14  ;;  %v5527_v50 = vpop.f32.mrb[18].mxu0 }
 0x603   :  { %v5530_v20 = vmax.f32 %v6491_v19, 0.0  ;;  %v5528_v21 = vpop.f32.mrb[19].mxu0 }
 0x604   :  { %v5531_v57 = vmax.f32 %v6492_v2, 0.0 }
 0x605   :  { %v5532_v25 = vpack.c.bf16 %v5530_v20, %v5530_v20 }
 0x606   :  { %v5533_v27 = vpack.c.bf16 %v5531_v57, %v5531_v57 }
 0x608   :  { %5694 = vmatprep.mubr.bf16.mxu1 %v5533_v27 }
 0x609   :  { %5695 = vmatmul.mubr.bf16.vlgmr.msra.gmra.mrb[28].mxu1 %v5532_v25 }
 0x6dc   :  { %v6471_v26 = vpop.f32.mrb[28].mxu1 }
 0x6dd   :  { %v6472_v36 = vpop.f32.mrb[29].mxu1 }
 0x6de   :  { %v6473_v28 = vadd.f32 %v6472_v36, %v6471_v26  ;;  %v6474_v30 = vpop.f32.mrb[30].mxu1 }
 0x6df   :  { %v6475_v0 = vpop.f32.mrb[31].mxu1 }
 0x6e0   :  { %v5703_v10 = vsel %vm5702_vm0, %v6473_v28, -inf }
 0x6e1   :  { %5704 = vmax.xlane.f32.xlu0 %v5703_v10 }
 0x76e   :  { %v5705_v32 = vpop.xlane.xlu0 %5704 }
 0x76f   :  { %v5706_v63 = vsub.f32 %v6473_v28, %v5705_v32 }
 0x771   :  { %v5707_v33 = vmul.f32 1.442695, %v5706_v63 }
 0x773   :  { %7153 = vpow2.f32 %v5707_v33 }
 0x77d   :  { %v7154_v37 = vpop.eup %7153 }
 0x77e   :  { %v5709_v34 = vsel %vm5702_vm0, %v7154_v37, 0.0 }
 0x77f   :  { %5710 = vadd.xlane.f32.xlu0 %v5709_v34 }
 0x80c   :  { %v5711_v40 = vpop.xlane.xlu0 %5710 }
 0x80d   :  { %7155 = vrcp.f32 %v5711_v40 }
 0x817   :  { %v7156_v58 = vpop.eup %7155 }
 0x818   :  { %v5713_v35 = vmul.f32 %v7156_v58, %v7154_v37 }
 0x81a   :  { %5714 = vst.msk [vmem:[#allocation19] sm:$0xff] %vm5702_vm0, %v5713_v35 }
 0x81b   :  { %7388 = shalt.err (!%p7385_p0)
}
 0x81c   :  { %s7389_s0 = scalar_lea.hbm %s7821_s10, 128 }
 0x81d   :  { %p7390_p1 = scmp.ne.s32.totalorder %s7821_s10, %s7389_s0  ;;  %p7393_p2 = scmp.lt.u32.totalorder %s7389_s0, %s7821_s10 }
 0x81f   :  { %p7395_p3 = pnand %p7393_p2, %p7390_p1 }
 0x821   :  { %7398 = shalt.err (!%p7395_p3)
}
 0x822   :  { %5724 = dma.vmem_to_hbm [thread:$0]  %s5722_s22, 128, %s7821_s10, [#allocation4]  }
 0x823   :  { %7411 = dma.done.wait [#allocation4], 128  }
 0x824   :  { %7412 = vsyncadd [#allocation4], 4294967168 }
 0x825   :  { %5728 = vsyncpa [#allocation3], 1 }
 0x826   :  { %5729 = vsyncpa [#allocation6], 1 }
 0x827   :  { %5730 = vsyncpa [#allocation9], 1 }
 0x828   :  { %5731 = vsyncpa [#allocation12], 1 }
 0x829   :  { %5732 = vsyncpa [#allocation15], 1 }
 0x82a   :  { %5733 = vsyncpa [#allocation18], 1 }
 0x82b   :  { %5734 = vsyncpa [#allocation4], 1 }

</bundles_post_ra>
